<compile_context>
chip_gen: v6e
topology: v6e:2x2x1
jax: 0.10.0
libtpu: 0.0.40
codegen_flags: <defaults>
</compile_context>

<pallas_src>
import jax
import jax.numpy as jnp
from jax.experimental import pallas as pl
from jax.experimental.pallas import tpu as pltpu

_SQRT_HALF = 0.7071067811865476
_BN_EPS = 1e-5


def _erf_poly(x):
    # Abramowitz & Stegun 7.1.26 polynomial erf approximation (|err| < 1.5e-7).
    # Uses only abs/exp/mul/add/div/where, all of which lower cleanly in Mosaic.
    p = 0.3275911
    a1, a2, a3, a4, a5 = (0.254829592, -0.284496736, 1.421413741,
                          -1.453152027, 1.061405429)
    z = jnp.abs(x)
    t = 1.0 / (1.0 + p * z)
    poly = ((((a5 * t + a4) * t + a3) * t + a2) * t + a1) * t
    e = 1.0 - poly * jnp.exp(-z * z)
    return jnp.where(x >= 0, e, -e)


def _gelu(x):
    # Exact (erf-based) GELU, matching PyTorch nn.GELU() default.
    return 0.5 * x * (1.0 + _erf_poly(x * _SQRT_HALF))


# ---------------------------------------------------------------------------
# Fused InvResFFN kernel: one grid step per image (NHWC, channels on lanes)
# ---------------------------------------------------------------------------
def _invres_ffn_kernel(x_ref, w1_ref, b1_ref, wdw_ref, b2_ref, w3_ref, b3_ref,
                       o_ref, pad_ref):
    _, H, W, Cin = x_ref.shape
    Chid = w1_ref.shape[1]
    KH = KW = 3  # the module hardcodes a 3x3 / padding=1 depthwise conv

    x = x_ref[0].astype(jnp.float32)               # (H, W, Cin)
    xm = x.reshape(H * W, Cin)                     # (HW, Cin)

    # --- 1x1 expand conv (+ folded BN1) + GELU : one (HW,Cin)x(Cin,Chid) MXU matmul
    h1 = jnp.dot(xm, w1_ref[...], preferred_element_type=jnp.float32) + b1_ref[...]
    h1 = _gelu(h1)                                 # (HW, Chid)

    # --- 3x3 depthwise conv (+ folded BN2) + GELU : 9 shifted VPU FMAs over a
    #     zero-padded VMEM scratch (kept in VMEM, never touches HBM).
    pad_ref[...] = jnp.zeros_like(pad_ref)
    pad_ref[pl.ds(1, H), pl.ds(1, W), :] = h1.reshape(H, W, Chid)
    acc = jnp.zeros((H, W, Chid), jnp.float32)
    for dy in range(KH):
        for dx in range(KW):
            tap = wdw_ref[pl.ds(dy * KW + dx, 1), :].reshape(1, 1, Chid)
            acc = acc + pad_ref[pl.ds(dy, H), pl.ds(dx, W), :] * tap
    h2 = _gelu(acc.reshape(H * W, Chid) + b2_ref[...])

    # --- 1x1 project conv (+ folded BN3) + identity shortcut, fused in VMEM
    out = (jnp.dot(h2, w3_ref[...], preferred_element_type=jnp.float32)
           + b3_ref[...] + xm)
    o_ref[0] = out.reshape(H, W, Cin).astype(o_ref.dtype)


# ---------------------------------------------------------------------------
# Wrapper: fold BN into conv weights/biases, single NCHW<->NHWC transpose pair
# ---------------------------------------------------------------------------
def invres_ffn_forward(x_nchw, params):
    N, C, H, W = x_nchw.shape
    Chid = params["w1"].shape[0]

    def fold(conv_b, gamma, beta, mean, var):
        s = gamma / jnp.sqrt(var + _BN_EPS)
        return s, (conv_b - mean) * s + beta

    s1, b1e = fold(params["b1"], params["bn1_g"], params["bn1_b"],
                   params["bn1_m"], params["bn1_v"])
    s2, b2e = fold(params["b_dw"], params["bn2_g"], params["bn2_b"],
                   params["bn2_m"], params["bn2_v"])
    s3, b3e = fold(params["b3"], params["bn3_g"], params["bn3_b"],
                   params["bn3_m"], params["bn3_v"])

    # conv1: (Chid, Cin, 1, 1) -> (Cin, Chid) scaled per output channel
    w1e = params["w1"][:, :, 0, 0].T * s1[None, :]
    # depthwise: (Chid, 1, 3, 3) -> (9, Chid), row = dy*3 + dx
    wdwe = jnp.transpose(params["w_dw"][:, 0], (1, 2, 0)).reshape(9, Chid) * s2[None, :]
    # conv3: (Cin, Chid, 1, 1) -> (Chid, Cin) scaled per output channel
    w3e = params["w3"][:, :, 0, 0].T * s3[None, :]

    x_nhwc = jnp.transpose(x_nchw, (0, 2, 3, 1))

    out_nhwc = pl.pallas_call(
        _invres_ffn_kernel,
        out_shape=jax.ShapeDtypeStruct((N, H, W, C), x_nchw.dtype),
        grid=(N,),
        in_specs=[
            pl.BlockSpec((1, H, W, C), lambda n: (n, 0, 0, 0)),
            pl.BlockSpec((C, Chid), lambda n: (0, 0)),
            pl.BlockSpec((1, Chid), lambda n: (0, 0)),
            pl.BlockSpec((9, Chid), lambda n: (0, 0)),
            pl.BlockSpec((1, Chid), lambda n: (0, 0)),
            pl.BlockSpec((Chid, C), lambda n: (0, 0)),
            pl.BlockSpec((1, C), lambda n: (0, 0)),
        ],
        out_specs=pl.BlockSpec((1, H, W, C), lambda n: (n, 0, 0, 0)),
        scratch_shapes=[pltpu.VMEM((H + 2, W + 2, Chid), jnp.float32)],
        compiler_params=pltpu.CompilerParams(
            dimension_semantics=("parallel",),
            vmem_limit_bytes=32 * 1024 * 1024),
    )(x_nhwc, w1e, b1e.reshape(1, Chid), wdwe, b2e.reshape(1, Chid),
      w3e, b3e.reshape(1, C))

    return jnp.transpose(out_nhwc, (0, 3, 1, 2))


# ---------------------------------------------------------------------------
# Deterministic parameters (mirrors the PyTorch module's shapes, eval-mode BN)
# ---------------------------------------------------------------------------
def make_params(key, n_in, expand=4):
    chid = n_in * expand
    ks = jax.random.split(key, 18)
    nrm, uni = jax.random.normal, jax.random.uniform
    return dict(
        w1=0.2 * nrm(ks[0], (chid, n_in, 1, 1), jnp.float32),
        b1=0.05 * nrm(ks[1], (chid,), jnp.float32),
        bn1_g=1.0 + 0.1 * nrm(ks[2], (chid,), jnp.float32),
        bn1_b=0.1 * nrm(ks[3], (chid,), jnp.float32),
        bn1_m=0.1 * nrm(ks[4], (chid,), jnp.float32),
        bn1_v=0.5 + uni(ks[5], (chid,), jnp.float32),
        w_dw=0.2 * nrm(ks[6], (chid, 1, 3, 3), jnp.float32),
        b_dw=0.05 * nrm(ks[7], (chid,), jnp.float32),
        bn2_g=1.0 + 0.1 * nrm(ks[8], (chid,), jnp.float32),
        bn2_b=0.1 * nrm(ks[9], (chid,), jnp.float32),
        bn2_m=0.1 * nrm(ks[10], (chid,), jnp.float32),
        bn2_v=0.5 + uni(ks[11], (chid,), jnp.float32),
        w3=0.2 * nrm(ks[12], (n_in, chid, 1, 1), jnp.float32),
        b3=0.05 * nrm(ks[13], (n_in,), jnp.float32),
        bn3_g=1.0 + 0.1 * nrm(ks[14], (n_in,), jnp.float32),
        bn3_b=0.1 * nrm(ks[15], (n_in,), jnp.float32),
        bn3_m=0.1 * nrm(ks[16], (n_in,), jnp.float32),
        bn3_v=0.5 + uni(ks[17], (n_in,), jnp.float32),
    )


# ---------------------------------------------------------------------------
# Pure-JAX reference (mirrors the PyTorch forward, eval-mode BN) for checking
# ---------------------------------------------------------------------------
def ref_forward(x, params):
    def bn(y, g, b, m, v):
        inv = 1.0 / jnp.sqrt(v + _BN_EPS)
        return ((y - m[None, :, None, None]) * inv[None, :, None, None]
                * g[None, :, None, None] + b[None, :, None, None])

    def conv(y, w, b, padding=0, groups=1):
        out = jax.lax.conv_general_dilated(
            y, w, (1, 1), [(padding, padding), (padding, padding)],
            dimension_numbers=("NCHW", "OIHW", "NCHW"),
            feature_group_count=groups)
        return out + b[None, :, None, None]

    def gelu(y):  # exact GELU (PyTorch nn.GELU default)
        return 0.5 * y * (1.0 + jax.lax.erf(y * _SQRT_HALF))

    chid = params["w1"].shape[0]
    x_ = x
    h = gelu(bn(conv(x, params["w1"], params["b1"]),
                params["bn1_g"], params["bn1_b"], params["bn1_m"], params["bn1_v"]))
    h = gelu(bn(conv(h, params["w_dw"], params["b_dw"], padding=1, groups=chid),
                params["bn2_g"], params["bn2_b"], params["bn2_m"], params["bn2_v"]))
    out = bn(conv(h, params["w3"], params["b3"]),
             params["bn3_g"], params["bn3_b"], params["bn3_m"], params["bn3_v"]) + x_
    return out


if __name__ == "__main__":
    key = jax.random.PRNGKey(0)
    # small but lane-friendly: hidden channels = n_in * expand = 128
    N, n_in, H, W, expand = 2, 32, 16, 16, 4

    kx, kp = jax.random.split(key)
    x = jax.random.normal(kx, (N, n_in, H, W), jnp.float32)
    params = make_params(kp, n_in, expand)

    out = invres_ffn_forward(x, params)
    out = jax.block_until_ready(out)
    assert out.shape == (N, n_in, H, W)

    ref = ref_forward(x, params)
    if not jnp.allclose(out, ref, rtol=1e-3, atol=1e-3):
        raise AssertionError(
            f"Pallas/reference mismatch, max err = {float(jnp.max(jnp.abs(out - ref)))}")

    print("KERNEL_OK")
</pallas_src>

<mosaic_0001>
module attributes {stable_mosaic.version = 11 : i64} {
  func.func @_invres_ffn_kernel(%arg0: i32, %arg1: memref<1x16x16x32xf32, #tpu.memory_space<vmem>>, %arg2: memref<32x128xf32, #tpu.memory_space<vmem>>, %arg3: memref<1x128xf32, #tpu.memory_space<vmem>>, %arg4: memref<9x128xf32, #tpu.memory_space<vmem>>, %arg5: memref<1x128xf32, #tpu.memory_space<vmem>>, %arg6: memref<128x32xf32, #tpu.memory_space<vmem>>, %arg7: memref<1x32xf32, #tpu.memory_space<vmem>>, %arg8: memref<1x16x16x32xf32, #tpu.memory_space<vmem>>, %arg9: memref<18x18x128xf32, #tpu.memory_space<vmem>>) attributes {dimension_semantics = [#tpu.dimension_semantics<parallel>], iteration_bounds = array<i64: 2>, scalar_prefetch = 0 : i64, scratch_operands = 1 : i64, tpu.core_type = #tpu.core_type<tc>, window_params = [{transform_indices = @transform_0, window_bounds = array<i64: 1, 16, 16, 32>}, {pipeline_mode = #tpu.pipeline_mode<synchronous>, transform_indices = @transform_1, window_bounds = array<i64: 32, 128>}, {pipeline_mode = #tpu.pipeline_mode<synchronous>, transform_indices = @transform_2, window_bounds = array<i64: 1, 128>}, {pipeline_mode = #tpu.pipeline_mode<synchronous>, transform_indices = @transform_3, window_bounds = array<i64: 9, 128>}, {pipeline_mode = #tpu.pipeline_mode<synchronous>, transform_indices = @transform_4, window_bounds = array<i64: 1, 128>}, {pipeline_mode = #tpu.pipeline_mode<synchronous>, transform_indices = @transform_5, window_bounds = array<i64: 128, 32>}, {pipeline_mode = #tpu.pipeline_mode<synchronous>, transform_indices = @transform_6, window_bounds = array<i64: 1, 32>}, {transform_indices = @transform_7, window_bounds = array<i64: 1, 16, 16, 32>}]} {
    %c0 = arith.constant 0 : index
    %c0_0 = arith.constant 0 : index
    %c0_1 = arith.constant 0 : index
    %c0_2 = arith.constant 0 : index
    %0 = vector.load %arg1[%c0, %c0_0, %c0_1, %c0_2] : memref<1x16x16x32xf32, #tpu.memory_space<vmem>>, vector<1x16x16x32xf32>
    %1 = vector.shape_cast %0 : vector<1x16x16x32xf32> to vector<16x16x32xf32>
    %2 = vector.shape_cast %1 : vector<16x16x32xf32> to vector<256x32xf32>
    %c0_3 = arith.constant 0 : index
    %c0_4 = arith.constant 0 : index
    %3 = vector.load %arg2[%c0_3, %c0_4] : memref<32x128xf32, #tpu.memory_space<vmem>>, vector<32x128xf32>
    %cst = arith.constant dense<0.000000e+00> : vector<256x128xf32>
    %4 = tpu.matmul %2, %3, %cst {dimension_numbers = #tpu.dot_dimension_numbers<[1], [0], [0], [1], [0, 0, 1, 1], [], []>} : vector<256x32xf32>, vector<32x128xf32>, vector<256x128xf32> -> vector<256x128xf32>
    %c0_5 = arith.constant 0 : index
    %c0_6 = arith.constant 0 : index
    %5 = vector.load %arg3[%c0_5, %c0_6] : memref<1x128xf32, #tpu.memory_space<vmem>>, vector<1x128xf32>
    %6 = vector.broadcast %5 : vector<1x128xf32> to vector<256x128xf32>
    %7 = arith.addf %4, %6 : vector<256x128xf32>
    %cst_7 = arith.constant 5.000000e-01 : f32
    %8 = vector.broadcast %cst_7 : f32 to vector<256x128xf32>
    %9 = arith.mulf %8, %7 : vector<256x128xf32>
    %cst_8 = arith.constant 0.707106769 : f32
    %10 = vector.broadcast %cst_8 : f32 to vector<256x128xf32>
    %11 = arith.mulf %7, %10 : vector<256x128xf32>
    %12 = math.absf %11 : vector<256x128xf32>
    %cst_9 = arith.constant 0.327591091 : f32
    %13 = vector.broadcast %cst_9 : f32 to vector<256x128xf32>
    %14 = arith.mulf %13, %12 : vector<256x128xf32>
    %cst_10 = arith.constant 1.000000e+00 : f32
    %15 = vector.broadcast %cst_10 : f32 to vector<256x128xf32>
    %16 = arith.addf %15, %14 : vector<256x128xf32>
    %cst_11 = arith.constant 1.000000e+00 : f32
    %17 = vector.broadcast %cst_11 : f32 to vector<256x128xf32>
    %18 = arith.divf %17, %16 : vector<256x128xf32>
    %cst_12 = arith.constant 1.06140542 : f32
    %19 = vector.broadcast %cst_12 : f32 to vector<256x128xf32>
    %20 = arith.mulf %19, %18 : vector<256x128xf32>
    %cst_13 = arith.constant -1.45315206 : f32
    %21 = vector.broadcast %cst_13 : f32 to vector<256x128xf32>
    %22 = arith.addf %20, %21 : vector<256x128xf32>
    %23 = arith.mulf %22, %18 : vector<256x128xf32>
    %cst_14 = arith.constant 1.42141378 : f32
    %24 = vector.broadcast %cst_14 : f32 to vector<256x128xf32>
    %25 = arith.addf %23, %24 : vector<256x128xf32>
    %26 = arith.mulf %25, %18 : vector<256x128xf32>
    %cst_15 = arith.constant -0.284496725 : f32
    %27 = vector.broadcast %cst_15 : f32 to vector<256x128xf32>
    %28 = arith.addf %26, %27 : vector<256x128xf32>
    %29 = arith.mulf %28, %18 : vector<256x128xf32>
    %cst_16 = arith.constant 0.254829586 : f32
    %30 = vector.broadcast %cst_16 : f32 to vector<256x128xf32>
    %31 = arith.addf %29, %30 : vector<256x128xf32>
    %32 = arith.mulf %31, %18 : vector<256x128xf32>
    %cst_17 = arith.constant 0.000000e+00 : f32
    %33 = vector.broadcast %cst_17 : f32 to vector<256x128xf32>
    %34 = arith.subf %33, %12 : vector<256x128xf32>
    %35 = arith.mulf %34, %12 : vector<256x128xf32>
    %36 = math.exp %35 : vector<256x128xf32>
    %37 = arith.mulf %32, %36 : vector<256x128xf32>
    %cst_18 = arith.constant 1.000000e+00 : f32
    %38 = vector.broadcast %cst_18 : f32 to vector<256x128xf32>
    %39 = arith.subf %38, %37 : vector<256x128xf32>
    %cst_19 = arith.constant 0.000000e+00 : f32
    %40 = vector.broadcast %cst_19 : f32 to vector<256x128xf32>
    %41 = arith.cmpf oge, %11, %40 : vector<256x128xf32>
    %cst_20 = arith.constant 0.000000e+00 : f32
    %42 = vector.broadcast %cst_20 : f32 to vector<256x128xf32>
    %43 = arith.subf %42, %39 : vector<256x128xf32>
    %44 = arith.select %41, %39, %43 : vector<256x128xi1>, vector<256x128xf32>
    %cst_21 = arith.constant 1.000000e+00 : f32
    %45 = vector.broadcast %cst_21 : f32 to vector<256x128xf32>
    %46 = arith.addf %45, %44 : vector<256x128xf32>
    %47 = arith.mulf %9, %46 : vector<256x128xf32>
    %cst_22 = arith.constant 0.000000e+00 : f32
    %48 = vector.broadcast %cst_22 : f32 to vector<18x18x128xf32>
    %c0_23 = arith.constant 0 : index
    %c0_24 = arith.constant 0 : index
    %c0_25 = arith.constant 0 : index
    %49 = vector.load %arg9[%c0_23, %c0_24, %c0_25] : memref<18x18x128xf32, #tpu.memory_space<vmem>>, vector<18x18x128xf32>
    tpu.vector_store %arg9[%c0_23, %c0_24, %c0_25], %48 {strides = array<i32>} : memref<18x18x128xf32, #tpu.memory_space<vmem>>, vector<18x18x128xf32>,
    %50 = vector.shape_cast %47 : vector<256x128xf32> to vector<16x16x128xf32>
    %c1 = arith.constant 1 : index
    %c1_26 = arith.constant 1 : index
    %c0_27 = arith.constant 0 : index
    %51 = vector.load %arg9[%c1, %c1_26, %c0_27] : memref<18x18x128xf32, #tpu.memory_space<vmem>>, vector<16x16x128xf32>
    tpu.vector_store %arg9[%c1, %c1_26, %c0_27], %50 {strides = array<i32>} : memref<18x18x128xf32, #tpu.memory_space<vmem>>, vector<16x16x128xf32>,
    %cst_28 = arith.constant 0.000000e+00 : f32
    %52 = vector.broadcast %cst_28 : f32 to vector<16x16x128xf32>
    %c0_29 = arith.constant 0 : index
    %c0_30 = arith.constant 0 : index
    %53 = vector.load %arg4[%c0_29, %c0_30] : memref<9x128xf32, #tpu.memory_space<vmem>>, vector<1x128xf32>
    %54 = vector.shape_cast %53 : vector<1x128xf32> to vector<1x1x128xf32>
    %c0_31 = arith.constant 0 : index
    %c0_32 = arith.constant 0 : index
    %c0_33 = arith.constant 0 : index
    %55 = vector.load %arg9[%c0_31, %c0_32, %c0_33] : memref<18x18x128xf32, #tpu.memory_space<vmem>>, vector<16x16x128xf32>
    %56 = vector.broadcast %54 : vector<1x1x128xf32> to vector<16x16x128xf32>
    %57 = arith.mulf %55, %56 : vector<16x16x128xf32>
    %58 = arith.addf %52, %57 : vector<16x16x128xf32>
    %c1_34 = arith.constant 1 : index
    %c0_35 = arith.constant 0 : index
    %59 = vector.load %arg4[%c1_34, %c0_35] : memref<9x128xf32, #tpu.memory_space<vmem>>, vector<1x128xf32>
    %60 = vector.shape_cast %59 : vector<1x128xf32> to vector<1x1x128xf32>
    %c0_36 = arith.constant 0 : index
    %c1_37 = arith.constant 1 : index
    %c0_38 = arith.constant 0 : index
    %61 = vector.load %arg9[%c0_36, %c1_37, %c0_38] : memref<18x18x128xf32, #tpu.memory_space<vmem>>, vector<16x16x128xf32>
    %62 = vector.broadcast %60 : vector<1x1x128xf32> to vector<16x16x128xf32>
    %63 = arith.mulf %61, %62 : vector<16x16x128xf32>
    %64 = arith.addf %58, %63 : vector<16x16x128xf32>
    %c2 = arith.constant 2 : index
    %c0_39 = arith.constant 0 : index
    %65 = vector.load %arg4[%c2, %c0_39] : memref<9x128xf32, #tpu.memory_space<vmem>>, vector<1x128xf32>
    %66 = vector.shape_cast %65 : vector<1x128xf32> to vector<1x1x128xf32>
    %c0_40 = arith.constant 0 : index
    %c2_41 = arith.constant 2 : index
    %c0_42 = arith.constant 0 : index
    %67 = vector.load %arg9[%c0_40, %c2_41, %c0_42] : memref<18x18x128xf32, #tpu.memory_space<vmem>>, vector<16x16x128xf32>
    %68 = vector.broadcast %66 : vector<1x1x128xf32> to vector<16x16x128xf32>
    %69 = arith.mulf %67, %68 : vector<16x16x128xf32>
    %70 = arith.addf %64, %69 : vector<16x16x128xf32>
    %c3 = arith.constant 3 : index
    %c0_43 = arith.constant 0 : index
    %71 = vector.load %arg4[%c3, %c0_43] : memref<9x128xf32, #tpu.memory_space<vmem>>, vector<1x128xf32>
    %72 = vector.shape_cast %71 : vector<1x128xf32> to vector<1x1x128xf32>
    %c1_44 = arith.constant 1 : index
    %c0_45 = arith.constant 0 : index
    %c0_46 = arith.constant 0 : index
    %73 = vector.load %arg9[%c1_44, %c0_45, %c0_46] : memref<18x18x128xf32, #tpu.memory_space<vmem>>, vector<16x16x128xf32>
    %74 = vector.broadcast %72 : vector<1x1x128xf32> to vector<16x16x128xf32>
    %75 = arith.mulf %73, %74 : vector<16x16x128xf32>
    %76 = arith.addf %70, %75 : vector<16x16x128xf32>
    %c4 = arith.constant 4 : index
    %c0_47 = arith.constant 0 : index
    %77 = vector.load %arg4[%c4, %c0_47] : memref<9x128xf32, #tpu.memory_space<vmem>>, vector<1x128xf32>
    %78 = vector.shape_cast %77 : vector<1x128xf32> to vector<1x1x128xf32>
    %c1_48 = arith.constant 1 : index
    %c1_49 = arith.constant 1 : index
    %c0_50 = arith.constant 0 : index
    %79 = vector.load %arg9[%c1_48, %c1_49, %c0_50] : memref<18x18x128xf32, #tpu.memory_space<vmem>>, vector<16x16x128xf32>
    %80 = vector.broadcast %78 : vector<1x1x128xf32> to vector<16x16x128xf32>
    %81 = arith.mulf %79, %80 : vector<16x16x128xf32>
    %82 = arith.addf %76, %81 : vector<16x16x128xf32>
    %c5 = arith.constant 5 : index
    %c0_51 = arith.constant 0 : index
    %83 = vector.load %arg4[%c5, %c0_51] : memref<9x128xf32, #tpu.memory_space<vmem>>, vector<1x128xf32>
    %84 = vector.shape_cast %83 : vector<1x128xf32> to vector<1x1x128xf32>
    %c1_52 = arith.constant 1 : index
    %c2_53 = arith.constant 2 : index
    %c0_54 = arith.constant 0 : index
    %85 = vector.load %arg9[%c1_52, %c2_53, %c0_54] : memref<18x18x128xf32, #tpu.memory_space<vmem>>, vector<16x16x128xf32>
    %86 = vector.broadcast %84 : vector<1x1x128xf32> to vector<16x16x128xf32>
    %87 = arith.mulf %85, %86 : vector<16x16x128xf32>
    %88 = arith.addf %82, %87 : vector<16x16x128xf32>
    %c6 = arith.constant 6 : index
    %c0_55 = arith.constant 0 : index
    %89 = vector.load %arg4[%c6, %c0_55] : memref<9x128xf32, #tpu.memory_space<vmem>>, vector<1x128xf32>
    %90 = vector.shape_cast %89 : vector<1x128xf32> to vector<1x1x128xf32>
    %c2_56 = arith.constant 2 : index
    %c0_57 = arith.constant 0 : index
    %c0_58 = arith.constant 0 : index
    %91 = vector.load %arg9[%c2_56, %c0_57, %c0_58] : memref<18x18x128xf32, #tpu.memory_space<vmem>>, vector<16x16x128xf32>
    %92 = vector.broadcast %90 : vector<1x1x128xf32> to vector<16x16x128xf32>
    %93 = arith.mulf %91, %92 : vector<16x16x128xf32>
    %94 = arith.addf %88, %93 : vector<16x16x128xf32>
    %c7 = arith.constant 7 : index
    %c0_59 = arith.constant 0 : index
    %95 = vector.load %arg4[%c7, %c0_59] : memref<9x128xf32, #tpu.memory_space<vmem>>, vector<1x128xf32>
    %96 = vector.shape_cast %95 : vector<1x128xf32> to vector<1x1x128xf32>
    %c2_60 = arith.constant 2 : index
    %c1_61 = arith.constant 1 : index
    %c0_62 = arith.constant 0 : index
    %97 = vector.load %arg9[%c2_60, %c1_61, %c0_62] : memref<18x18x128xf32, #tpu.memory_space<vmem>>, vector<16x16x128xf32>
    %98 = vector.broadcast %96 : vector<1x1x128xf32> to vector<16x16x128xf32>
    %99 = arith.mulf %97, %98 : vector<16x16x128xf32>
    %100 = arith.addf %94, %99 : vector<16x16x128xf32>
    %c8 = arith.constant 8 : index
    %c0_63 = arith.constant 0 : index
    %101 = vector.load %arg4[%c8, %c0_63] : memref<9x128xf32, #tpu.memory_space<vmem>>, vector<1x128xf32>
    %102 = vector.shape_cast %101 : vector<1x128xf32> to vector<1x1x128xf32>
    %c2_64 = arith.constant 2 : index
    %c2_65 = arith.constant 2 : index
    %c0_66 = arith.constant 0 : index
    %103 = vector.load %arg9[%c2_64, %c2_65, %c0_66] : memref<18x18x128xf32, #tpu.memory_space<vmem>>, vector<16x16x128xf32>
    %104 = vector.broadcast %102 : vector<1x1x128xf32> to vector<16x16x128xf32>
    %105 = arith.mulf %103, %104 : vector<16x16x128xf32>
    %106 = arith.addf %100, %105 : vector<16x16x128xf32>
    %107 = vector.shape_cast %106 : vector<16x16x128xf32> to vector<256x128xf32>
    %c0_67 = arith.constant 0 : index
    %c0_68 = arith.constant 0 : index
    %108 = vector.load %arg5[%c0_67, %c0_68] : memref<1x128xf32, #tpu.memory_space<vmem>>, vector<1x128xf32>
    %109 = vector.broadcast %108 : vector<1x128xf32> to vector<256x128xf32>
    %110 = arith.addf %107, %109 : vector<256x128xf32>
    %cst_69 = arith.constant 5.000000e-01 : f32
    %111 = vector.broadcast %cst_69 : f32 to vector<256x128xf32>
    %112 = arith.mulf %111, %110 : vector<256x128xf32>
    %cst_70 = arith.constant 0.707106769 : f32
    %113 = vector.broadcast %cst_70 : f32 to vector<256x128xf32>
    %114 = arith.mulf %110, %113 : vector<256x128xf32>
    %115 = math.absf %114 : vector<256x128xf32>
    %cst_71 = arith.constant 0.327591091 : f32
    %116 = vector.broadcast %cst_71 : f32 to vector<256x128xf32>
    %117 = arith.mulf %116, %115 : vector<256x128xf32>
    %cst_72 = arith.constant 1.000000e+00 : f32
    %118 = vector.broadcast %cst_72 : f32 to vector<256x128xf32>
    %119 = arith.addf %118, %117 : vector<256x128xf32>
    %cst_73 = arith.constant 1.000000e+00 : f32
    %120 = vector.broadcast %cst_73 : f32 to vector<256x128xf32>
    %121 = arith.divf %120, %119 : vector<256x128xf32>
    %cst_74 = arith.constant 1.06140542 : f32
    %122 = vector.broadcast %cst_74 : f32 to vector<256x128xf32>
    %123 = arith.mulf %122, %121 : vector<256x128xf32>
    %cst_75 = arith.constant -1.45315206 : f32
    %124 = vector.broadcast %cst_75 : f32 to vector<256x128xf32>
    %125 = arith.addf %123, %124 : vector<256x128xf32>
    %126 = arith.mulf %125, %121 : vector<256x128xf32>
    %cst_76 = arith.constant 1.42141378 : f32
    %127 = vector.broadcast %cst_76 : f32 to vector<256x128xf32>
    %128 = arith.addf %126, %127 : vector<256x128xf32>
    %129 = arith.mulf %128, %121 : vector<256x128xf32>
    %cst_77 = arith.constant -0.284496725 : f32
    %130 = vector.broadcast %cst_77 : f32 to vector<256x128xf32>
    %131 = arith.addf %129, %130 : vector<256x128xf32>
    %132 = arith.mulf %131, %121 : vector<256x128xf32>
    %cst_78 = arith.constant 0.254829586 : f32
    %133 = vector.broadcast %cst_78 : f32 to vector<256x128xf32>
    %134 = arith.addf %132, %133 : vector<256x128xf32>
    %135 = arith.mulf %134, %121 : vector<256x128xf32>
    %cst_79 = arith.constant 0.000000e+00 : f32
    %136 = vector.broadcast %cst_79 : f32 to vector<256x128xf32>
    %137 = arith.subf %136, %115 : vector<256x128xf32>
    %138 = arith.mulf %137, %115 : vector<256x128xf32>
    %139 = math.exp %138 : vector<256x128xf32>
    %140 = arith.mulf %135, %139 : vector<256x128xf32>
    %cst_80 = arith.constant 1.000000e+00 : f32
    %141 = vector.broadcast %cst_80 : f32 to vector<256x128xf32>
    %142 = arith.subf %141, %140 : vector<256x128xf32>
    %cst_81 = arith.constant 0.000000e+00 : f32
    %143 = vector.broadcast %cst_81 : f32 to vector<256x128xf32>
    %144 = arith.cmpf oge, %114, %143 : vector<256x128xf32>
    %cst_82 = arith.constant 0.000000e+00 : f32
    %145 = vector.broadcast %cst_82 : f32 to vector<256x128xf32>
    %146 = arith.subf %145, %142 : vector<256x128xf32>
    %147 = arith.select %144, %142, %146 : vector<256x128xi1>, vector<256x128xf32>
    %cst_83 = arith.constant 1.000000e+00 : f32
    %148 = vector.broadcast %cst_83 : f32 to vector<256x128xf32>
    %149 = arith.addf %148, %147 : vector<256x128xf32>
    %150 = arith.mulf %112, %149 : vector<256x128xf32>
    %c0_84 = arith.constant 0 : index
    %c0_85 = arith.constant 0 : index
    %151 = vector.load %arg6[%c0_84, %c0_85] : memref<128x32xf32, #tpu.memory_space<vmem>>, vector<128x32xf32>
    %cst_86 = arith.constant dense<0.000000e+00> : vector<256x32xf32>
    %152 = tpu.matmul %150, %151, %cst_86 {dimension_numbers = #tpu.dot_dimension_numbers<[1], [0], [0], [1], [0, 0, 1, 1], [], []>} : vector<256x128xf32>, vector<128x32xf32>, vector<256x32xf32> -> vector<256x32xf32>
    %c0_87 = arith.constant 0 : index
    %c0_88 = arith.constant 0 : index
    %153 = vector.load %arg7[%c0_87, %c0_88] : memref<1x32xf32, #tpu.memory_space<vmem>>, vector<1x32xf32>
    %154 = vector.broadcast %153 : vector<1x32xf32> to vector<256x32xf32>
    %155 = arith.addf %152, %154 : vector<256x32xf32>
    %156 = arith.addf %155, %2 : vector<256x32xf32>
    %157 = vector.shape_cast %156 : vector<256x32xf32> to vector<16x16x32xf32>
    %c0_89 = arith.constant 0 : index
    %c0_90 = arith.constant 0 : index
    %c0_91 = arith.constant 0 : index
    %c0_92 = arith.constant 0 : index
    %158 = vector.load %arg8[%c0_89, %c0_90, %c0_91, %c0_92] : memref<1x16x16x32xf32, #tpu.memory_space<vmem>>, vector<1x16x16x32xf32>
    %159 = vector.shape_cast %158 : vector<1x16x16x32xf32> to vector<16x16x32xf32>
    %160 = vector.shape_cast %157 : vector<16x16x32xf32> to vector<1x16x16x32xf32>
    tpu.vector_store %arg8[%c0_89, %c0_90, %c0_91, %c0_92], %160 {strides = array<i32>} : memref<1x16x16x32xf32, #tpu.memory_space<vmem>>, vector<1x16x16x32xf32>,
    return
  }
  func.func @transform_0(%arg0: i32) -> (i32, i32, i32, i32) {
    %c0_i32 = arith.constant 0 : i32
    %c0_i32_0 = arith.constant 0 : i32
    %c0_i32_1 = arith.constant 0 : i32
    %c0_i32_2 = arith.constant 0 : i32
    return %arg0, %c0_i32, %c0_i32_0, %c0_i32_1 : i32, i32, i32, i32
  }
  func.func @transform_1(%arg0: i32) -> (i32, i32) {
    %c0_i32 = arith.constant 0 : i32
    %c0_i32_0 = arith.constant 0 : i32
    %c0_i32_1 = arith.constant 0 : i32
    return %c0_i32, %c0_i32_0 : i32, i32
  }
  func.func @transform_2(%arg0: i32) -> (i32, i32) {
    %c0_i32 = arith.constant 0 : i32
    %c0_i32_0 = arith.constant 0 : i32
    %c0_i32_1 = arith.constant 0 : i32
    return %c0_i32, %c0_i32_0 : i32, i32
  }
  func.func @transform_3(%arg0: i32) -> (i32, i32) {
    %c0_i32 = arith.constant 0 : i32
    %c0_i32_0 = arith.constant 0 : i32
    %c0_i32_1 = arith.constant 0 : i32
    return %c0_i32, %c0_i32_0 : i32, i32
  }
  func.func @transform_4(%arg0: i32) -> (i32, i32) {
    %c0_i32 = arith.constant 0 : i32
    %c0_i32_0 = arith.constant 0 : i32
    %c0_i32_1 = arith.constant 0 : i32
    return %c0_i32, %c0_i32_0 : i32, i32
  }
  func.func @transform_5(%arg0: i32) -> (i32, i32) {
    %c0_i32 = arith.constant 0 : i32
    %c0_i32_0 = arith.constant 0 : i32
    %c0_i32_1 = arith.constant 0 : i32
    return %c0_i32, %c0_i32_0 : i32, i32
  }
  func.func @transform_6(%arg0: i32) -> (i32, i32) {
    %c0_i32 = arith.constant 0 : i32
    %c0_i32_0 = arith.constant 0 : i32
    %c0_i32_1 = arith.constant 0 : i32
    return %c0_i32, %c0_i32_0 : i32, i32
  }
  func.func @transform_7(%arg0: i32) -> (i32, i32, i32, i32) {
    %c0_i32 = arith.constant 0 : i32
    %c0_i32_0 = arith.constant 0 : i32
    %c0_i32_1 = arith.constant 0 : i32
    %c0_i32_2 = arith.constant 0 : i32
    return %arg0, %c0_i32, %c0_i32_0, %c0_i32_1 : i32, i32, i32, i32
  }
}

</mosaic_0001>

<bundles_post_ra>
// kernel: tpu_custom_call.1
= control target key start
LH: loop header
LB: loop body
LE: loop exit
PB: predicated region body
PF: predicated region fallthrough
CT: control target
= control target key end

     0   :  { %12 = vsyncpa [#allocation4], 0  ;;  %s7225_s0 = inlined_call_operand.hbm [shape: f32[2,16,16,32], index: 0, kind: input, shape index: {}]   ;;  %s7226_s1 = inlined_call_operand.vmem [shape: f32[32,128], index: 1, kind: input, shape index: {}]   ;;  %s7227_s2 = inlined_call_operand.vmem [shape: f32[1,128], index: 2, kind: input, shape index: {}]   ;;  %s7228_s3 = inlined_call_operand.vmem [shape: f32[9,128], index: 3, kind: input, shape index: {}]   ;;  %s7229_s4 = inlined_call_operand.vmem [shape: f32[1,128], index: 4, kind: input, shape index: {}]   ;;  %s7230_s5 = inlined_call_operand.vmem [shape: f32[128,32], index: 5, kind: input, shape index: {}]   ;;  %s7231_s6 = inlined_call_operand.vmem [shape: f32[1,32], index: 6, kind: input, shape index: {}]   ;;  %s7232_s7 = inlined_call_operand.hbm [shape: f32[2,16,16,32], index: 7, kind: output, shape index: {}]  }
   0x1   :  { %14 = vsyncpa [#allocation4 + $0x1], 0 }
   0x2   :  { %15 = vsyncpa [#allocation5], 0 }
   0x3   :  { %17 = vsyncpa [#allocation5 + $0x1], 0  ;;  %s4640_s24 = smov 0   ;;  %s4642_s25 = smov 0  }
   0x4   :  { %s4644_s26 = smov 0   ;;  %s4646_s27 = smov 0  }
   0x5 LB: > { %s4661_s28 = sadd.s32 4294967295, %s4591_s27   ;;  %s3825_s29 = sadd.s32 4294967294, %s4591_s27   ;;  %s4591_s27 = sphi %s4646_s27, %s7247_s27   ;;  %s4587_s26 = sphi %s4644_s26, %s7246_s26   ;;  %s4583_s25 = sphi %s4642_s25, %s7245_s25   ;;  %s4579_s24 = sphi %s4640_s24, %s7244_s24  }
   0x6   : > { %s4665_s30 = sadd.s32 1, %s4591_s27   ;;  %s30_s8 = sadd.s32 1, %s4587_s26 }
   0x7   : > { %s27_s9 = ssub.s32 %s4591_s27, %s4665_s30  ;;  %p37_p0 = scmp.ne.s32.totalorder %s4587_s26, %s4583_s25 }
   0x8   : > { %p28_p1 = scmp.eq.s32.totalorder %s27_s9, 0  ;;  %p38_p2 = scmp.eq.s32.totalorder %s4591_s27, 0 }
   0x9   : > { %p43_p3 = scmp.ne.s32.totalorder %s4583_s25, %s4579_s24  ;;  %p44_p4 = scmp.eq.s32.totalorder %s4661_s28, 0 }
   0xa   : > { %s4677_s10 = scalar_select %p28_p1, %s4587_s26, %s30_s8  }
   0xb   : > { %p4679_p5 = por %p38_p2, %p37_p0  ;;  %p4683_p6 = por %p44_p4, %p43_p3 }
   0xc   : > { %p193_p7 = scmp.eq.s32.totalorder %s4661_s28, 1  ;;  %p199_p8 = scmp.eq.s32.totalorder %s3825_s29, 1 }
   0xd   : > { %s7236_s12 = scalar_select %p4683_p6, 1, 0 }
   0xe   : > { %p4149_p10 = scmp.lt.s32.totalorder %s4591_s27, 2  ;;  %p4690_p11 = por %p193_p7, %p37_p0 }
   0xf   : > { %p4694_p12 = por %p199_p8, %p43_p3  ;;  %s237_s15 = sand.u32 1, %s4587_s26  }
  0x10   : > { %s7237_s13 = scalar_select %p4690_p11, 1, 0 }
  0x11   : > { %s7238_s14 = scalar_select %p4694_p12, 1, 0 }
  0x12   : > { %s3883_s16 = sshll.u32 %s4591_s27, 12  ;;  %s3828_s17 = sshll.u32 %s237_s15, 8 }
  0x13   : > { %s4703_s20 = scalar_lea.hbm %s7225_s0, %s3883_s16  ;;  %s241_s21 = scalar_lea.vmem [#allocation3], %s3828_s17 }
  0x14   : > { %s248_s22 = sshll.u32 %s241_s21, 4  ;;  %p4707_p13 = pnand %p4149_p10, %p4679_p5  ;;  %s4711_s22 = int_to_ptr.vmem [resolvable:$true] %s248_s22 }
  0x15   : > { %s4713_s29 = scalar_lea.sflag [#allocation4], %s237_s15  ;;  %s4499_s8 = scalar_lea.hbm %s4703_s20, 4096 }
  0x16   : > { %p4500_p0 = scmp.ne.s32.totalorder %s4703_s20, %s4499_s8  ;;  %p4501_p1 = pneg %p4707_p13 }
  0x17   : > { %s4504_s17 = scalar_lea.hbm %s7225_s0, 8192  ;;  %p4505_p4 = scmp.lt.s32.totalorder %s4703_s20, %s7225_s0 }
  0x18   : > { %p4502_p2 = pnand %p4501_p1, %p4500_p0  ;;  %p4506_p5 = scmp.lt.s32.totalorder %s4504_s17, %s4499_s8 }
  0x1a   : > { %p4503_p3 = pneg %p4502_p2  ;;  %p4507_p7 = por %p4506_p5, %p4505_p4 }
  0x1c   : > { %p4508_p8 = pnand %p4507_p7, %p4503_p3 }
  0x1e   : > { %4511 = shalt.err (!%p4508_p8)
}
  0x1f   : > { %s4512_s15 = scalar_lea.vmem %s4711_s22, 4096  ;;  %s4593_s19 = smov [#allocation3]  }
  0x20   : > { %p4513_p10 = scmp.ne.s32.totalorder %s4711_s22, %s4512_s15  ;;  %s4517_s21 = sshll.u32 %s4593_s19, 4  ;;  %s4518_s21 = int_to_ptr.vmem [resolvable:$false] %s4517_s21 }
  0x21   : > { %s4519_s9 = scalar_lea.vmem %s4518_s21, 8192  ;;  %p4520_p2 = scmp.lt.s32.totalorder %s4711_s22, %s4518_s21 }
  0x22   : > { %p4515_p9 = pnand %p4513_p10, %p4501_p1  ;;  %p4521_p12 = scmp.lt.s32.totalorder %s4519_s9, %s4512_s15 }
  0x24   : > { %p4516_p0 = pneg %p4515_p9  ;;  %p4522_p11 = por %p4521_p12, %p4520_p2 }
  0x26   : > { %p4523_p6 = pnand %p4522_p11, %p4516_p0 }
  0x28   : > { %4526 = shalt.err (!%p4523_p6)
}
  0x29   : > { %s4594_s8 = smov 128   ;;  %s4595_s16 = smov 8  }
  0x2a   : > { %4144 = dma.hbm_to_vmem [thread:$0]  (!%p4707_p13), %s4703_s20, 4096, %s4711_s22, %s4713_s29, %s4594_s8, %s4594_s8, %s4595_s16  }
  0x2b   : > { %p3831_p9 = scmp.ge.s32.totalorder %s4591_s27, 1  ;;  %p256_p1 = scmp.lt.s32.totalorder %s4591_s27, 3 }
  0x2d   : > { %p257_p3 = pnand %p3831_p9, %p256_p1 }
  0x2e   : > { %s4737_s17 = sand.u32 (!%p257_p3), 1, %s4583_s25   ;;  %p7240_p6 = scmp.ne.s32.totalorder (!%p257_p3), %s7236_s12, 0 }
  0x2f   : > { %260 = sbr.rel (%p257_p3) target bundleno = 1076 (0x434), region = 48  ;;  %s3832_s11 = sshll.u32 (!%p257_p3), %s4737_s17, 8 }
  0x30   : > { %s263_s18 = scalar_lea.sflag (!%p257_p3), [#allocation4], %s4737_s17  ;;  %s4743_s15 = scalar_lea.vmem (!%p257_p3), [#allocation3], %s3832_s11 }
  0x34   : > { %4570 = dma.done.wait (%p7240_p6), %s263_s18, 4096  }
  0x35   : > { %4572 = vsyncadd (%p7240_p6), %s263_s18, 4294963200  ;;  %vm340_vm0 = vcmask 261120   ;;  %v332_v0 = vld [vmem:[%s7226_s1 + $0x18] sm:$0xff]  ;;  %v331_v1 = vld [vmem:[%s7226_s1 + $0x10] sm:$0xff]  ;;  %v4596_v36 = vmov 0.0   ;;  %s7017_s9 = scalar_lea.vmem [#allocation6], %s3832_s11 }
  0x36   : > { %3969 = vmatprep.subr.mxu0 %v332_v0  ;;  %v297_v2 = vld [vmem:[%s4743_s15] sm:$0xff]  ;;  %v330_v3 = vld [vmem:[%s7226_s1 + $0x8] sm:$0xff]  ;;  %v329_v4 = vld [vmem:[%s7226_s1] sm:$0xff]  ;;  %1530 = vst [vmem:[#allocation2 + $0x20] sm:$0xff] %v4596_v36  ;;  %s3884_s11 = sshll.u32 %s4661_s28, 12  ;;  %s3752_s8 = sshll.u32 %s7017_s9, 4  ;;  %s7177_s8 = int_to_ptr.vmem [resolvable:$true] %s3752_s8 }
  0x37   : > { %3970 = vmatpush3.msra.mxu0 %v332_v0  ;;  %3977 = vmatprep.mubr.msk.f32.mxu0 %vm340_vm0, %v297_v2  ;;  %v298_v5 = vld [vmem:[%s4743_s15 + $0x8] sm:$0xff]  ;;  %v299_v6 = vld [vmem:[%s4743_s15 + $0x10] sm:$0xff]  ;;  %v300_v7 = vld [vmem:[%s4743_s15 + $0x18] sm:$0xff]  ;;  %1531 = vst [vmem:[#allocation2 + $0x28] sm:$0x3] %v4596_v36  ;;  %s7175_s20 = scalar_lea.hbm %s7232_s7, %s3884_s11  ;;  %s3739_s28 = scalar_lea.sflag [#allocation5], %s4737_s17 }
  0x38   : > { %3971 = vmatprep.subr.mxu0 %v331_v1  ;;  %v301_v8 = vld [vmem:[%s4743_s15 + $0x20] sm:$0xff]  ;;  %v302_v9 = vld [vmem:[%s4743_s15 + $0x28] sm:$0xff]  ;;  %v303_v10 = vld [vmem:[%s4743_s15 + $0x30] sm:$0xff]  ;;  %1526 = vst [vmem:[#allocation2] sm:$0xff] %v4596_v36  ;;  %s4527_s22 = scalar_lea.vmem %s7177_s8, 4096  ;;  %p7241_p12 = scmp.ne.s32.totalorder %s7237_s13, 0 }
  0x39   : > { %3972 = vmatpush3.msra.mxu0 %v331_v1  ;;  %v304_v11 = vld [vmem:[%s4743_s15 + $0x38] sm:$0xff]  ;;  %v305_v12 = vld [vmem:[%s4743_s15 + $0x40] sm:$0xff]  ;;  %v306_v13 = vld [vmem:[%s4743_s15 + $0x48] sm:$0xff]  ;;  %1527 = vst [vmem:[#allocation2 + $0x8] sm:$0xff] %v4596_v36  ;;  %p4528_p11 = scmp.ne.s32.totalorder %s7177_s8, %s4527_s22  ;;  %s4597_s23 = smov [#allocation6]  }
  0x3a   : > { %3973 = vmatprep.subr.mxu0 %v330_v3  ;;  %v307_v14 = vld [vmem:[%s4743_s15 + $0x50] sm:$0xff]  ;;  %v308_v15 = vld [vmem:[%s4743_s15 + $0x58] sm:$0xff]  ;;  %v309_v16 = vld [vmem:[%s4743_s15 + $0x60] sm:$0xff]  ;;  %1528 = vst [vmem:[#allocation2 + $0x10] sm:$0x3] %v4596_v36  ;;  %s4531_s29 = sshll.u32 %s4597_s23, 4  ;;  %s4532_s29 = int_to_ptr.vmem [resolvable:$false] %s4531_s29 }
  0x3b   : > { %3974 = vmatpush3.msra.mxu0 %v330_v3  ;;  %v310_v17 = vld [vmem:[%s4743_s15 + $0x68] sm:$0xff]  ;;  %v311_v18 = vld [vmem:[%s4743_s15 + $0x70] sm:$0xff]  ;;  %v312_v19 = vld [vmem:[%s4743_s15 + $0x78] sm:$0xff]  ;;  %1529 = vst [vmem:[#allocation2 + $0x18] sm:$0xff] %v4596_v36  ;;  %p4529_p13 = pnand %p4528_p11, %p7241_p12  ;;  %s4533_s19 = scalar_lea.vmem %s4532_s29, 8192 }
  0x3c   : > { %3975 = vmatprep.subr.mxu0 %v329_v4  ;;  %v313_v20 = vld [vmem:[%s4743_s15 + $0x80] sm:$0xff]  ;;  %v314_v21 = vld [vmem:[%s4743_s15 + $0x88] sm:$0xff]  ;;  %v315_v22 = vld [vmem:[%s4743_s15 + $0x90] sm:$0xff]  ;;  %1532 = vst [vmem:[#allocation2 + $0x30] sm:$0xff] %v4596_v36  ;;  %p4534_p5 = scmp.lt.s32.totalorder %s7177_s8, %s4532_s29  ;;  %p4535_p7 = scmp.lt.s32.totalorder %s4533_s19, %s4527_s22 }
  0x3d   : > { %3976 = vmatpush3.msra.mxu0 %v329_v4  ;;  %v316_v23 = vld [vmem:[%s4743_s15 + $0x98] sm:$0xff]  ;;  %v317_v24 = vld [vmem:[%s4743_s15 + $0xa0] sm:$0xff]  ;;  %v318_v25 = vld [vmem:[%s4743_s15 + $0xa8] sm:$0xff]  ;;  %1533 = vst [vmem:[#allocation2 + $0x38] sm:$0xff] %v4596_v36  ;;  %p4530_p4 = pneg %p4529_p13 }
  0x3e   : > { %3978 = vmatmul.mubr.msk.f32.vlgmr.msra.gmra.mxu0 %vm340_vm0, %v298_v5  ;;  %v319_v26 = vld [vmem:[%s4743_s15 + $0xb0] sm:$0xff]  ;;  %v320_v27 = vld [vmem:[%s4743_s15 + $0xb8] sm:$0xff]  ;;  %v321_v28 = vld [vmem:[%s4743_s15 + $0xc0] sm:$0xff]  ;;  %1534 = vst [vmem:[#allocation2 + $0x40] sm:$0x3] %v4596_v36  ;;  %p4536_p8 = por %p4535_p7, %p4534_p5 }
  0x3f   : > { %3980 = vmatprep.mubr.msk.f32.mxu0 %vm340_vm0, %v299_v6  ;;  %v322_v29 = vld [vmem:[%s4743_s15 + $0xc8] sm:$0xff]  ;;  %v323_v30 = vld [vmem:[%s4743_s15 + $0xd0] sm:$0xff]  ;;  %v324_v31 = vld [vmem:[%s4743_s15 + $0xd8] sm:$0xff]  ;;  %1535 = vst [vmem:[#allocation2 + $0x48] sm:$0xff] %v4596_v36 }
  0x40   : > { %v325_v32 = vld [vmem:[%s4743_s15 + $0xe0] sm:$0xff]  ;;  %v326_v33 = vld [vmem:[%s4743_s15 + $0xe8] sm:$0xff]  ;;  %v327_v34 = vld [vmem:[%s4743_s15 + $0xf0] sm:$0xff]  ;;  %1536 = vst [vmem:[#allocation2 + $0x50] sm:$0xff] %v4596_v36  ;;  %p4537_p10 = pnand %p4536_p8, %p4530_p4 }
  0x41   : > { %v328_v35 = vld [vmem:[%s4743_s15 + $0xf8] sm:$0xff]  ;;  %1537 = vst [vmem:[#allocation2 + $0x58] sm:$0x3] %v4596_v36  ;;  %1538 = vst [vmem:[#allocation2 + $0x60] sm:$0xff] %v4596_v36  ;;  %v4828_v37 = vld [vmem:[%s7227_s2] ss:$0 sm:$0xff] }
  0x42   : > { %3981 = vmatmul.mubr.msk.f32.gmra.mxu0 %vm340_vm0, %v300_v7  ;;  %1539 = vst [vmem:[#allocation2 + $0x68] sm:$0xff] %v4596_v36  ;;  %1540 = vst [vmem:[#allocation2 + $0x70] sm:$0x3] %v4596_v36 }
  0x43   : > { %3983 = vmatprep.mubr.msk.f32.mxu0 %vm340_vm0, %v301_v8  ;;  %1541 = vst [vmem:[#allocation2 + $0x78] sm:$0xff] %v4596_v36  ;;  %1542 = vst [vmem:[#allocation2 + $0x80] sm:$0xff] %v4596_v36 }
  0x44   : > { %1543 = vst [vmem:[#allocation2 + $0x88] sm:$0x3] %v4596_v36  ;;  %1544 = vst [vmem:[#allocation2 + $0x90] sm:$0xff] %v4596_v36 }
  0x45   : > { %1545 = vst [vmem:[#allocation2 + $0x98] sm:$0xff] %v4596_v36  ;;  %1546 = vst [vmem:[#allocation2 + $0xa0] sm:$0x3] %v4596_v36 }
  0x46   : > { %3984 = vmatmul.mubr.msk.f32.gmra.mxu0 %vm340_vm0, %v302_v9  ;;  %1547 = vst [vmem:[#allocation2 + $0xa8] sm:$0xff] %v4596_v36  ;;  %1548 = vst [vmem:[#allocation2 + $0xb0] sm:$0xff] %v4596_v36 }
  0x47   : > { %3986 = vmatprep.mubr.msk.f32.mxu0 %vm340_vm0, %v303_v10  ;;  %1549 = vst [vmem:[#allocation2 + $0xb8] sm:$0x3] %v4596_v36  ;;  %1550 = vst [vmem:[#allocation2 + $0xc0] sm:$0xff] %v4596_v36 }
  0x48   : > { %1551 = vst [vmem:[#allocation2 + $0xc8] sm:$0xff] %v4596_v36  ;;  %1552 = vst [vmem:[#allocation2 + $0xd0] sm:$0x3] %v4596_v36 }
  0x49   : > { %1553 = vst [vmem:[#allocation2 + $0xd8] sm:$0xff] %v4596_v36  ;;  %1554 = vst [vmem:[#allocation2 + $0xe0] sm:$0xff] %v4596_v36 }
  0x4a   : > { %3987 = vmatmul.mubr.msk.f32.gmra.mxu0 %vm340_vm0, %v304_v11  ;;  %1555 = vst [vmem:[#allocation2 + $0xe8] sm:$0x3] %v4596_v36  ;;  %1556 = vst [vmem:[#allocation2 + $0xf0] sm:$0xff] %v4596_v36 }
  0x4b   : > { %3989 = vmatprep.mubr.msk.f32.mxu0 %vm340_vm0, %v305_v12  ;;  %1557 = vst [vmem:[#allocation2 + $0xf8] sm:$0xff] %v4596_v36  ;;  %1558 = vst [vmem:[#allocation2 + $0x100] sm:$0x3] %v4596_v36 }
  0x4c   : > { %1559 = vst [vmem:[#allocation2 + $0x108] sm:$0xff] %v4596_v36  ;;  %1560 = vst [vmem:[#allocation2 + $0x110] sm:$0xff] %v4596_v36 }
  0x4d   : > { %1561 = vst [vmem:[#allocation2 + $0x118] sm:$0x3] %v4596_v36  ;;  %1562 = vst [vmem:[#allocation2 + $0x120] sm:$0xff] %v4596_v36 }
  0x4e   : > { %3990 = vmatmul.mubr.msk.f32.gmra.mxu0 %vm340_vm0, %v306_v13  ;;  %1563 = vst [vmem:[#allocation2 + $0x128] sm:$0xff] %v4596_v36  ;;  %1564 = vst [vmem:[#allocation2 + $0x130] sm:$0x3] %v4596_v36 }
  0x4f   : > { %3992 = vmatprep.mubr.msk.f32.mxu0 %vm340_vm0, %v307_v14  ;;  %1565 = vst [vmem:[#allocation2 + $0x138] sm:$0xff] %v4596_v36  ;;  %1566 = vst [vmem:[#allocation2 + $0x140] sm:$0xff] %v4596_v36 }
  0x50   : > { %1567 = vst [vmem:[#allocation2 + $0x148] sm:$0x3] %v4596_v36  ;;  %1568 = vst [vmem:[#allocation2 + $0x150] sm:$0xff] %v4596_v36 }
  0x51   : > { %1569 = vst [vmem:[#allocation2 + $0x158] sm:$0xff] %v4596_v36  ;;  %1570 = vst [vmem:[#allocation2 + $0x160] sm:$0x3] %v4596_v36 }
  0x52   : > { %3993 = vmatmul.mubr.msk.f32.gmra.mxu0 %vm340_vm0, %v308_v15  ;;  %1571 = vst [vmem:[#allocation2 + $0x168] sm:$0xff] %v4596_v36  ;;  %1572 = vst [vmem:[#allocation2 + $0x170] sm:$0xff] %v4596_v36 }
  0x53   : > { %3995 = vmatprep.mubr.msk.f32.mxu0 %vm340_vm0, %v309_v16  ;;  %1573 = vst [vmem:[#allocation2 + $0x178] sm:$0x3] %v4596_v36  ;;  %1574 = vst [vmem:[#allocation2 + $0x180] sm:$0xff] %v4596_v36 }
  0x54   : > { %1575 = vst [vmem:[#allocation2 + $0x188] sm:$0xff] %v4596_v36  ;;  %1576 = vst [vmem:[#allocation2 + $0x190] sm:$0x3] %v4596_v36 }
  0x55   : > { %1577 = vst [vmem:[#allocation2 + $0x198] sm:$0xff] %v4596_v36  ;;  %1578 = vst [vmem:[#allocation2 + $0x1a0] sm:$0xff] %v4596_v36 }
  0x56   : > { %3996 = vmatmul.mubr.msk.f32.gmra.mxu0 %vm340_vm0, %v310_v17  ;;  %1579 = vst [vmem:[#allocation2 + $0x1a8] sm:$0x3] %v4596_v36 }
  0x57   : > { %3998 = vmatprep.mubr.msk.f32.mxu0 %vm340_vm0, %v311_v18 }
  0x5a   : > { %3999 = vmatmul.mubr.msk.f32.gmra.mxu0 %vm340_vm0, %v312_v19 }
  0x5b   : > { %4001 = vmatprep.mubr.msk.f32.mxu0 %vm340_vm0, %v313_v20 }
  0x5e   : > { %4002 = vmatmul.mubr.msk.f32.gmra.mxu0 %vm340_vm0, %v314_v21 }
  0x5f   : > { %4004 = vmatprep.mubr.msk.f32.mxu0 %vm340_vm0, %v315_v22 }
  0x62   : > { %4005 = vmatmul.mubr.msk.f32.gmra.mxu0 %vm340_vm0, %v316_v23 }
  0x63   : > { %4007 = vmatprep.mubr.msk.f32.mxu0 %vm340_vm0, %v317_v24 }
  0x66   : > { %4008 = vmatmul.mubr.msk.f32.gmra.mxu0 %vm340_vm0, %v318_v25 }
  0x67   : > { %4010 = vmatprep.mubr.msk.f32.mxu0 %vm340_vm0, %v319_v26 }
  0x6a   : > { %4011 = vmatmul.mubr.msk.f32.gmra.mxu0 %vm340_vm0, %v320_v27 }
  0x6b   : > { %4013 = vmatprep.mubr.msk.f32.mxu0 %vm340_vm0, %v321_v28 }
  0x6e   : > { %4014 = vmatmul.mubr.msk.f32.gmra.mxu0 %vm340_vm0, %v322_v29 }
  0x6f   : > { %4016 = vmatprep.mubr.msk.f32.mxu0 %vm340_vm0, %v323_v30 }
  0x72   : > { %4017 = vmatmul.mubr.msk.f32.gmra.mxu0 %vm340_vm0, %v324_v31 }
  0x73   : > { %4019 = vmatprep.mubr.msk.f32.mxu0 %vm340_vm0, %v325_v32 }
  0x76   : > { %4020 = vmatmul.mubr.msk.f32.gmra.mxu0 %vm340_vm0, %v326_v33 }
  0x77   : > { %4022 = vmatprep.mubr.msk.f32.mxu0 %vm340_vm0, %v327_v34 }
  0x7a   : > { %4023 = vmatmul.mubr.msk.f32.gmra.mxu0 %vm340_vm0, %v328_v35 }
  0xfe   : > { %v3979_v38 = vpop.f32.mrf.mxu0 }
  0xff   : > { %v509_v39 = vadd.f32 %v3979_v38, %v4828_v37 }
 0x100   : > { %v503_v40 = vpop.f32.mrf.mxu0 }
 0x101   : > { %v4831_v41 = vmul.f32 0.70710677, %v509_v39  ;;  %v4834_v42 = vadd.f32 %v4828_v37, %v503_v40  ;;  %v4874_v22 = vmul.f32 0.5, %v509_v39 }
 0x102   : > { %v3982_v43 = vpop.f32.mrf.mxu0 }
 0x103   : > { %v727_v44 = vand.u32 2147483647, %v4831_v41  ;;  %v4838_v45 = vmul.f32 0.70710677, %v4834_v42  ;;  %v4841_v46 = vadd.f32 %v3982_v43, %v4828_v37  ;;  %vm1367_vm1 = vcmp.ge.f32.partialorder %v4831_v41, 0.0 }
 0x104   : > { %v513_v47 = vpop.f32.mrf.mxu0 }
 0x105   : > { %v759_v48 = vmul.f32 0.3275911, %v727_v44  ;;  %v726_v49 = vand.u32 2147483647, %v4838_v45  ;;  %v1175_v50 = vsub.f32 0.0, %v727_v44  ;;  %v4848_v52 = vadd.f32 %v4828_v37, %v513_v47 }
 0x106   : > { %v4845_v51 = vmul.f32 0.70710677, %v4841_v46  ;;  %v3985_v53 = vpop.f32.mrf.mxu0  ;;  %vm1366_vm2 = vcmp.ge.f32.partialorder %v4838_v45, 0.0 }
 0x107   : > { %v791_v54 = vadd.f32 1.0, %v759_v48  ;;  %v758_v55 = vmul.f32 0.3275911, %v726_v49  ;;  %v1174_v56 = vsub.f32 0.0, %v726_v49  ;;  %v4852_v58 = vmul.f32 0.70710677, %v4848_v52 }
 0x108   : > { %v729_v57 = vand.u32 2147483647, %v4845_v51  ;;  %v523_v59 = vpop.f32.mrf.mxu0  ;;  %v1207_v61 = vmul.f32 %v1175_v50, %v727_v44  ;;  %v4856_v3 = vadd.f32 %v3985_v53, %v4828_v37  ;;  %v4891_v44 = vmul.f32 0.5, %v4834_v42 }
 0x109   : > { %4188 = vrcp.f32 %v791_v54  ;;  %v790_v60 = vadd.f32 1.0, %v758_v55  ;;  %v728_v0 = vand.u32 2147483647, %v4852_v58  ;;  %v1206_v2 = vmul.f32 %v1174_v56, %v726_v49 }
 0x10a   : > { %v761_v62 = vmul.f32 0.3275911, %v729_v57  ;;  %v1177_v63 = vsub.f32 0.0, %v729_v57  ;;  %v3988_v1 = vpop.f32.mrf.mxu0  ;;  %v4859_v4 = vadd.f32 %v4828_v37, %v523_v59  ;;  %v4862_v9 = vmul.f32 0.70710677, %v4856_v3 }
 0x10b   : > { %4190 = vrcp.f32 %v790_v60  ;;  %v760_v7 = vmul.f32 0.3275911, %v728_v0  ;;  %v1176_v8 = vsub.f32 0.0, %v728_v0  ;;  %v1240_v10 = vmul.f32 1.442695, %v1207_v61 }
 0x10c   : > { %v793_v5 = vadd.f32 1.0, %v761_v62  ;;  %v1209_v6 = vmul.f32 %v1177_v63, %v729_v57  ;;  %v533_v12 = vpop.f32.mrf.mxu0  ;;  %v1238_v13 = vmul.f32 1.442695, %v1206_v2  ;;  %v731_v15 = vand.u32 2147483647, %v4862_v9 }
 0x10d   : > { %v792_v11 = vadd.f32 1.0, %v760_v7  ;;  %v1208_v14 = vmul.f32 %v1176_v8, %v728_v0  ;;  %v4866_v16 = vmul.f32 0.70710677, %v4859_v4  ;;  %v4869_v18 = vadd.f32 %v3988_v1, %v4828_v37 }
 0x10e   : > { %4192 = vrcp.f32 %v793_v5  ;;  %v1244_v17 = vmul.f32 1.442695, %v1209_v6  ;;  %v763_v19 = vmul.f32 0.3275911, %v731_v15  ;;  %v1179_v20 = vsub.f32 0.0, %v731_v15  ;;  %v3991_v25 = vpop.f32.mrf.mxu0 }
 0x10f   : > { %4194 = vrcp.f32 %v792_v11  ;;  %v4872_v21 = vadd.f32 %v4828_v37, %v533_v12  ;;  %v730_v23 = vand.u32 2147483647, %v4866_v16  ;;  %v4878_v24 = vmul.f32 0.70710677, %v4869_v18 }
 0x110   : > { %4196 = vpow2.f32 %v1240_v10  ;;  %v1242_v26 = vmul.f32 1.442695, %v1208_v14  ;;  %v795_v27 = vadd.f32 1.0, %v763_v19  ;;  %v1211_v28 = vmul.f32 %v1179_v20, %v731_v15  ;;  %v543_v59 = vpop.f32.mrf.mxu0 }
 0x111   : > { %4198 = vpow2.f32 %v1238_v13  ;;  %v762_v29 = vmul.f32 0.3275911, %v730_v23  ;;  %v1178_v30 = vsub.f32 0.0, %v730_v23  ;;  %v733_v31 = vand.u32 2147483647, %v4878_v24 }
 0x112   : > { %4200 = vpow2.f32 %v1244_v17  ;;  %v1248_v32 = vmul.f32 1.442695, %v1211_v28  ;;  %v4882_v33 = vmul.f32 0.70710677, %v4872_v21  ;;  %v4885_v34 = vadd.f32 %v3991_v25, %v4828_v37 }
 0x113   : > { %4202 = vrcp.f32 %v795_v27  ;;  %v794_v36 = vadd.f32 1.0, %v762_v29  ;;  %v1210_v38 = vmul.f32 %v1178_v30, %v730_v23  ;;  %v765_v39 = vmul.f32 0.3275911, %v733_v31 }
 0x114   : > { %v1181_v40 = vsub.f32 0.0, %v733_v31  ;;  %4204 = vpow2.f32 %v1242_v26  ;;  %v732_v47 = vand.u32 2147483647, %v4882_v33  ;;  %v4895_v48 = vmul.f32 0.5, %v4841_v46 }
 0x115   : > { %v4898_v49 = vmul.f32 0.5, %v4848_v52  ;;  %4206 = vrcp.f32 %v794_v36  ;;  %v797_v50 = vadd.f32 1.0, %v765_v39  ;;  %v1246_v60 = vmul.f32 1.442695, %v1210_v38  ;;  %v3994_v36 = vpop.f32.mrf.mxu0 }
 0x116   : > { %v4887_v35 = vpop.eup %4188  ;;  %v1213_v55 = vmul.f32 %v1181_v40, %v733_v31  ;;  %v764_v56 = vmul.f32 0.3275911, %v732_v47  ;;  %v1180_v57 = vsub.f32 0.0, %v732_v47  ;;  %4208 = vpow2.f32 %v1248_v32 }
 0x117   : > { %v887_v43 = vmul.f32 1.0614054, %v4887_v35  ;;  %v4904_v61 = vmul.f32 0.70710677, %v4885_v34  ;;  %4210 = vrcp.f32 %v797_v50  ;;  %v4912_v5 = vadd.f32 %v4828_v37, %v543_v59 }
 0x118   : > { %v4900_v53 = vpop.eup %4190  ;;  %v796_v62 = vadd.f32 1.0, %v764_v56  ;;  %v1212_v63 = vmul.f32 %v1180_v57, %v732_v47  ;;  %v1252_v7 = vmul.f32 1.442695, %v1213_v55  ;;  %v4920_v20 = vmul.f32 0.5, %v4856_v3 }
 0x119   : > { %v919_v54 = vadd.f32 -1.4531521, %v887_v43  ;;  %v886_v42 = vmul.f32 1.0614054, %v4900_v53  ;;  %v735_v2 = vand.u32 2147483647, %v4904_v61  ;;  %v4941_v59 = vadd.f32 %v3994_v36, %v4828_v37 }
 0x11a   : > { %4212 = vrcp.f32 %v796_v62  ;;  %v1250_v8 = vmul.f32 1.442695, %v1212_v63  ;;  %v4926_v32 = vmul.f32 0.70710677, %v4912_v5  ;;  %vm1369_vm3 = vcmp.ge.f32.partialorder %v4845_v51, 0.0 }
 0x11b   : > { %v4906_v46 = vpop.eup %4192  ;;  %v951_v52 = vmul.f32 %v4887_v35, %v919_v54  ;;  %v918_v0 = vadd.f32 -1.4531521, %v886_v42  ;;  %v767_v13 = vmul.f32 0.3275911, %v735_v2  ;;  %v1183_v14 = vsub.f32 0.0, %v735_v2 }
 0x11c   : > { %v889_v1 = vmul.f32 1.0614054, %v4906_v46  ;;  %v4914_v10 = vpop.eup %4194  ;;  %4214 = vpow2.f32 %v1246_v60  ;;  %v4935_v54 = vand.u32 2147483647, %v4926_v32  ;;  %vm1368_vm4 = vcmp.ge.f32.partialorder %v4852_v58, 0.0 }
 0x11d   : > { %v983_v6 = vadd.f32 1.4214138, %v951_v52  ;;  %v950_v11 = vmul.f32 %v4900_v53, %v918_v0  ;;  %v4197_v15 = vpop.eup %4196  ;;  %v888_v19 = vmul.f32 1.0614054, %v4914_v10  ;;  %v799_v27 = vadd.f32 1.0, %v767_v13 }
 0x11e   : > { %v921_v12 = vadd.f32 -1.4531521, %v889_v1  ;;  %v4199_v23 = vpop.eup %4198  ;;  %v1215_v28 = vmul.f32 %v1183_v14, %v735_v2  ;;  %4216 = vpow2.f32 %v1252_v7  ;;  %v766_v2 = vmul.f32 0.3275911, %v4935_v54 }
 0x11f   : > { %v1015_v17 = vmul.f32 %v4887_v35, %v983_v6  ;;  %v982_v25 = vadd.f32 1.4214138, %v950_v11  ;;  %v4923_v29 = vpop.eup %4200  ;;  %v920_v31 = vadd.f32 -1.4531521, %v888_v19  ;;  %4218 = vpow2.f32 %v1250_v8 }
 0x120   : > { %v953_v26 = vmul.f32 %v4906_v46, %v921_v12  ;;  %v4928_v38 = vpop.eup %4202  ;;  %v1256_v40 = vmul.f32 1.442695, %v1215_v28  ;;  %4220 = vrcp.f32 %v799_v27  ;;  %v1182_v12 = vsub.f32 0.0, %v4935_v54 }
 0x121   : > { %v1047_v30 = vadd.f32 -0.28449672, %v1015_v17  ;;  %v1014_v3 = vmul.f32 %v4900_v53, %v982_v25  ;;  %v952_v47 = vmul.f32 %v4914_v10, %v920_v31  ;;  %v891_v50 = vmul.f32 1.0614054, %v4928_v38  ;;  %v4937_v55 = vpop.eup %4204 }
 0x122   : > { %v985_v39 = vadd.f32 1.4214138, %v953_v26  ;;  %v4943_v42 = vpop.eup %4206  ;;  %4222 = vpow2.f32 %v1256_v40  ;;  %v798_v25 = vadd.f32 1.0, %v766_v2  ;;  %vm1371_vm5 = vcmp.ge.f32.partialorder %v4862_v9, 0.0 }
 0x123   : > { %v1079_v43 = vmul.f32 %v4887_v35, %v1047_v30  ;;  %v1046_v56 = vadd.f32 -0.28449672, %v1014_v3  ;;  %v984_v52 = vadd.f32 1.4214138, %v952_v47  ;;  %v923_v62 = vadd.f32 -1.4531521, %v891_v50  ;;  %v4949_v6 = vpop.eup %4208 }
 0x124   : > { %v1017_v57 = vmul.f32 %v4906_v46, %v985_v39  ;;  %v890_v1 = vmul.f32 1.0614054, %v4943_v42  ;;  %v4955_v13 = vpop.eup %4210  ;;  %4224 = vrcp.f32 %v798_v25  ;;  %vm1370_vm6 = vcmp.ge.f32.partialorder %v4866_v16, 0.0 }
 0x125   : > { %v1111_v60 = vadd.f32 0.2548296, %v1079_v43  ;;  %v1078_v63 = vmul.f32 %v4900_v53, %v1046_v56  ;;  %v1016_v8 = vmul.f32 %v4914_v10, %v984_v52  ;;  %v955_v11 = vmul.f32 %v4928_v38, %v923_v62 }
 0x126   : > { %v1049_v0 = vadd.f32 -0.28449672, %v1017_v57  ;;  %v922_v19 = vadd.f32 -1.4531521, %v890_v1  ;;  %vm1373_vm7 = vcmp.ge.f32.partialorder %v4878_v24, 0.0  ;;  %v669_v24 = vmul.f32 0.5, %v4869_v18 }
 0x127   : > { %v1143_v7 = vmul.f32 %v4887_v35, %v1111_v60  ;;  %v1110_v14 = vadd.f32 0.2548296, %v1078_v63  ;;  %v1048_v27 = vadd.f32 -0.28449672, %v1016_v8  ;;  %v987_v28 = vadd.f32 1.4214138, %v955_v11  ;;  %v4960_v30 = vpop.eup %4212 }
 0x128   : > { %v1081_v17 = vmul.f32 %v4906_v46, %v1049_v0  ;;  %v893_v35 = vmul.f32 1.0614054, %v4955_v13  ;;  %v954_v3 = vmul.f32 %v4943_v42, %v922_v19  ;;  %v892_v60 = vmul.f32 1.0614054, %v4960_v30 }
 0x129   : > { %v1303_v26 = vmul.f32 %v4197_v15, %v1143_v7  ;;  %v1142_v31 = vmul.f32 %v4900_v53, %v1110_v14  ;;  %v1080_v40 = vmul.f32 %v4914_v10, %v1048_v27  ;;  %v1019_v15 = vmul.f32 %v4928_v38, %v987_v28  ;;  %v4215_v47 = vpop.eup %4214 }
 0x12a   : > { %v1113_v36 = vadd.f32 0.2548296, %v1081_v17  ;;  %v925_v43 = vadd.f32 -1.4531521, %v893_v35  ;;  %v986_v57 = vadd.f32 1.4214138, %v954_v3 }
 0x12b   : > { %v1335_v39 = vsub.f32 1.0, %v1303_v26  ;;  %v1302_v50 = vmul.f32 %v4199_v23, %v1142_v31  ;;  %v1112_v52 = vadd.f32 0.2548296, %v1080_v40  ;;  %v1051_v62 = vadd.f32 -0.28449672, %v1019_v15  ;;  %v4970_v0 = vpop.eup %4216 }
 0x12c   : > { %v1145_v56 = vmul.f32 %v4906_v46, %v1113_v36  ;;  %v957_v63 = vmul.f32 %v4955_v13, %v925_v43  ;;  %v1018_v7 = vmul.f32 %v4943_v42, %v986_v57  ;;  %v924_v23 = vadd.f32 -1.4531521, %v892_v60  ;;  %v4975_v8 = vpop.eup %4218 }
 0x12d   : > { %v1399_v53 = vsub.f32 0.0, %v1335_v39  ;;  %v1334_v1 = vsub.f32 1.0, %v1302_v50  ;;  %v1144_v11 = vmul.f32 %v4914_v10, %v1112_v52  ;;  %v1083_v14 = vmul.f32 %v4928_v38, %v1051_v62 }
 0x12e   : > { %v1305_v2 = vmul.f32 %v4923_v29, %v1145_v56  ;;  %v989_v17 = vadd.f32 1.4214138, %v957_v63  ;;  %v1050_v27 = vadd.f32 -0.28449672, %v1018_v7  ;;  %v4981_v29 = vpop.eup %4220  ;;  %v956_v36 = vmul.f32 %v4960_v30, %v924_v23 }
 0x12f   : > { %v1431_v46 = vsel %vm1367_vm1, %v1335_v39, %v1399_v53  ;;  %v1398_v25 = vsub.f32 0.0, %v1334_v1  ;;  %v1304_v28 = vmul.f32 %v4937_v55, %v1144_v11  ;;  %v1115_v35 = vadd.f32 0.2548296, %v1083_v14  ;;  %v4986_v41 = vpop.eup %4222 }
 0x130   : > { %v1463_v19 = vadd.f32 1.0, %v1431_v46  ;;  %v1337_v26 = vsub.f32 1.0, %v1305_v2  ;;  %v1021_v31 = vmul.f32 %v4955_v13, %v989_v17  ;;  %v1082_v40 = vmul.f32 %v4943_v42, %v1050_v27  ;;  %v553_v17 = vpop.f32.mrf.mxu0 }
 0x131   : > { %v1430_v3 = vsel %vm1366_vm2, %v1334_v1, %v1398_v25  ;;  %v1336_v43 = vsub.f32 1.0, %v1304_v28  ;;  %v1147_v55 = vmul.f32 %v4928_v38, %v1115_v35  ;;  %v988_v60 = vadd.f32 1.4214138, %v956_v36  ;;  %v5003_v2 = vpop.eup %4224 }
 0x132   : > { %v1495_v10 = vmul.f32 %v1463_v19, %v4874_v22  ;;  %v1401_v39 = vsub.f32 0.0, %v1337_v26  ;;  %v1462_v15 = vadd.f32 1.0, %v1430_v3  ;;  %v1053_v50 = vadd.f32 -0.28449672, %v1021_v31 }
 0x133   : > { %v1114_v57 = vadd.f32 0.2548296, %v1082_v40  ;;  %v895_v22 = vmul.f32 1.0614054, %v4981_v29  ;;  %v1400_v52 = vsub.f32 0.0, %v1336_v43  ;;  %v1307_v62 = vmul.f32 %v4949_v6, %v1147_v55 }
 0x134   : > { %1582 = vst [vmem:[#allocation2 + $0x21] sm:$0xff] %v1495_v10  ;;  %v1433_v56 = vsel %vm1369_vm3, %v1337_v26, %v1401_v39  ;;  %v1494_v45 = vmul.f32 %v1462_v15, %v4891_v44  ;;  %v1085_v38 = vmul.f32 %v4955_v13, %v1053_v50  ;;  %v1020_v1 = vmul.f32 %v4960_v30, %v988_v60 }
 0x135   : > { %v1465_v53 = vadd.f32 1.0, %v1433_v56  ;;  %v1146_v63 = vmul.f32 %v4943_v42, %v1114_v57  ;;  %v927_v51 = vadd.f32 -1.4531521, %v895_v22  ;;  %v1432_v44 = vsel %vm1368_vm4, %v1336_v43, %v1400_v52 }
 0x136   : > { %1581 = vst [vmem:[#allocation2 + $0x19] sm:$0xff] %v1494_v45  ;;  %v1339_v23 = vsub.f32 1.0, %v1307_v62  ;;  %v1214_v6 = vmul.f32 %v1182_v12, %v4935_v54  ;;  %v1464_v46 = vadd.f32 1.0, %v1432_v44  ;;  %v1117_v11 = vadd.f32 0.2548296, %v1085_v38 }
 0x137   : > { %v1497_v7 = vmul.f32 %v1465_v53, %v4895_v48  ;;  %v1306_v42 = vmul.f32 %v4215_v47, %v1146_v63  ;;  %v1052_v14 = vadd.f32 -0.28449672, %v1020_v1  ;;  %v959_v25 = vmul.f32 %v4981_v29, %v927_v51 }
 0x138   : > { %v1403_v19 = vsub.f32 0.0, %v1339_v23  ;;  %v894_v26 = vmul.f32 1.0614054, %v5003_v2  ;;  %v1254_v48 = vmul.f32 1.442695, %v1214_v6  ;;  %v1496_v58 = vmul.f32 %v1464_v46, %v4898_v49 }
 0x139   : > { %1584 = vst [vmem:[#allocation2 + $0x39] sm:$0xff] %v1497_v7  ;;  %v1338_v27 = vsub.f32 1.0, %v1306_v42  ;;  %v1149_v28 = vmul.f32 %v4955_v13, %v1117_v11  ;;  %v1084_v35 = vmul.f32 %v4960_v30, %v1052_v14  ;;  %v991_v12 = vadd.f32 1.4214138, %v959_v25 }
 0x13a   : > { %v1435_v54 = vsel %vm1371_vm5, %v1339_v23, %v1403_v19  ;;  %v926_v47 = vadd.f32 -1.4531521, %v894_v26  ;;  %v5019_v31 = vadd.f32 %v4828_v37, %v553_v17  ;;  %1583 = vst [vmem:[#allocation2 + $0x31] sm:$0xff] %v1496_v58  ;;  %4226 = vpow2.f32 %v1254_v48 }
 0x13b   : > { %v1467_v36 = vadd.f32 1.0, %v1435_v54  ;;  %v1402_v10 = vsub.f32 0.0, %v1338_v27  ;;  %v1309_v3 = vmul.f32 %v4970_v0, %v1149_v28  ;;  %v1116_v39 = vadd.f32 0.2548296, %v1084_v35 }
 0x13c   : > { %v1023_v49 = vmul.f32 %v4981_v29, %v991_v12  ;;  %v958_v13 = vmul.f32 %v5003_v2, %v926_v47  ;;  %v5025_v40 = vmul.f32 0.70710677, %v4941_v59  ;;  %v666_v50 = vmul.f32 0.5, %v4859_v4 }
 0x13d   : > { %v1499_v9 = vmul.f32 %v1467_v36, %v4920_v20  ;;  %v1434_v15 = vsel %vm1370_vm6, %v1338_v27, %v1402_v10  ;;  %v1341_v43 = vsub.f32 1.0, %v1309_v3  ;;  %v1148_v55 = vmul.f32 %v4960_v30, %v1116_v39  ;;  %v3997_v20 = vpop.f32.mrf.mxu0 }
 0x13e   : > { %v1466_v0 = vadd.f32 1.0, %v1434_v15  ;;  %v1055_v56 = vadd.f32 -0.28449672, %v1023_v49  ;;  %v990_v57 = vadd.f32 1.4214138, %v958_v13  ;;  %vm1372_vm8 = vcmp.ge.f32.partialorder %v4882_v33, 0.0 }
 0x13f   : > { %1586 = vst [vmem:[#allocation2 + $0x51] sm:$0xff] %v1499_v9  ;;  %v1405_v60 = vsub.f32 0.0, %v1341_v43  ;;  %v1308_v22 = vmul.f32 %v4975_v8, %v1148_v55  ;;  %v737_v45 = vand.u32 2147483647, %v5025_v40  ;;  %v5038_v30 = vmul.f32 0.70710677, %v5019_v31  ;;  %v563_v23 = vpop.f32.mrf.mxu0 }
 0x140   : > { %v1498_v53 = vmul.f32 %v1466_v0, %v666_v50  ;;  %v1087_v16 = vmul.f32 %v4981_v29, %v1055_v56  ;;  %v1022_v52 = vmul.f32 %v5003_v2, %v990_v57  ;;  %v5046_v11 = vadd.f32 %v3997_v20, %v4828_v37 }
 0x141   : > { %v1437_v4 = vsel %vm1373_vm7, %v1341_v43, %v1405_v60  ;;  %v1340_v62 = vsub.f32 1.0, %v1308_v22  ;;  %v769_v63 = vmul.f32 0.3275911, %v737_v45  ;;  %v736_v44 = vand.u32 2147483647, %v5038_v30 }
 0x142   : > { %1585 = vst [vmem:[#allocation2 + $0x49] sm:$0xff] %v1498_v53  ;;  %v1469_v38 = vadd.f32 1.0, %v1437_v4  ;;  %v1119_v1 = vadd.f32 0.2548296, %v1087_v16  ;;  %v1054_v8 = vadd.f32 -0.28449672, %v1022_v52 }
 0x143   : > { %v1404_v51 = vsub.f32 0.0, %v1340_v62  ;;  %v801_v7 = vadd.f32 1.0, %v769_v63  ;;  %v768_v18 = vmul.f32 0.3275911, %v736_v44  ;;  %v668_v17 = vmul.f32 0.5, %v4872_v21 }
 0x144   : > { %v1501_v6 = vmul.f32 %v1469_v38, %v669_v24  ;;  %v1151_v46 = vmul.f32 %v4981_v29, %v1119_v1  ;;  %v1086_v42 = vmul.f32 %v5003_v2, %v1054_v8  ;;  %v5051_v48 = vmul.f32 0.70710677, %v5046_v11  ;;  %v4000_v29 = vpop.f32.mrf.mxu0 }
 0x145   : > { %v1436_v14 = vsel %vm1372_vm8, %v1340_v62, %v1404_v51  ;;  %4228 = vrcp.f32 %v801_v7  ;;  %v800_v26 = vadd.f32 1.0, %v768_v18  ;;  %v1185_v35 = vsub.f32 0.0, %v737_v45 }
 0x146   : > { %1588 = vst [vmem:[#allocation2 + $0x69] sm:$0xff] %v1501_v6  ;;  %v1468_v33 = vadd.f32 1.0, %v1436_v14  ;;  %v1311_v19 = vmul.f32 %v4986_v41, %v1151_v46  ;;  %v1118_v25 = vadd.f32 0.2548296, %v1086_v42  ;;  %v1184_v12 = vsub.f32 0.0, %v736_v44 }
 0x147   : > { %v4227_v54 = vpop.eup %4226  ;;  %4230 = vrcp.f32 %v800_v26  ;;  %v739_v47 = vand.u32 2147483647, %v5051_v48  ;;  %v564_v21 = vadd.f32 %v4828_v37, %v563_v23  ;;  %v5057_v10 = vadd.f32 %v4000_v29, %v4828_v37 }
 0x148   : > { %v1500_v58 = vmul.f32 %v1468_v33, %v668_v17  ;;  %v1343_v27 = vsub.f32 1.0, %v1311_v19  ;;  %v1150_v28 = vmul.f32 %v5003_v2, %v1118_v25  ;;  %vm1375_vm9 = vcmp.ge.f32.partialorder %v4904_v61, 0.0  ;;  %v573_v2 = vpop.f32.mrf.mxu0 }
 0x149   : > { %v771_v3 = vmul.f32 0.3275911, %v739_v47  ;;  %v5060_v39 = vmul.f32 0.70710677, %v564_v21  ;;  %v671_v49 = vmul.f32 0.5, %v4885_v34  ;;  %v1217_v15 = vmul.f32 %v1185_v35, %v737_v45 }
 0x14a   : > { %1587 = vst [vmem:[#allocation2 + $0x61] sm:$0xff] %v1500_v58  ;;  %v1407_v41 = vsub.f32 0.0, %v1343_v27  ;;  %v1310_v36 = vmul.f32 %v4227_v54, %v1150_v28  ;;  %v1216_v55 = vmul.f32 %v1184_v12, %v736_v44  ;;  %v670_v56 = vmul.f32 0.5, %v4912_v5  ;;  %v4003_v5 = vpop.f32.mrf.mxu0 }
 0x14b   : > { %v803_v50 = vadd.f32 1.0, %v771_v3  ;;  %v738_v0 = vand.u32 2147483647, %v5060_v39  ;;  %v5066_v60 = vmul.f32 0.70710677, %v5057_v10  ;;  %v5069_v61 = vadd.f32 %v4828_v37, %v573_v2 }
 0x14c   : > { %v1439_v13 = vsel %vm1375_vm9, %v1343_v27, %v1407_v41  ;;  %v1342_v9 = vsub.f32 1.0, %v1310_v36  ;;  %vm1374_vm10 = vcmp.ge.f32.partialorder %v4926_v32, 0.0  ;;  %v5073_v20 = vmul.f32 0.5, %v4941_v59  ;;  %v583_v42 = vpop.f32.mrf.mxu0 }
 0x14d   : > { %v1471_v43 = vadd.f32 1.0, %v1439_v13  ;;  %4232 = vrcp.f32 %v803_v50  ;;  %v770_v34 = vmul.f32 0.3275911, %v738_v0  ;;  %v1187_v53 = vsub.f32 0.0, %v739_v47 }
 0x14e   : > { %v1406_v57 = vsub.f32 0.0, %v1342_v9  ;;  %v741_v16 = vand.u32 2147483647, %v5066_v60  ;;  %v1260_v4 = vmul.f32 1.442695, %v1217_v15  ;;  %v5079_v38 = vmul.f32 0.5, %v5019_v31  ;;  %v4006_v54 = vpop.f32.mrf.mxu0 }
 0x14f   : > { %v1503_v22 = vmul.f32 %v1471_v43, %v671_v49  ;;  %v1258_v62 = vmul.f32 1.442695, %v1216_v55  ;;  %v802_v63 = vadd.f32 1.0, %v770_v34  ;;  %v1186_v32 = vsub.f32 0.0, %v738_v0 }
 0x150   : > { %v1438_v45 = vsel %vm1374_vm10, %v1342_v9, %v1406_v57  ;;  %v773_v1 = vmul.f32 0.3275911, %v741_v16  ;;  %v5082_v8 = vmul.f32 0.70710677, %v5069_v61  ;;  %v5086_v7 = vadd.f32 %v4003_v5, %v4828_v37 }
 0x151   : > { %1590 = vst [vmem:[#allocation2 + $0x81] sm:$0xff] %v1503_v22  ;;  %v1470_v52 = vadd.f32 1.0, %v1438_v45  ;;  %4234 = vrcp.f32 %v802_v63  ;;  %v1219_v44 = vmul.f32 %v1187_v53, %v739_v47  ;;  %v1189_v6 = vsub.f32 0.0, %v741_v16 }
 0x152   : > { %v5076_v24 = vpop.eup %4228  ;;  %v805_v23 = vadd.f32 1.0, %v773_v1  ;;  %v740_v46 = vand.u32 2147483647, %v5082_v8  ;;  %4236 = vpow2.f32 %v1260_v4  ;;  %v5090_v14 = vmul.f32 0.5, %v5046_v11 }
 0x153   : > { %v1502_v59 = vmul.f32 %v1470_v52, %v670_v56  ;;  %v897_v51 = vmul.f32 1.0614054, %v5076_v24  ;;  %v5093_v18 = vmul.f32 0.70710677, %v5086_v7  ;;  %v5097_v33 = vmul.f32 0.5, %v564_v21 }
 0x154   : > { %v5095_v17 = vpop.eup %4230  ;;  %v1218_v19 = vmul.f32 %v1186_v32, %v738_v0  ;;  %v772_v25 = vmul.f32 0.3275911, %v740_v46  ;;  %v1188_v26 = vsub.f32 0.0, %v740_v46  ;;  %4238 = vrcp.f32 %v805_v23  ;;  %v593_v23 = vpop.f32.mrf.mxu0 }
 0x155   : > { %1589 = vst [vmem:[#allocation2 + $0x79] sm:$0xff] %v1502_v59  ;;  %v929_v31 = vadd.f32 -1.4531521, %v897_v51  ;;  %v896_v58 = vmul.f32 1.0614054, %v5095_v17  ;;  %4240 = vpow2.f32 %v1258_v62  ;;  %v1221_v28 = vmul.f32 %v1189_v6, %v741_v16 }
 0x156   : > { %v743_v27 = vand.u32 2147483647, %v5093_v18  ;;  %v1264_v11 = vmul.f32 1.442695, %v1219_v44  ;;  %v804_v35 = vadd.f32 1.0, %v772_v25  ;;  %v5103_v21 = vadd.f32 %v4828_v37, %v583_v42 }
 0x157   : > { %v961_v29 = vmul.f32 %v5076_v24, %v929_v31  ;;  %v928_v47 = vadd.f32 -1.4531521, %v896_v58  ;;  %v1262_v36 = vmul.f32 1.442695, %v1218_v19  ;;  %v1220_v3 = vmul.f32 %v1188_v26, %v740_v46 }
 0x158   : > { %v775_v41 = vmul.f32 0.3275911, %v743_v27  ;;  %4242 = vrcp.f32 %v804_v35  ;;  %v1191_v2 = vsub.f32 0.0, %v743_v27  ;;  %v5108_v15 = vadd.f32 %v4006_v54, %v4828_v37 }
 0x159   : > { %v993_v12 = vadd.f32 1.4214138, %v961_v29  ;;  %v960_v13 = vmul.f32 %v5095_v17, %v928_v47  ;;  %4244 = vpow2.f32 %v1264_v11  ;;  %v5113_v55 = vmul.f32 0.5, %v5057_v10 }
 0x15a   : > { %v807_v9 = vadd.f32 1.0, %v775_v41  ;;  %v5110_v43 = vpop.eup %4232  ;;  %v1268_v50 = vmul.f32 1.442695, %v1221_v28  ;;  %v5116_v0 = vmul.f32 0.70710677, %v5103_v21  ;;  %v1223_v45 = vmul.f32 %v1191_v2, %v743_v27 }
 0x15b   : > { %v1025_v49 = vmul.f32 %v5076_v24, %v993_v12  ;;  %v992_v57 = vadd.f32 1.4214138, %v960_v13  ;;  %v899_v22 = vmul.f32 1.0614054, %v5110_v43  ;;  %v1266_v34 = vmul.f32 1.442695, %v1220_v3 }
 0x15c   : > { %4246 = vrcp.f32 %v807_v9  ;;  %v742_v53 = vand.u32 2147483647, %v5116_v0  ;;  %v5123_v52 = vmul.f32 0.70710677, %v5108_v15  ;;  %v5128_v62 = vmul.f32 0.5, %v5069_v61  ;;  %v3441_v3 = vld [vmem:[%s7230_s5 + $0x78] sm:$0xff] }
 0x15d   : > { %v1057_v56 = vadd.f32 -0.28449672, %v1025_v49  ;;  %4248 = vpow2.f32 %v1262_v36  ;;  %v1024_v5 = vmul.f32 %v5095_v17, %v992_v57  ;;  %v931_v10 = vadd.f32 -1.4531521, %v899_v22  ;;  %4025 = vmatprep.subr.mxu0 %v3441_v3  ;;  %4105 = vmatprep.subr.mxu1 %v3441_v3 }
 0x15e   : > { %v5125_v4 = vpop.eup %4234  ;;  %4250 = vpow2.f32 %v1268_v50  ;;  %v774_v63 = vmul.f32 0.3275911, %v742_v53  ;;  %v1190_v32 = vsub.f32 0.0, %v742_v53  ;;  %vm1377_vm11 = vcmp.ge.f32.partialorder %v5025_v40, 0.0  ;;  %4026 = vmatpush3.msra.mxu0 %v3441_v3  ;;  %4121 = vmatpush3.msra.mxu1 %v3441_v3 }
 0x15f   : > { %v1089_v16 = vmul.f32 %v5076_v24, %v1057_v56  ;;  %v1056_v59 = vadd.f32 -0.28449672, %v1024_v5  ;;  %v963_v51 = vmul.f32 %v5110_v43, %v931_v10  ;;  %v898_v44 = vmul.f32 1.0614054, %v5125_v4  ;;  %v4237_v6 = vpop.eup %4236 }
 0x160   : > { %4252 = vpow2.f32 %v1266_v34  ;;  %v1272_v46 = vmul.f32 1.442695, %v1223_v45  ;;  %v806_v42 = vadd.f32 1.0, %v774_v63  ;;  %v745_v31 = vand.u32 2147483647, %v5123_v52 }
 0x161   : > { %v1121_v1 = vadd.f32 0.2548296, %v1089_v16  ;;  %v1088_v19 = vmul.f32 %v5095_v17, %v1056_v59  ;;  %v995_v25 = vadd.f32 1.4214138, %v963_v51  ;;  %v930_v26 = vadd.f32 -1.4531521, %v898_v44  ;;  %v5136_v29 = vpop.eup %4238 }
 0x162   : > { %4254 = vrcp.f32 %v806_v42  ;;  %v1222_v58 = vmul.f32 %v1190_v32, %v742_v53  ;;  %v777_v27 = vmul.f32 0.3275911, %v745_v31  ;;  %v5139_v11 = vadd.f32 %v4828_v37, %v593_v23  ;;  %v4241_v28 = vpop.eup %4240  ;;  %v3439_v59 = vld [vmem:[%s7230_s5 + $0x68] sm:$0xff] }
 0x163   : > { %v1153_v61 = vmul.f32 %v5076_v24, %v1121_v1  ;;  %v1120_v54 = vadd.f32 0.2548296, %v1088_v19  ;;  %v1027_v12 = vmul.f32 %v5110_v43, %v995_v25  ;;  %v962_v47 = vmul.f32 %v5125_v4, %v930_v26  ;;  %v3438_v25 = vld [vmem:[%s7230_s5 + $0x60] sm:$0xff] }
 0x164   : > { %vm1376_vm12 = vcmp.ge.f32.partialorder %v5038_v30, 0.0  ;;  %v901_v24 = vmul.f32 1.0614054, %v5136_v29  ;;  %4256 = vpow2.f32 %v1272_v46  ;;  %v809_v41 = vadd.f32 1.0, %v777_v27  ;;  %v3436_v30 = vld [vmem:[%s7230_s5 + $0x50] sm:$0xff] }
 0x165   : > { %v1313_v35 = vmul.f32 %v4237_v6, %v1153_v61  ;;  %v1193_v36 = vsub.f32 0.0, %v745_v31  ;;  %v5148_v37 = vpop.eup %4242  ;;  %v1152_v49 = vmul.f32 %v5095_v17, %v1120_v54  ;;  %v1059_v13 = vadd.f32 -0.28449672, %v1027_v12  ;;  %v3440_v17 = vld [vmem:[%s7230_s5 + $0x70] sm:$0xff] }
 0x166   : > { %v994_v9 = vadd.f32 1.4214138, %v962_v47  ;;  %v933_v50 = vadd.f32 -1.4531521, %v901_v24  ;;  %v900_v56 = vmul.f32 1.0614054, %v5148_v37  ;;  %4258 = vrcp.f32 %v809_v41  ;;  %v4245_v22 = vpop.eup %4244  ;;  %4027 = vmatprep.subr.mxu0 %v3440_v17  ;;  %4106 = vmatprep.subr.mxu1 %v3440_v17 }
 0x167   : > { %v1345_v2 = vsub.f32 1.0, %v1313_v35  ;;  %v5152_v57 = vmul.f32 1.442695, %v1222_v58  ;;  %v1312_v45 = vmul.f32 %v4241_v28, %v1152_v49  ;;  %v1091_v53 = vmul.f32 %v5110_v43, %v1059_v13  ;;  %4028 = vmatpush3.msra.mxu0 %v3440_v17  ;;  %4122 = vmatpush3.msra.mxu1 %v3440_v17  ;;  %v3437_v24 = vld [vmem:[%s7230_s5 + $0x58] sm:$0xff] }
 0x168   : > { %v1026_v16 = vmul.f32 %v5125_v4, %v994_v9  ;;  %v965_v10 = vmul.f32 %v5136_v29, %v933_v50  ;;  %v932_v63 = vadd.f32 -1.4531521, %v900_v56  ;;  %v1225_v32 = vmul.f32 %v1193_v36, %v745_v31  ;;  %4029 = vmatprep.subr.mxu0 %v3439_v59  ;;  %4107 = vmatprep.subr.mxu1 %v3439_v59 }
 0x169   : > { %v1409_v34 = vsub.f32 0.0, %v1345_v2  ;;  %v5159_v5 = vpop.eup %4246  ;;  %v5163_v1 = vmul.f32 0.70710677, %v5139_v11  ;;  %v1344_v23 = vsub.f32 1.0, %v1312_v45  ;;  %v1123_v6 = vadd.f32 0.2548296, %v1091_v53  ;;  %4030 = vmatpush3.msra.mxu0 %v3439_v59  ;;  %4123 = vmatpush3.msra.mxu1 %v3439_v59 }
 0x16a   : > { %v4249_v51 = vpop.eup %4248  ;;  %v1058_v46 = vadd.f32 -0.28449672, %v1026_v16  ;;  %vm1379_vm13 = vcmp.ge.f32.partialorder %v5051_v48, 0.0  ;;  %v997_v31 = vadd.f32 1.4214138, %v965_v10  ;;  %v964_v61 = vmul.f32 %v5148_v37, %v932_v63  ;;  %4031 = vmatprep.subr.mxu0 %v3438_v25  ;;  %4108 = vmatprep.subr.mxu1 %v3438_v25  ;;  %v3435_v63 = vld [vmem:[%s7230_s5 + $0x48] sm:$0xff] }
 0x16b   : > { %v1441_v44 = vsel %vm1377_vm11, %v1345_v2, %v1409_v34  ;;  %v903_v19 = vmul.f32 1.0614054, %v5159_v5  ;;  %v5176_v40 = vpop.eup %4250  ;;  %v1408_v26 = vsub.f32 0.0, %v1344_v23  ;;  %v1155_v58 = vmul.f32 %v5110_v43, %v1123_v6  ;;  %4032 = vmatpush3.msra.mxu0 %v3438_v25  ;;  %4124 = vmatpush3.msra.mxu1 %v3438_v25 }
 0x16c   : > { %v1473_v42 = vadd.f32 1.0, %v1441_v44  ;;  %v1090_v27 = vmul.f32 %v5125_v4, %v1058_v46  ;;  %v5181_v28 = vand.u32 2147483647, %v5163_v1  ;;  %v1029_v54 = vmul.f32 %v5136_v29, %v997_v31  ;;  %4033 = vmatprep.subr.mxu0 %v3437_v24  ;;  %4109 = vmatprep.subr.mxu1 %v3437_v24  ;;  %v4009_v46 = vpop.f32.mrf.mxu0 }
 0x16d   : > { %v996_v12 = vadd.f32 1.4214138, %v964_v61  ;;  %v935_v47 = vadd.f32 -1.4531521, %v903_v19  ;;  %v5188_v43 = vpop.eup %4252  ;;  %v1440_v41 = vsel %vm1376_vm12, %v1344_v23, %v1408_v26  ;;  %v1315_v36 = vmul.f32 %v4245_v22, %v1155_v58  ;;  %4034 = vmatpush3.msra.mxu0 %v3437_v24  ;;  %4125 = vmatpush3.msra.mxu1 %v3437_v24 }
 0x16e   : > { %v1505_v35 = vmul.f32 %v1473_v42, %v5073_v20  ;;  %v1122_v3 = vadd.f32 0.2548296, %v1090_v27  ;;  %v776_v2 = vmul.f32 0.3275911, %v5181_v28  ;;  %v1472_v20 = vadd.f32 1.0, %v1440_v41  ;;  %4035 = vmatprep.subr.mxu0 %v3436_v30  ;;  %4110 = vmatprep.subr.mxu1 %v3436_v30  ;;  %v3434_v42 = vld [vmem:[%s7230_s5 + $0x40] sm:$0xff] }
 0x16f   : > { %vm1378_vm14 = vcmp.ge.f32.partialorder %v5060_v39, 0.0  ;;  %v1061_v49 = vadd.f32 -0.28449672, %v1029_v54  ;;  %v1028_v13 = vmul.f32 %v5148_v37, %v996_v12  ;;  %v967_v9 = vmul.f32 %v5159_v5, %v935_v47  ;;  %v5199_v50 = vpop.eup %4254  ;;  %4036 = vmatpush3.msra.mxu0 %v3436_v30  ;;  %4126 = vmatpush3.msra.mxu1 %v3436_v30 }
 0x170   : > { %1592 = vst [vmem:[#allocation2 + $0x99] sm:$0xff] %v1505_v35  ;;  %v1347_v56 = vsub.f32 1.0, %v1315_v36  ;;  %v1154_v22 = vmul.f32 %v5125_v4, %v1122_v3  ;;  %v1276_v34 = vmul.f32 1.442695, %v1225_v32  ;;  %v808_v45 = vadd.f32 1.0, %v776_v2  ;;  %4037 = vmatprep.subr.mxu0 %v3435_v63  ;;  %4111 = vmatprep.subr.mxu1 %v3435_v63  ;;  %v3433_v35 = vld [vmem:[%s7230_s5 + $0x38] sm:$0xff]  ;;  %v603_v3 = vpop.f32.mrf.mxu0 }
 0x171   : > { %v1504_v53 = vmul.f32 %v1472_v20, %v5079_v38  ;;  %v1093_v16 = vmul.f32 %v5136_v29, %v1061_v49  ;;  %v1060_v17 = vadd.f32 -0.28449672, %v1028_v13  ;;  %v999_v10 = vadd.f32 1.4214138, %v967_v9  ;;  %v5207_v59 = vpop.eup %4256  ;;  %4038 = vmatpush3.msra.mxu0 %v3435_v63  ;;  %4127 = vmatpush3.msra.mxu1 %v3435_v63 }
 0x172   : > { %v1411_v44 = vsub.f32 0.0, %v1347_v56  ;;  %v1314_v4 = vmul.f32 %v4249_v51, %v1154_v22  ;;  %v902_v32 = vmul.f32 1.0614054, %v5199_v50  ;;  %4260 = vrcp.f32 %v808_v45  ;;  %4039 = vmatprep.subr.mxu0 %v3434_v42  ;;  %4112 = vmatprep.subr.mxu1 %v3434_v42 }
 0x173   : > { %1591 = vst [vmem:[#allocation2 + $0x91] sm:$0xff] %v1504_v53  ;;  %v1125_v38 = vadd.f32 0.2548296, %v1093_v16  ;;  %v1092_v23 = vmul.f32 %v5148_v37, %v1060_v17  ;;  %v1031_v6 = vmul.f32 %v5159_v5, %v999_v10  ;;  %4262 = vpow2.f32 %v5152_v57  ;;  %v5216_v51 = vpop.eup %4258  ;;  %4040 = vmatpush3.msra.mxu0 %v3434_v42  ;;  %4128 = vmatpush3.msra.mxu1 %v3434_v42  ;;  %v5278_v42 = vpop.f32.mrf.mxu0 }
 0x174   : > { %v1443_v31 = vsel %vm1379_vm13, %v1347_v56, %v1411_v44  ;;  %v1346_v61 = vsub.f32 1.0, %v1314_v4  ;;  %vm1381_vm15 = vcmp.ge.f32.partialorder %v5066_v60, 0.0  ;;  %v934_v19 = vadd.f32 -1.4531521, %v902_v32  ;;  %4041 = vmatprep.subr.mxu0 %v3433_v35  ;;  %4113 = vmatprep.subr.mxu1 %v3433_v35  ;;  %v3429_v4 = vld [vmem:[%s7230_s5 + $0x18] sm:$0xff]  ;;  %v3428_v60 = vld [vmem:[%s7230_s5 + $0x10] sm:$0xff] }
 0x175   : > { %v1192_v25 = vsub.f32 0.0, %v5181_v28  ;;  %v1475_v57 = vadd.f32 1.0, %v1443_v31  ;;  %v1157_v26 = vmul.f32 %v5136_v29, %v1125_v38  ;;  %v1124_v58 = vadd.f32 0.2548296, %v1092_v23  ;;  %v3432_v29 = vld [vmem:[%s7230_s5 + $0x30] sm:$0xff]  ;;  %4042 = vmatpush3.msra.mxu0 %v3433_v35  ;;  %4129 = vmatpush3.msra.mxu1 %v3433_v35 }
 0x176   : > { %v1063_v27 = vadd.f32 -0.28449672, %v1031_v6  ;;  %v1410_v48 = vsub.f32 0.0, %v1346_v61  ;;  %vm1380_vm1 = vcmp.ge.f32.partialorder %v5082_v8, 0.0  ;;  %v966_v54 = vmul.f32 %v5199_v50, %v934_v19  ;;  %4043 = vmatprep.subr.mxu0 %v3432_v29  ;;  %4114 = vmatprep.subr.mxu1 %v3432_v29 }
 0x177   : > { %v905_v12 = vmul.f32 1.0614054, %v5216_v51  ;;  %4264 = vpow2.f32 %v1276_v34  ;;  %v1507_v47 = vmul.f32 %v1475_v57, %v5090_v14  ;;  %v1317_v24 = vmul.f32 %v5176_v40, %v1157_v26  ;;  %v3431_v14 = vld [vmem:[%s7230_s5 + $0x28] sm:$0xff]  ;;  %4044 = vmatpush3.msra.mxu0 %v3432_v29  ;;  %4130 = vmatpush3.msra.mxu1 %v3432_v29 }
 0x178   : > { %v1156_v41 = vmul.f32 %v5148_v37, %v1124_v58  ;;  %v1095_v36 = vmul.f32 %v5159_v5, %v1063_v27  ;;  %v1442_v2 = vsel %vm1378_vm14, %v1346_v61, %v1410_v48  ;;  %v998_v20 = vadd.f32 1.4214138, %v966_v54  ;;  %4045 = vmatprep.subr.mxu0 %v3431_v14  ;;  %4115 = vmatprep.subr.mxu1 %v3431_v14  ;;  %v3427_v48 = vld [vmem:[%s7230_s5 + $0x8] sm:$0xff] }
 0x179   : > { %v937_v49 = vadd.f32 -1.4531521, %v905_v12  ;;  %v1224_v13 = vmul.f32 %v1192_v25, %v5181_v28  ;;  %1594 = vst [vmem:[#allocation2 + $0xb1] sm:$0xff] %v1507_v47  ;;  %v1474_v40 = vadd.f32 1.0, %v1442_v2  ;;  %v1349_v37 = vsub.f32 1.0, %v1317_v24  ;;  %4046 = vmatpush3.msra.mxu0 %v3431_v14  ;;  %4131 = vmatpush3.msra.mxu1 %v3431_v14 }
 0x17a   : > { %v1316_v9 = vmul.f32 %v5188_v43, %v1156_v41  ;;  %v1127_v30 = vadd.f32 0.2548296, %v1095_v36  ;;  %v1030_v39 = vmul.f32 %v5199_v50, %v998_v20  ;;  %v5248_v28 = vld [vmem:[%s7227_s2] ss:$0 sm:$0xff]  ;;  %v5262_v10 = vmul.f32 0.5, %v5086_v7  ;;  %v613_v41 = vpop.f32.mrf.mxu0 }
 0x17b   : > { %v969_v56 = vmul.f32 %v5216_v51, %v937_v49  ;;  %v5251_v22 = vadd.f32 %v5248_v28, %v4009_v46  ;;  %v5254_v34 = vadd.f32 %v5248_v28, %v603_v3  ;;  %v3430_v43 = vld [vmem:[%s7230_s5 + $0x20] sm:$0xff]  ;;  %v1506_v45 = vmul.f32 %v1474_v40, %v5097_v33 }
 0x17c   : > { %v1413_v53 = vsub.f32 0.0, %v1349_v37  ;;  %v1348_v16 = vsub.f32 1.0, %v1316_v9  ;;  %v1159_v17 = vmul.f32 %v5159_v5, %v1127_v30  ;;  %v1062_v63 = vadd.f32 -0.28449672, %v1030_v39  ;;  %4047 = vmatprep.subr.mxu0 %v3430_v43  ;;  %4116 = vmatprep.subr.mxu1 %v3430_v43  ;;  %v3426_v36 = vld [vmem:[%s7230_s5] sm:$0xff]  ;;  %v4015_v39 = vpop.f32.mrf.mxu0 }
 0x17d   : > { %v1001_v44 = vadd.f32 1.4214138, %v969_v56  ;;  %1593 = vst [vmem:[#allocation2 + $0xa9] sm:$0xff] %v1506_v45  ;;  %v5271_v38 = vmul.f32 0.70710677, %v5251_v22  ;;  %4048 = vmatpush3.msra.mxu0 %v3430_v43  ;;  %4132 = vmatpush3.msra.mxu1 %v3430_v43  ;;  %vm1383_vm2 = vcmp.ge.f32.partialorder %v5093_v18, 0.0 }
 0x17e   : > { %v1445_v33 = vsel %vm1381_vm15, %v1349_v37, %v1413_v53  ;;  %v1412_v32 = vsub.f32 0.0, %v1348_v16  ;;  %v1319_v5 = vmul.f32 %v5207_v59, %v1159_v17  ;;  %v1094_v23 = vmul.f32 %v5199_v50, %v1062_v63  ;;  %4049 = vmatprep.subr.mxu0 %v3429_v4  ;;  %4117 = vmatprep.subr.mxu1 %v3429_v4 }
 0x17f   : > { %v1477_v7 = vadd.f32 1.0, %v1445_v33  ;;  %v1033_v6 = vmul.f32 %v5216_v51, %v1001_v44  ;;  %v5276_v46 = vmul.f32 0.70710677, %v5254_v34  ;;  %v5283_v59 = vpop.eup %4260  ;;  %v1274_v19 = vmul.f32 1.442695, %v1224_v13  ;;  %4050 = vmatpush3.msra.mxu0 %v3429_v4  ;;  %4133 = vmatpush3.msra.mxu1 %v3429_v4 }
 0x180   : > { %v1444_v31 = vsel %vm1380_vm1, %v1348_v16, %v1412_v32  ;;  %v1351_v61 = vsub.f32 1.0, %v1319_v5  ;;  %v5288_v25 = vand.u32 2147483647, %v5271_v38  ;;  %v4263_v57 = vpop.eup %4262  ;;  %v1126_v27 = vadd.f32 0.2548296, %v1094_v23  ;;  %4051 = vmatprep.subr.mxu0 %v3428_v60  ;;  %4118 = vmatprep.subr.mxu1 %v3428_v60 }
 0x181   : > { %v1509_v26 = vmul.f32 %v1477_v7, %v5113_v55  ;;  %v1476_v58 = vadd.f32 1.0, %v1444_v31  ;;  %v1065_v35 = vadd.f32 -0.28449672, %v1033_v6  ;;  %v904_v54 = vmul.f32 1.0614054, %v5283_v59  ;;  %4052 = vmatpush3.msra.mxu0 %v3428_v60  ;;  %4134 = vmatpush3.msra.mxu1 %v3428_v60 }
 0x182   : > { %v1415_v8 = vsub.f32 0.0, %v1351_v61  ;;  %v779_v12 = vmul.f32 0.3275911, %v5288_v25  ;;  %v1158_v29 = vmul.f32 %v5199_v50, %v1126_v27  ;;  %v5301_v24 = vand.u32 2147483647, %v5276_v46  ;;  %4053 = vmatprep.subr.mxu0 %v3427_v48  ;;  %4119 = vmatprep.subr.mxu1 %v3427_v48 }
 0x183   : > { %1596 = vst [vmem:[#allocation2 + $0xc9] sm:$0xff] %v1509_v26  ;;  %v1508_v55 = vmul.f32 %v1476_v58, %v5128_v62  ;;  %v1097_v47 = vmul.f32 %v5216_v51, %v1065_v35  ;;  %v936_v20 = vadd.f32 -1.4531521, %v904_v54  ;;  %4266 = vpow2.f32 %v1274_v19  ;;  %4054 = vmatpush3.msra.mxu0 %v3427_v48  ;;  %4135 = vmatpush3.msra.mxu1 %v3427_v48 }
 0x184   : > { %v4265_v3 = vpop.eup %4264  ;;  %v1447_v2 = vsel %vm1383_vm2, %v1351_v61, %v1415_v8  ;;  %v811_v62 = vadd.f32 1.0, %v779_v12  ;;  %v1318_v49 = vmul.f32 %v4263_v57, %v1158_v29  ;;  %v778_v14 = vmul.f32 0.3275911, %v5301_v24  ;;  %4055 = vmatprep.subr.mxu0 %v3426_v36  ;;  %4120 = vmatprep.subr.mxu1 %v3426_v36 }
 0x185   : > { %1595 = vst [vmem:[#allocation2 + $0xc1] sm:$0xff] %v1508_v55  ;;  %v1479_v50 = vadd.f32 1.0, %v1447_v2  ;;  %v1129_v13 = vadd.f32 0.2548296, %v1097_v47  ;;  %v968_v40 = vmul.f32 %v5283_v59, %v936_v20  ;;  %4056 = vmatpush3.msra.mxu0 %v3426_v36  ;;  %v5314_v53 = vadd.f32 %v5248_v28, %v5278_v42  ;;  %4136 = vmatpush3.msra.mxu1 %v3426_v36  ;;  %v623_v55 = vpop.f32.mrf.mxu0 }
 0x186   : > { %4268 = vrcp.f32 %v811_v62  ;;  %v1350_v37 = vsub.f32 1.0, %v1318_v49  ;;  %v810_v30 = vadd.f32 1.0, %v778_v14  ;;  %vm1382_vm3 = vcmp.ge.f32.partialorder %v5116_v0, 0.0 }
 0x187   : > { %v1511_v18 = vmul.f32 %v1479_v50, %v5262_v10  ;;  %v1161_v9 = vmul.f32 %v5216_v51, %v1129_v13  ;;  %v1000_v56 = vadd.f32 1.4214138, %v968_v40  ;;  %v5319_v51 = vadd.f32 %v5248_v28, %v613_v41  ;;  %v4018_v13 = vpop.f32.mrf.mxu0 }
 0x188   : > { %v1414_v43 = vsub.f32 0.0, %v1350_v37  ;;  %4270 = vrcp.f32 %v810_v30  ;;  %v5322_v17 = vadd.f32 %v5248_v28, %v4015_v39  ;;  %v1195_v44 = vsub.f32 0.0, %v5288_v25 }
 0x189   : > { %1598 = vst [vmem:[#allocation2 + $0xe1] sm:$0xff] %v1511_v18  ;;  %v1321_v45 = vmul.f32 %v4265_v3, %v1161_v9  ;;  %v1032_v16 = vmul.f32 %v5283_v59, %v1000_v56  ;;  %v5326_v4 = vmul.f32 0.70710677, %v5314_v53  ;;  %v678_v33 = vmul.f32 0.5, %v5103_v21 }
 0x18a   : > { %v1446_v10 = vsel %vm1382_vm3, %v1350_v37, %v1414_v43  ;;  %v1194_v7 = vsub.f32 0.0, %v5301_v24  ;;  %v5332_v6 = vmul.f32 0.70710677, %v5319_v51  ;;  %vm1385_vm4 = vcmp.ge.f32.partialorder %v5123_v52, 0.0 }
 0x18b   : > { %v1353_v63 = vsub.f32 1.0, %v1321_v45  ;;  %v1478_v32 = vadd.f32 1.0, %v1446_v10  ;;  %v1064_v5 = vadd.f32 -0.28449672, %v1032_v16  ;;  %v749_v23 = vand.u32 2147483647, %v5326_v4  ;;  %v633_v10 = vpop.f32.mrf.mxu0 }
 0x18c   : > { %v5337_v31 = vmul.f32 0.70710677, %v5322_v17  ;;  %v1227_v21 = vmul.f32 %v1195_v44, %v5288_v25  ;;  %v748_v57 = vand.u32 2147483647, %v5332_v6  ;;  %v681_v26 = vmul.f32 0.5, %v5108_v15 }
 0x18d   : > { %v1417_v0 = vsub.f32 0.0, %v1353_v63  ;;  %v1510_v42 = vmul.f32 %v1478_v32, %v678_v33  ;;  %v1096_v60 = vmul.f32 %v5283_v59, %v1064_v5  ;;  %v781_v19 = vmul.f32 0.3275911, %v749_v23 }
 0x18e   : > { %v751_v35 = vand.u32 2147483647, %v5337_v31  ;;  %v680_v52 = vmul.f32 0.5, %v5139_v11  ;;  %v1226_v8 = vmul.f32 %v1194_v7, %v5301_v24  ;;  %v780_v12 = vmul.f32 0.3275911, %v748_v57 }
 0x18f   : > { %v1449_v61 = vsel %vm1385_vm4, %v1353_v63, %v1417_v0  ;;  %1597 = vst [vmem:[#allocation2 + $0xd9] sm:$0xff] %v1510_v42  ;;  %v1128_v27 = vadd.f32 0.2548296, %v1096_v60  ;;  %v813_v54 = vadd.f32 1.0, %v781_v19  ;;  %v1197_v47 = vsub.f32 0.0, %v749_v23 }
 0x190   : > { %v1481_v58 = vadd.f32 1.0, %v1449_v61  ;;  %v4267_v48 = vpop.eup %4266  ;;  %v783_v41 = vmul.f32 0.3275911, %v751_v35  ;;  %vm1384_vm5 = vcmp.ge.f32.partialorder %v5163_v1, 0.0  ;;  %v1280_v15 = vmul.f32 1.442695, %v1227_v21 }
 0x191   : > { %v1160_v25 = vmul.f32 %v5283_v59, %v1128_v27  ;;  %4272 = vrcp.f32 %v813_v54  ;;  %v812_v3 = vadd.f32 1.0, %v780_v12  ;;  %v5350_v11 = vmul.f32 0.5, %v5251_v22  ;;  %v4021_v54 = vpop.f32.mrf.mxu0 }
 0x192   : > { %v1513_v29 = vmul.f32 %v1481_v58, %v681_v26  ;;  %v815_v20 = vadd.f32 1.0, %v783_v41  ;;  %v5354_v62 = vmul.f32 0.5, %v5254_v34  ;;  %v1278_v59 = vmul.f32 1.442695, %v1226_v8 }
 0x193   : > { %v5346_v36 = vpop.eup %4268  ;;  %v1320_v2 = vmul.f32 %v4267_v48, %v1160_v25  ;;  %v1196_v50 = vsub.f32 0.0, %v748_v57  ;;  %v624_v49 = vadd.f32 %v5248_v28, %v623_v55  ;;  %v1229_v37 = vmul.f32 %v1197_v47, %v749_v23 }
 0x194   : > { %1600 = vst [vmem:[#allocation2 + $0xf9] sm:$0xff] %v1513_v29  ;;  %v907_v24 = vmul.f32 1.0614054, %v5346_v36  ;;  %4274 = vrcp.f32 %v812_v3  ;;  %v1199_v9 = vsub.f32 0.0, %v751_v35  ;;  %v5364_v56 = vadd.f32 %v5248_v28, %v4018_v13 }
 0x195   : > { %v5357_v14 = vpop.eup %4270  ;;  %v1352_v40 = vsub.f32 1.0, %v1320_v2  ;;  %4276 = vpow2.f32 %v1280_v15  ;;  %v5360_v30 = vmul.f32 0.70710677, %v624_v49  ;;  %v1228_v45 = vmul.f32 %v1196_v50, %v748_v57 }
 0x196   : > { %v939_v18 = vadd.f32 -1.4531521, %v907_v24  ;;  %v906_v22 = vmul.f32 1.0614054, %v5357_v14  ;;  %4278 = vrcp.f32 %v815_v20  ;;  %v1284_v33 = vmul.f32 1.442695, %v1229_v37 }
 0x197   : > { %v1416_v39 = vsub.f32 0.0, %v1352_v40  ;;  %4280 = vpow2.f32 %v1278_v59  ;;  %v750_v16 = vand.u32 2147483647, %v5360_v30  ;;  %v5370_v32 = vmul.f32 0.70710677, %v5364_v56 }
 0x198   : > { %v971_v34 = vmul.f32 %v5346_v36, %v939_v18  ;;  %v938_v43 = vadd.f32 -1.4531521, %v906_v22  ;;  %v1231_v7 = vmul.f32 %v1199_v9, %v751_v35  ;;  %v5375_v60 = vmul.f32 0.5, %v5314_v53 }
 0x199   : > { %v1448_v63 = vsel %vm1384_vm5, %v1352_v40, %v1416_v39  ;;  %v782_v23 = vmul.f32 0.3275911, %v750_v16  ;;  %v753_v61 = vand.u32 2147483647, %v5370_v32  ;;  %v5379_v1 = vadd.f32 %v5248_v28, %v633_v10 }
 0x19a   : > { %v1003_v44 = vadd.f32 1.4214138, %v971_v34  ;;  %v1480_v5 = vadd.f32 1.0, %v1448_v63  ;;  %v970_v0 = vmul.f32 %v5357_v14, %v938_v43  ;;  %v1282_v57 = vmul.f32 1.442695, %v1228_v45 }
 0x19b   : > { %v814_v26 = vadd.f32 1.0, %v782_v23  ;;  %4282 = vpow2.f32 %v1284_v33  ;;  %v5382_v27 = vmul.f32 0.5, %v5319_v51  ;;  %v785_v35 = vmul.f32 0.3275911, %v753_v61 }
 0x19c   : > { %v1035_v42 = vmul.f32 %v5346_v36, %v1003_v44  ;;  %v1512_v21 = vmul.f32 %v1480_v5, %v680_v52  ;;  %v1002_v19 = vadd.f32 1.4214138, %v970_v0  ;;  %v1288_v53 = vmul.f32 1.442695, %v1231_v7 }
 0x19d   : > { %4284 = vrcp.f32 %v814_v26  ;;  %v5386_v8 = vmul.f32 0.70710677, %v5379_v1  ;;  %v1198_v55 = vsub.f32 0.0, %v750_v16  ;;  %v817_v29 = vadd.f32 1.0, %v785_v35 }
 0x19e   : > { %v1067_v58 = vadd.f32 -0.28449672, %v1035_v42  ;;  %1599 = vst [vmem:[#allocation2 + $0xf1] sm:$0xff] %v1512_v21  ;;  %v1034_v48 = vmul.f32 %v5357_v14, %v1002_v19  ;;  %v5388_v12 = vpop.eup %4272  ;;  %v1201_v25 = vsub.f32 0.0, %v753_v61  ;;  %4286 = vpow2.f32 %v1282_v57 }
 0x19f   : > { %v909_v51 = vmul.f32 1.0614054, %v5388_v12  ;;  %v752_v41 = vand.u32 2147483647, %v5386_v8  ;;  %v5394_v3 = vmul.f32 0.5, %v5322_v17  ;;  %4288 = vrcp.f32 %v817_v29 }
 0x1a0   : > { %v1099_v52 = vmul.f32 %v5346_v36, %v1067_v58  ;;  %v1066_v47 = vadd.f32 -0.28449672, %v1034_v48  ;;  %v5397_v2 = vadd.f32 %v5248_v28, %v4021_v54  ;;  %vm1387_vm6 = vcmp.ge.f32.partialorder %v5271_v38, 0.0 }
 0x1a1   : > { %v5399_v24 = vpop.eup %4274  ;;  %v941_v59 = vadd.f32 -1.4531521, %v909_v51  ;;  %v5403_v50 = vmul.f32 0.5, %v624_v49  ;;  %v784_v13 = vmul.f32 0.3275911, %v752_v41  ;;  %4290 = vpow2.f32 %v1288_v53 }
 0x1a2   : > { %v1131_v15 = vadd.f32 0.2548296, %v1099_v52  ;;  %v1098_v20 = vmul.f32 %v5357_v14, %v1066_v47  ;;  %v4277_v40 = vpop.eup %4276  ;;  %v908_v17 = vmul.f32 1.0614054, %v5399_v24  ;;  %v1230_v37 = vmul.f32 %v1198_v55, %v750_v16  ;;  %v643_v55 = vpop.f32.mrf.mxu0 }
 0x1a3   : > { %v5407_v22 = vpop.eup %4278  ;;  %v973_v39 = vmul.f32 %v5388_v12, %v941_v59  ;;  %v1233_v34 = vmul.f32 %v1201_v25, %v753_v61  ;;  %v816_v43 = vadd.f32 1.0, %v784_v13  ;;  %vm1386_vm7 = vcmp.ge.f32.partialorder %v5276_v46, 0.0 }
 0x1a4   : > { %v1163_v18 = vmul.f32 %v5346_v36, %v1131_v15  ;;  %v1130_v9 = vadd.f32 0.2548296, %v1098_v20  ;;  %v4281_v45 = vpop.eup %4280  ;;  %v940_v49 = vadd.f32 -1.4531521, %v908_v17  ;;  %v911_v63 = vmul.f32 1.0614054, %v5407_v22 }
 0x1a5   : > { %v5413_v36 = vmul.f32 0.70710677, %v5397_v2  ;;  %v1005_v16 = vadd.f32 1.4214138, %v973_v39  ;;  %4292 = vrcp.f32 %v816_v43  ;;  %v1200_v33 = vsub.f32 0.0, %v752_v41 }
 0x1a6   : > { %v1323_v10 = vmul.f32 %v4277_v40, %v1163_v18  ;;  %v1162_v44 = vmul.f32 %v5357_v14, %v1130_v9  ;;  %v972_v0 = vmul.f32 %v5399_v24, %v940_v49  ;;  %v943_v7 = vadd.f32 -1.4531521, %v911_v63 }
 0x1a7   : > { %v5418_v23 = vand.u32 2147483647, %v5413_v36  ;;  %v1037_v61 = vmul.f32 %v5388_v12, %v1005_v16  ;;  %v1286_v21 = vmul.f32 1.442695, %v1230_v37  ;;  %v5422_v19 = vmul.f32 0.5, %v5364_v56 }
 0x1a8   : > { %v1355_v5 = vsub.f32 1.0, %v1323_v10  ;;  %v1322_v42 = vmul.f32 %v4281_v45, %v1162_v44  ;;  %v1004_v26 = vadd.f32 1.4214138, %v972_v0  ;;  %v975_v14 = vmul.f32 %v5407_v22, %v943_v7  ;;  %v4283_v35 = vpop.eup %4282 }
 0x1a9   : > { %v787_v58 = vmul.f32 0.3275911, %v5418_v23  ;;  %v1069_v53 = vadd.f32 -0.28449672, %v1037_v61  ;;  %v1292_v54 = vmul.f32 1.442695, %v1233_v34  ;;  %v1232_v52 = vmul.f32 %v1200_v33, %v752_v41 }
 0x1aa   : > { %v1419_v57 = vsub.f32 0.0, %v1355_v5  ;;  %v1354_v48 = vsub.f32 1.0, %v1322_v42  ;;  %v5426_v29 = vpop.eup %4284  ;;  %v1036_v56 = vmul.f32 %v5399_v24, %v1004_v26  ;;  %v1007_v47 = vadd.f32 1.4214138, %v975_v14 }
 0x1ab   : > { %v819_v51 = vadd.f32 1.0, %v787_v58  ;;  %v1101_v59 = vmul.f32 %v5388_v12, %v1069_v53  ;;  %v910_v13 = vmul.f32 1.0614054, %v5426_v29  ;;  %v4287_v40 = vpop.eup %4286  ;;  %v5435_v17 = vadd.f32 %v5248_v28, %v643_v55 }
 0x1ac   : > { %v1451_v25 = vsel %vm1387_vm6, %v1355_v5, %v1419_v57  ;;  %v1418_v20 = vsub.f32 0.0, %v1354_v48  ;;  %v1068_v18 = vadd.f32 -0.28449672, %v1036_v56  ;;  %v1039_v41 = vmul.f32 %v5407_v22, %v1007_v47  ;;  %v5437_v38 = vpop.eup %4288 }
 0x1ad   : > { %v1483_v15 = vadd.f32 1.0, %v1451_v25  ;;  %4294 = vrcp.f32 %v819_v51  ;;  %v1133_v39 = vadd.f32 0.2548296, %v1101_v59  ;;  %v942_v34 = vadd.f32 -1.4531521, %v910_v13  ;;  %v4024_v25 = vpop.f32.mrf.mxu0 }
 0x1ae   : > { %v1450_v9 = vsel %vm1386_vm7, %v1354_v48, %v1418_v20  ;;  %vm1389_vm8 = vcmp.ge.f32.partialorder %v5326_v4, 0.0  ;;  %v1100_v45 = vmul.f32 %v5399_v24, %v1068_v18  ;;  %v1071_v10 = vadd.f32 -0.28449672, %v1039_v41  ;;  %v4291_v63 = vpop.eup %4290 }
 0x1af   : > { %v1515_v37 = vmul.f32 %v1483_v15, %v5350_v11  ;;  %v1482_v43 = vadd.f32 1.0, %v1450_v9  ;;  %v913_v49 = vmul.f32 1.0614054, %v5437_v38  ;;  %v1165_v44 = vmul.f32 %v5388_v12, %v1133_v39 }
 0x1b0   : > { %v974_v16 = vmul.f32 %v5426_v29, %v942_v34  ;;  %4296 = vpow2.f32 %v1286_v21  ;;  %v1290_v11 = vmul.f32 1.442695, %v1232_v52  ;;  %v1132_v33 = vadd.f32 0.2548296, %v1100_v45 }
 0x1b1   : > { %1602 = vst [vmem:[#allocation2 + $0x111] sm:$0xff] %v1515_v37  ;;  %v1514_v46 = vmul.f32 %v1482_v43, %v5354_v62  ;;  %v1103_v5 = vmul.f32 %v5407_v22, %v1071_v10  ;;  %v945_v0 = vadd.f32 -1.4531521, %v913_v49  ;;  %v1325_v7 = vmul.f32 %v4283_v35, %v1165_v44 }
 0x1b2   : > { %vm1388_vm9 = vcmp.ge.f32.partialorder %v5332_v6, 0.0  ;;  %v1006_v42 = vadd.f32 1.4214138, %v974_v16  ;;  %v1203_v61 = vsub.f32 0.0, %v5418_v23  ;;  %v5452_v57 = vmul.f32 0.70710677, %v5435_v17  ;;  %v5454_v12 = vpop.eup %4292 }
 0x1b3   : > { %1601 = vst [vmem:[#allocation2 + $0x109] sm:$0xff] %v1514_v46  ;;  %v1164_v21 = vmul.f32 %v5399_v24, %v1132_v33  ;;  %v1135_v26 = vadd.f32 0.2548296, %v1103_v5  ;;  %v977_v62 = vmul.f32 %v5437_v38, %v945_v0  ;;  %4298 = vpow2.f32 %v1292_v54 }
 0x1b4   : > { %v1357_v14 = vsub.f32 1.0, %v1325_v7  ;;  %vm1391_vm10 = vcmp.ge.f32.partialorder %v5337_v31, 0.0  ;;  %v1038_v58 = vmul.f32 %v5426_v29, %v1006_v42  ;;  %v912_v35 = vmul.f32 1.0614054, %v5454_v12  ;;  %v653_v7 = vpop.f32.mrf.mxu0 }
 0x1b5   : > { %v754_v48 = vand.u32 2147483647, %v5452_v57  ;;  %v1324_v53 = vmul.f32 %v4287_v40, %v1164_v21  ;;  %v1167_v52 = vmul.f32 %v5407_v22, %v1135_v26  ;;  %v1009_v55 = vadd.f32 1.4214138, %v977_v62 }
 0x1b6   : > { %4300 = vpow2.f32 %v1290_v11  ;;  %v1421_v24 = vsub.f32 0.0, %v1357_v14  ;;  %v1070_v56 = vadd.f32 -0.28449672, %v1038_v58  ;;  %v944_v47 = vadd.f32 -1.4531521, %v912_v35 }
 0x1b7   : > { %v1235_v54 = vmul.f32 %v1203_v61, %v5418_v23  ;;  %v1356_v51 = vsub.f32 1.0, %v1324_v53  ;;  %v1327_v15 = vmul.f32 %v4291_v63, %v1167_v52  ;;  %v1041_v20 = vmul.f32 %v5437_v38, %v1009_v55 }
 0x1b8   : > { %v786_v59 = vmul.f32 0.3275911, %v754_v48  ;;  %v1453_v13 = vsel %vm1389_vm8, %v1357_v14, %v1421_v24  ;;  %v1102_v40 = vmul.f32 %v5426_v29, %v1070_v56  ;;  %v976_v22 = vmul.f32 %v5454_v12, %v944_v47 }
 0x1b9   : > { %v5470_v18 = vadd.f32 %v5248_v28, %v4024_v25  ;;  %v1485_v41 = vadd.f32 1.0, %v1453_v13  ;;  %v1420_v37 = vsub.f32 0.0, %v1356_v51  ;;  %v1359_v9 = vsub.f32 1.0, %v1327_v15 }
 0x1ba   : > { %v1073_v39 = vadd.f32 -0.28449672, %v1041_v20  ;;  %v5472_v23 = vpop.eup %4294  ;;  %v1134_v34 = vadd.f32 0.2548296, %v1102_v40  ;;  %v1008_v43 = vadd.f32 1.4214138, %v976_v22 }
 0x1bb   : > { %v818_v45 = vadd.f32 1.0, %v786_v59  ;;  %v1202_v10 = vsub.f32 0.0, %v754_v48  ;;  %v1517_v4 = vmul.f32 %v1485_v41, %v5375_v60  ;;  %v1452_v49 = vsel %vm1388_vm9, %v1356_v51, %v1420_v37 }
 0x1bc   : > { %v1423_v63 = vsub.f32 0.0, %v1359_v9  ;;  %vm1390_vm11 = vcmp.ge.f32.partialorder %v5360_v30, 0.0  ;;  %v1105_v44 = vmul.f32 %v5437_v38, %v1073_v39  ;;  %v1484_v16 = vadd.f32 1.0, %v1452_v49 }
 0x1bd   : > { %v1166_v11 = vmul.f32 %v5426_v29, %v1134_v34  ;;  %v1040_v46 = vmul.f32 %v5454_v12, %v1008_v43  ;;  %v915_v33 = vmul.f32 1.0614054, %v5472_v23  ;;  %v4297_v5 = vpop.eup %4296  ;;  %1604 = vst [vmem:[#allocation2 + $0x129] sm:$0xff] %v1517_v4  ;;  %v1296_v6 = vmul.f32 1.442695, %v1235_v54 }
 0x1be   : > { %v1455_v60 = vsel %vm1391_vm10, %v1359_v9, %v1423_v63  ;;  %v1137_v0 = vadd.f32 0.2548296, %v1105_v44  ;;  %4302 = vrcp.f32 %v818_v45  ;;  %v1516_v42 = vmul.f32 %v1484_v16, %v5382_v27  ;;  %v5512_v9 = vld [vmem:[%s7228_s3] ss:$0 sm:$0xff]  ;;  %v1715_v45 = vld [vmem:[#allocation2 + $0x1] sm:$0xff] }
 0x1bf   : > { %v1487_v61 = vadd.f32 1.0, %v1455_v60  ;;  %v1326_v21 = vmul.f32 %v4297_v5, %v1166_v11  ;;  %vm1393_vm12 = vcmp.ge.f32.partialorder %v5370_v32, 0.0  ;;  %v1072_v29 = vadd.f32 -0.28449672, %v1040_v46  ;;  %v5525_v63 = vld [vmem:[%s7228_s3 + $0x2] ss:$0 sm:$0xff] }
 0x1c0   : > { %v1169_v26 = vmul.f32 %v5437_v38, %v1137_v0  ;;  %v947_v62 = vadd.f32 -1.4531521, %v915_v33  ;;  %v1234_v14 = vmul.f32 %v1202_v10, %v754_v48  ;;  %v5488_v58 = vmul.f32 0.70710677, %v5470_v18  ;;  %v4299_v31 = vpop.eup %4298  ;;  %1603 = vst [vmem:[#allocation2 + $0x121] sm:$0xff] %v1516_v42  ;;  %v1816_v44 = vld [vmem:[#allocation2 + $0x2] sm:$0xff] }
 0x1c1   : > { %v1519_v35 = vmul.f32 %v1487_v61, %v5394_v3  ;;  %v1358_v53 = vsub.f32 1.0, %v1326_v21  ;;  %v1104_v52 = vmul.f32 %v5454_v12, %v1072_v29  ;;  %v5493_v27 = vadd.f32 %v5248_v28, %v653_v7  ;;  %v1917_v7 = vld [vmem:[#allocation2 + $0x18] sm:$0xff] }
 0x1c2   : > { %v1329_v55 = vmul.f32 %v4299_v31, %v1169_v26  ;;  %v979_v25 = vmul.f32 %v5472_v23, %v947_v62  ;;  %4304 = vpow2.f32 %v1296_v6  ;;  %v757_v38 = vand.u32 2147483647, %v5488_v58  ;;  %v5533_v6 = vld [vmem:[%s7228_s3 + $0x3] ss:$0 sm:$0xff]  ;;  %v2018_v62 = vld [vmem:[#allocation2 + $0x19] sm:$0xff] }
 0x1c3   : > { %v4301_v48 = vpop.eup %4300  ;;  %1606 = vst [vmem:[#allocation2 + $0x141] sm:$0xff] %v1519_v35  ;;  %v1422_v24 = vsub.f32 0.0, %v1358_v53  ;;  %v5498_v56 = vmul.f32 0.5, %v5379_v1  ;;  %v1136_v47 = vadd.f32 0.2548296, %v1104_v52  ;;  %vm1392_vm13 = vcmp.ge.f32.partialorder %v5386_v8, 0.0 }
 0x1c4   : > { %v5501_v3 = vmul.f32 0.70710677, %v5493_v27  ;;  %v1361_v54 = vsub.f32 1.0, %v1329_v55  ;;  %v1011_v28 = vadd.f32 1.4214138, %v979_v25  ;;  %v1205_v15 = vsub.f32 0.0, %v757_v38 }
 0x1c5   : > { %v789_v51 = vmul.f32 0.3275911, %v757_v38  ;;  %v1454_v20 = vsel %vm1390_vm11, %v1358_v53, %v1422_v24  ;;  %v1168_v59 = vmul.f32 %v5454_v12, %v1136_v47  ;;  %v1294_v13 = vmul.f32 1.442695, %v1234_v14  ;;  %v5517_v12 = vld [vmem:[%s7228_s3 + $0x1] ss:$0 sm:$0xff] }
 0x1c6   : > { %v756_v40 = vand.u32 2147483647, %v5501_v3  ;;  %v1486_v1 = vadd.f32 1.0, %v1454_v20  ;;  %v1425_v22 = vsub.f32 0.0, %v1361_v54  ;;  %v1043_v41 = vmul.f32 %v5472_v23, %v1011_v28  ;;  %v1716_v53 = vld [vmem:[#allocation2 + $0x9] sm:$0xff]  ;;  %v2119_v25 = vld [vmem:[#allocation2 + $0x1a] sm:$0xff] }
 0x1c7   : > { %v821_v37 = vadd.f32 1.0, %v789_v51  ;;  %v1328_v39 = vmul.f32 %v4301_v48, %v1168_v59  ;;  %v1237_v34 = vmul.f32 %v1205_v15, %v757_v38  ;;  %v1751_v0 = vmul.f32 %v5517_v12, %v1715_v45  ;;  %v5551_v38 = vld [vmem:[#allocation2 + $0x30] sm:$0xff]  ;;  %v5557_v8 = vld [vmem:[%s7228_s3 + $0x6] ss:$0 sm:$0xff]  ;;  %v5564_v20 = vld [vmem:[%s7228_s3 + $0x5] ss:$0 sm:$0xff] }
 0x1c8   : > { %v788_v43 = vmul.f32 0.3275911, %v756_v40  ;;  %v1204_v30 = vsub.f32 0.0, %v756_v40  ;;  %v1518_v10 = vmul.f32 %v1486_v1, %v5403_v50  ;;  %v1457_v4 = vsel %vm1393_vm12, %v1361_v54, %v1425_v22  ;;  %v4445_v50 = vld [vmem:[#allocation2] sm:$0xff]  ;;  %v1817_v54 = vld [vmem:[#allocation2 + $0xa] sm:$0xff]  ;;  %v5568_v59 = vld [vmem:[#allocation2 + $0x32] sm:$0xff] }
 0x1c9   : > { %v1075_v49 = vadd.f32 -0.28449672, %v1043_v41  ;;  %4306 = vrcp.f32 %v821_v37  ;;  %v1489_v16 = vadd.f32 1.0, %v1457_v4  ;;  %v1360_v11 = vsub.f32 1.0, %v1328_v39  ;;  %v5573_v41 = vld [vmem:[#allocation2 + $0x20] sm:$0xff] }
 0x1ca   : > { %v1300_v46 = vmul.f32 1.442695, %v1237_v34  ;;  %v820_v33 = vadd.f32 1.0, %v788_v43  ;;  %1605 = vst [vmem:[#allocation2 + $0x139] sm:$0xff] %v1518_v10  ;;  %v1236_v60 = vmul.f32 %v1204_v30, %v756_v40  ;;  %v1650_v32 = vmul.f32 %v4445_v50, %v5512_v9  ;;  %v5575_v37 = vld [vmem:[#allocation2 + $0x21] sm:$0xff] }
 0x1cb   : > { %v1107_v5 = vmul.f32 %v5472_v23, %v1075_v49  ;;  %v5535_v42 = vpop.eup %4302  ;;  %v1521_v61 = vmul.f32 %v1489_v16, %v5422_v19  ;;  %v1424_v21 = vsub.f32 0.0, %v1360_v11  ;;  %v5539_v29 = vmul.f32 0.5, %v5397_v2  ;;  %v5549_v2 = vld [vmem:[%s7228_s3 + $0x4] ss:$0 sm:$0xff]  ;;  %v5582_v43 = vld [vmem:[%s7228_s3 + $0x7] ss:$0 sm:$0xff] }
 0x1cc   : > { %v1852_v26 = vmul.f32 %v5525_v63, %v1816_v44  ;;  %v914_v31 = vmul.f32 1.0614054, %v5535_v42  ;;  %4308 = vrcp.f32 %v820_v33  ;;  %v1298_v35 = vmul.f32 1.442695, %v1236_v60  ;;  %v5591_v10 = vld [vmem:[#allocation2 + $0x22] sm:$0xff] }
 0x1cd   : > { %v1139_v14 = vadd.f32 0.2548296, %v1107_v5  ;;  %1608 = vst [vmem:[#allocation2 + $0x159] sm:$0xff] %v1521_v61  ;;  %v1456_v52 = vsel %vm1392_vm13, %v1360_v11, %v1424_v21  ;;  %4310 = vpow2.f32 %v1294_v13  ;;  %v1783_v55 = vadd.f32 %v1751_v0, %v1650_v32 }
 0x1ce   : > { %v1953_v19 = vmul.f32 %v5533_v6, %v1917_v7  ;;  %v1488_v48 = vadd.f32 1.0, %v1456_v52  ;;  %v946_v47 = vadd.f32 -1.4531521, %v914_v31  ;;  %4312 = vpow2.f32 %v1300_v46  ;;  %v5607_v31 = vld [vmem:[#allocation2 + $0x38] sm:$0xff] }
 0x1cf   : > { %v1171_v24 = vmul.f32 %v5472_v23, %v1139_v14  ;;  %v4305_v28 = vpop.eup %4304  ;;  %vm1395_vm14 = vcmp.ge.f32.partialorder %v5413_v36, 0.0  ;;  %4314 = vpow2.f32 %v1298_v35  ;;  %v1884_v51 = vadd.f32 %v1852_v26, %v1783_v55  ;;  %v5566_v23 = vld [vmem:[#allocation2 + $0x31] sm:$0xff] }
 0x1d0   : > { %v2054_v15 = vmul.f32 %v5549_v2, %v2018_v62  ;;  %v1520_v13 = vmul.f32 %v1488_v48, %v5498_v56  ;;  %v978_v1 = vmul.f32 %v5535_v42, %v946_v47  ;;  %v2155_v22 = vmul.f32 %v5564_v20, %v2119_v25  ;;  %v5587_v56 = vld [vmem:[%s7228_s3 + $0x8] ss:$0 sm:$0xff] }
 0x1d1   : > { %v1331_v40 = vmul.f32 %v4305_v28, %v1171_v24  ;;  %v1985_v39 = vadd.f32 %v1953_v19, %v1884_v51  ;;  %v2257_v34 = vmul.f32 %v5557_v8, %v5551_v38  ;;  %v1752_v30 = vmul.f32 %v5517_v12, %v1716_v53 }
 0x1d2   : > { %v1853_v45 = vmul.f32 %v5525_v63, %v1817_v54  ;;  %1607 = vst [vmem:[#allocation2 + $0x151] sm:$0xff] %v1520_v13  ;;  %v1010_v49 = vadd.f32 1.4214138, %v978_v1  ;;  %v2358_v44 = vmul.f32 %v5582_v43, %v5566_v23  ;;  %v2459_v16 = vmul.f32 %v5587_v56, %v5568_v59  ;;  %v5618_v54 = vld [vmem:[#allocation2 + $0x3a] sm:$0xff] }
 0x1d3   : > { %v1363_v4 = vsub.f32 1.0, %v1331_v40  ;;  %v2086_v11 = vadd.f32 %v2054_v15, %v1985_v39  ;;  %v1784_v46 = vadd.f32 %v1752_v30, %v1650_v32  ;;  %v1954_v33 = vmul.f32 %v5533_v6, %v5573_v41  ;;  %v5609_v32 = vld [vmem:[#allocation2 + $0x39] sm:$0xff] }
 0x1d4   : > { %v2055_v5 = vmul.f32 %v5549_v2, %v5575_v37  ;;  %v1042_v50 = vmul.f32 %v5535_v42, %v1010_v49  ;;  %v2156_v0 = vmul.f32 %v5564_v20, %v5591_v10  ;;  %v1652_v61 = vmul.f32 %v5512_v9, %v1917_v7 }
 0x1d5   : > { %v1427_v60 = vsub.f32 0.0, %v1363_v4  ;;  %v2187_v26 = vadd.f32 %v2155_v22, %v2086_v11  ;;  %v1885_v14 = vadd.f32 %v1853_v45, %v1784_v46  ;;  %v1753_v35 = vmul.f32 %v5517_v12, %v2018_v62 }
 0x1d6   : > { %v5605_v21 = vpop.eup %4306  ;;  %v1854_v53 = vmul.f32 %v5525_v63, %v2119_v25  ;;  %v1074_v55 = vadd.f32 -0.28449672, %v1042_v50  ;;  %v1955_v7 = vmul.f32 %v5533_v6, %v5551_v38  ;;  %v2258_v25 = vmul.f32 %v5557_v8, %v5607_v31 }
 0x1d7   : > { %v1459_v52 = vsel %vm1395_vm14, %v1363_v4, %v1427_v60  ;;  %v917_v19 = vmul.f32 1.0614054, %v5605_v21  ;;  %v2289_v24 = vadd.f32 %v2257_v34, %v2187_v26  ;;  %v1986_v47 = vadd.f32 %v1954_v33, %v1885_v14  ;;  %v5633_v4 = vld [vmem:[%s7229_s4] ss:$0 sm:$0xff] }
 0x1d8   : > { %v1491_v48 = vadd.f32 1.0, %v1459_v52  ;;  %v1785_v28 = vadd.f32 %v1753_v35, %v1652_v61  ;;  %v1106_v51 = vmul.f32 %v5535_v42, %v1074_v55  ;;  %v2359_v36 = vmul.f32 %v5582_v43, %v5609_v32 }
 0x1d9   : > { %v949_v62 = vadd.f32 -1.4531521, %v917_v19  ;;  %v5625_v15 = vpop.eup %4308  ;;  %v2390_v40 = vadd.f32 %v2358_v44, %v2289_v24  ;;  %v2087_v1 = vadd.f32 %v2055_v5, %v1986_v47  ;;  %v2460_v49 = vmul.f32 %v5587_v56, %v5618_v54  ;;  %v5639_v5 = vld [vmem:[#allocation2 + $0x48] sm:$0xff] }
 0x1da   : > { %v1523_v13 = vmul.f32 %v1491_v48, %v5539_v29  ;;  %v1886_v22 = vadd.f32 %v1854_v53, %v1785_v28  ;;  %v4311_v39 = vpop.eup %4310  ;;  %v1138_v34 = vadd.f32 0.2548296, %v1106_v51  ;;  %v916_v45 = vmul.f32 1.0614054, %v5625_v15  ;;  %v5649_v53 = vld [vmem:[#allocation2 + $0x49] sm:$0xff] }
 0x1db   : > { %v981_v30 = vmul.f32 %v5605_v21, %v949_v62  ;;  %v4313_v11 = vpop.eup %4312  ;;  %v2491_v29 = vadd.f32 %v2459_v16, %v2390_v40  ;;  %v2188_v44 = vadd.f32 %v2156_v0, %v2087_v1  ;;  %v2056_v33 = vmul.f32 %v5549_v2, %v5566_v23 }
 0x1dc   : > { %1610 = vst [vmem:[#allocation2 + $0x171] sm:$0xff] %v1523_v13  ;;  %v1987_v46 = vadd.f32 %v1955_v7, %v1886_v22  ;;  %v5641_v60 = vpop.eup %4314  ;;  %v1170_v50 = vmul.f32 %v5535_v42, %v1138_v34  ;;  %v948_v26 = vadd.f32 -1.4531521, %v916_v45  ;;  %v2157_v14 = vmul.f32 %v5564_v20, %v5568_v59  ;;  %v5665_v22 = vld [vmem:[#allocation2 + $0x4a] sm:$0xff] }
 0x1dd   : > { %v1013_v61 = vadd.f32 1.4214138, %v981_v30  ;;  %v5647_v35 = vadd.f32 %v5633_v4, %v2491_v29  ;;  %v2290_v16 = vadd.f32 %v2258_v25, %v2188_v44  ;;  %v1653_v52 = vmul.f32 %v5512_v9, %v5573_v41 }
 0x1de   : > { %v2088_v0 = vadd.f32 %v2056_v33, %v1987_v46  ;;  %v1330_v55 = vmul.f32 %v4311_v39, %v1170_v50  ;;  %v980_v42 = vmul.f32 %v5625_v15, %v948_v26  ;;  %v2259_v7 = vmul.f32 %v5557_v8, %v5639_v5 }
 0x1df   : > { %v1045_v19 = vmul.f32 %v5605_v21, %v1013_v61  ;;  %v5658_v48 = vmul.f32 0.70710677, %v5647_v35  ;;  %v2391_v24 = vadd.f32 %v2359_v36, %v2290_v16  ;;  %v1754_v28 = vmul.f32 %v5517_v12, %v5575_v37 }
 0x1e0   : > { %v2189_v47 = vadd.f32 %v2157_v14, %v2088_v0  ;;  %v1362_v51 = vsub.f32 1.0, %v1330_v55  ;;  %v1012_v25 = vadd.f32 1.4214138, %v980_v42  ;;  %v2360_v41 = vmul.f32 %v5582_v43, %v5649_v53 }
 0x1e1   : > { %v1077_v62 = vadd.f32 -0.28449672, %v1045_v19  ;;  %v2626_v13 = vand.u32 2147483647, %v5658_v48  ;;  %v2492_v40 = vadd.f32 %v2460_v49, %v2391_v24  ;;  %v1786_v39 = vadd.f32 %v1754_v28, %v1653_v52 }
 0x1e2   : > { %v2291_v1 = vadd.f32 %v2259_v7, %v2189_v47  ;;  %vm1394_vm15 = vcmp.ge.f32.partialorder %v5452_v57, 0.0  ;;  %v1426_v36 = vsub.f32 0.0, %v1362_v51  ;;  %v1044_v37 = vmul.f32 %v5625_v15, %v1012_v25 }
 0x1e3   : > { %v1109_v34 = vmul.f32 %v5605_v21, %v1077_v62  ;;  %v2658_v30 = vmul.f32 0.3275911, %v2626_v13  ;;  %v5671_v45 = vadd.f32 %v5633_v4, %v2492_v40  ;;  %v1855_v44 = vmul.f32 %v5525_v63, %v5591_v10 }
 0x1e4   : > { %v2392_v29 = vadd.f32 %v2360_v41, %v2291_v1  ;;  %v1458_v49 = vsel %vm1394_vm15, %v1362_v51, %v1426_v36  ;;  %v1076_v33 = vadd.f32 -0.28449672, %v1044_v37  ;;  %v2461_v50 = vmul.f32 %v5587_v56, %v5665_v22  ;;  %v5693_v1 = vld [vmem:[#allocation2 + $0x50] sm:$0xff] }
 0x1e5   : > { %v1141_v46 = vadd.f32 0.2548296, %v1109_v34  ;;  %v690_v57 = vmul.f32 0.5, %v5435_v17  ;;  %v1490_v61 = vadd.f32 1.0, %v1458_v49  ;;  %v2690_v26 = vadd.f32 1.0, %v2658_v30  ;;  %v5705_v49 = vld [vmem:[#allocation2 + $0x51] sm:$0xff] }
 0x1e6   : > { %v1887_v14 = vadd.f32 %v1855_v44, %v1786_v39  ;;  %v1108_v0 = vmul.f32 %v5625_v15, %v1076_v33  ;;  %v5681_v52 = vmul.f32 0.70710677, %v5671_v45  ;;  %v2493_v55 = vadd.f32 %v2461_v50, %v2392_v29 }
 0x1e7   : > { %v1173_v16 = vmul.f32 %v5605_v21, %v1141_v46  ;;  %v1522_v10 = vmul.f32 %v1490_v61, %v690_v57  ;;  %4316 = vrcp.f32 %v2690_v26  ;;  %v3074_v19 = vsub.f32 0.0, %v2626_v13  ;;  %v5708_v26 = vld [vmem:[#allocation2 + $0x52] sm:$0xff] }
 0x1e8   : > { %v1956_v42 = vmul.f32 %v5533_v6, %v5607_v31  ;;  %v1140_v24 = vadd.f32 0.2548296, %v1108_v0  ;;  %v2627_v17 = vand.u32 2147483647, %v5681_v52  ;;  %v693_v47 = vmul.f32 0.5, %v5470_v18 }
 0x1e9   : > { %v1333_v7 = vmul.f32 %v4313_v11, %v1173_v16  ;;  %1609 = vst [vmem:[#allocation2 + $0x169] sm:$0xff] %v1522_v10  ;;  %v5688_v21 = vadd.f32 %v5633_v4, %v2493_v55  ;;  %v2057_v51 = vmul.f32 %v5549_v2, %v5609_v32  ;;  %v3106_v11 = vmul.f32 %v3074_v19, %v2626_v13 }
 0x1ea   : > { %v1988_v28 = vadd.f32 %v1956_v42, %v1887_v14  ;;  %v1172_v25 = vmul.f32 %v5625_v15, %v1140_v24  ;;  %v2659_v41 = vmul.f32 0.3275911, %v2627_v17  ;;  %v3075_v40 = vsub.f32 0.0, %v2627_v17 }
 0x1eb   : > { %v1365_v62 = vsub.f32 1.0, %v1333_v7  ;;  %v5696_v39 = vmul.f32 0.70710677, %v5688_v21  ;;  %v2158_v18 = vmul.f32 %v5564_v20, %v5618_v54  ;;  %vm1397_vm1 = vcmp.ge.f32.partialorder %v5488_v58, 0.0 }
 0x1ec   : > { %v2089_v36 = vadd.f32 %v2057_v51, %v1988_v28  ;;  %v1332_v37 = vmul.f32 %v5641_v60, %v1172_v25  ;;  %v2691_v30 = vadd.f32 1.0, %v2659_v41  ;;  %v3107_v29 = vmul.f32 %v3075_v40, %v2627_v17 }
 0x1ed   : > { %v1429_v34 = vsub.f32 0.0, %v1365_v62  ;;  %v2628_v15 = vand.u32 2147483647, %v5696_v39  ;;  %v2260_v13 = vmul.f32 %v5557_v8, %v5693_v1  ;;  %vm1396_vm2 = vcmp.ge.f32.partialorder %v5501_v3, 0.0 }
 0x1ee   : > { %v2190_v44 = vadd.f32 %v2158_v18, %v2089_v36  ;;  %v1364_v33 = vsub.f32 1.0, %v1332_v37  ;;  %4318 = vrcp.f32 %v2691_v30  ;;  %v3138_v14 = vmul.f32 1.442695, %v3106_v11  ;;  %v5734_v37 = vld [vmem:[#allocation2 + $0x60] sm:$0xff] }
 0x1ef   : > { %v1461_v46 = vsel %vm1397_vm1, %v1365_v62, %v1429_v34  ;;  %v2660_v57 = vmul.f32 0.3275911, %v2628_v15  ;;  %v3076_v60 = vsub.f32 0.0, %v2628_v15  ;;  %v3140_v16 = vmul.f32 1.442695, %v3107_v29  ;;  %v5736_v30 = vld [vmem:[#allocation2 + $0x61] sm:$0xff] }
 0x1f0   : > { %v1493_v50 = vadd.f32 1.0, %v1461_v46  ;;  %v2292_v61 = vadd.f32 %v2260_v13, %v2190_v44  ;;  %v1428_v58 = vsub.f32 0.0, %v1364_v33  ;;  %v2361_v0 = vmul.f32 %v5582_v43, %v5705_v49  ;;  %v5747_v46 = vld [vmem:[#allocation2 + $0x62] sm:$0xff] }
 0x1f1   : > { %v2692_v10 = vadd.f32 1.0, %v2660_v57  ;;  %v3108_v19 = vmul.f32 %v3076_v60, %v2628_v15  ;;  %v1654_v42 = vmul.f32 %v5512_v9, %v5551_v38  ;;  %v2462_v24 = vmul.f32 %v5587_v56, %v5708_v26 }
 0x1f2   : > { %v1525_v55 = vmul.f32 %v1493_v50, %v693_v47  ;;  %v1460_v3 = vsel %vm1396_vm2, %v1364_v33, %v1428_v58  ;;  %v2393_v7 = vadd.f32 %v2361_v0, %v2292_v61  ;;  %v1755_v17 = vmul.f32 %v5517_v12, %v5566_v23 }
 0x1f3   : > { %v692_v28 = vmul.f32 0.5, %v5493_v27  ;;  %v1492_v51 = vadd.f32 1.0, %v1460_v3  ;;  %4320 = vrcp.f32 %v2692_v10  ;;  %v1856_v47 = vmul.f32 %v5525_v63, %v5568_v59  ;;  %v5765_v10 = vld [vmem:[#allocation2 + $0x68] sm:$0xff] }
 0x1f4   : > { %1612 = vst [vmem:[#allocation2 + $0x189] sm:$0xff] %v1525_v55  ;;  %v5721_v62 = vpop.eup %4316  ;;  %v3142_v25 = vmul.f32 1.442695, %v3108_v19  ;;  %v2494_v38 = vadd.f32 %v2462_v24, %v2393_v7  ;;  %v1787_v41 = vadd.f32 %v1755_v17, %v1654_v42  ;;  %v1957_v40 = vmul.f32 %v5533_v6, %v5639_v5 }
 0x1f5   : > { %v1524_v11 = vmul.f32 %v1492_v51, %v692_v28  ;;  %v2786_v36 = vmul.f32 1.0614054, %v5721_v62  ;;  %4322 = vpow2.f32 %v3138_v14  ;;  %v5727_v23 = vmul.f32 0.5, %v5647_v35 }
 0x1f6   : > { %4324 = vpow2.f32 %v3140_v16  ;;  %v5730_v27 = vadd.f32 %v5633_v4, %v2494_v38  ;;  %v1888_v59 = vadd.f32 %v1856_v47, %v1787_v41  ;;  %v2058_v34 = vmul.f32 %v5549_v2, %v5649_v53 }
 0x1f7   : > { %1611 = vst [vmem:[#allocation2 + $0x181] sm:$0xff] %v1524_v11  ;;  %v2818_v18 = vadd.f32 -1.4531521, %v2786_v36  ;;  %v1655_v29 = vmul.f32 %v5512_v9, %v5607_v31  ;;  %v1756_v35 = vmul.f32 %v5517_v12, %v5609_v32  ;;  %4326 = vpow2.f32 %v3142_v25  ;;  %v5777_v36 = vld [vmem:[#allocation2 + $0x69] sm:$0xff] }
 0x1f8   : > { %v5743_v15 = vmul.f32 0.70710677, %v5730_v27  ;;  %v1989_v44 = vadd.f32 %v1957_v40, %v1888_v59  ;;  %v2159_v13 = vmul.f32 %v5564_v20, %v5665_v22  ;;  %v1857_v57 = vmul.f32 %v5525_v63, %v5618_v54 }
 0x1f9   : > { %v2850_v33 = vmul.f32 %v5721_v62, %v2818_v18  ;;  %v1788_v50 = vadd.f32 %v1756_v35, %v1655_v29  ;;  %v1958_v31 = vmul.f32 %v5533_v6, %v5693_v1  ;;  %v2261_v61 = vmul.f32 %v5557_v8, %v5734_v37  ;;  %v5784_v35 = vld [vmem:[#allocation2 + $0x6a] sm:$0xff] }
 0x1fa   : > { %v2629_v32 = vand.u32 2147483647, %v5743_v15  ;;  %v2090_v60 = vadd.f32 %v2058_v34, %v1989_v44  ;;  %v2362_v58 = vmul.f32 %v5582_v43, %v5736_v30  ;;  %v2463_v0 = vmul.f32 %v5587_v56, %v5747_v46 }
 0x1fb   : > { %v5759_v14 = vpop.eup %4318  ;;  %v2882_v16 = vadd.f32 1.4214138, %v2850_v33  ;;  %v1889_v55 = vadd.f32 %v1857_v57, %v1788_v50  ;;  %v2059_v54 = vmul.f32 %v5549_v2, %v5705_v49  ;;  %v2160_v7 = vmul.f32 %v5564_v20, %v5708_v26 }
 0x1fc   : > { %v2787_v19 = vmul.f32 1.0614054, %v5759_v14  ;;  %v2661_v42 = vmul.f32 0.3275911, %v2629_v32  ;;  %v2191_v3 = vadd.f32 %v2159_v13, %v2090_v60  ;;  %v1656_v28 = vmul.f32 %v5512_v9, %v5639_v5 }
 0x1fd   : > { %v2914_v24 = vmul.f32 %v5721_v62, %v2882_v16  ;;  %v1990_v17 = vadd.f32 %v1958_v31, %v1889_v55  ;;  %v1757_v51 = vmul.f32 %v5517_v12, %v5649_v53  ;;  %v2262_v41 = vmul.f32 %v5557_v8, %v5765_v10 }
 0x1fe   : > { %v2819_v47 = vadd.f32 -1.4531521, %v2787_v19  ;;  %v2693_v25 = vadd.f32 1.0, %v2661_v42  ;;  %v2293_v38 = vadd.f32 %v2261_v61, %v2191_v3  ;;  %v1858_v18 = vmul.f32 %v5525_v63, %v5665_v22 }
 0x1ff   : > { %v2946_v40 = vadd.f32 -0.28449672, %v2914_v24  ;;  %v2091_v11 = vadd.f32 %v2059_v54, %v1990_v17  ;;  %v1789_v59 = vadd.f32 %v1757_v51, %v1656_v28  ;;  %v3077_v53 = vsub.f32 0.0, %v2629_v32 }
 0x200   : > { %v5781_v34 = vpop.eup %4320  ;;  %v2851_v5 = vmul.f32 %v5759_v14, %v2819_v47  ;;  %4328 = vrcp.f32 %v2693_v25  ;;  %v2394_v29 = vadd.f32 %v2362_v58, %v2293_v38  ;;  %v2363_v22 = vmul.f32 %v5582_v43, %v5777_v36  ;;  %v5804_v25 = vld [vmem:[#allocation2 + $0x78] sm:$0xff] }
 0x201   : > { %v2978_v44 = vmul.f32 %v5721_v62, %v2946_v40  ;;  %v2788_v13 = vmul.f32 1.0614054, %v5781_v34  ;;  %v2192_v33 = vadd.f32 %v2160_v7, %v2091_v11  ;;  %v1890_v50 = vadd.f32 %v1858_v18, %v1789_v59 }
 0x202   : > { %v4323_v57 = vpop.eup %4322  ;;  %v2883_v31 = vadd.f32 1.4214138, %v2851_v5  ;;  %v2495_v60 = vadd.f32 %v2463_v0, %v2394_v29  ;;  %v1959_v61 = vmul.f32 %v5533_v6, %v5734_v37  ;;  %v2464_v19 = vmul.f32 %v5587_v56, %v5784_v35 }
 0x203   : > { %v4325_v16 = vpop.eup %4324  ;;  %v3010_v55 = vadd.f32 0.2548296, %v2978_v44  ;;  %v2820_v58 = vadd.f32 -1.4531521, %v2788_v13  ;;  %v2294_v54 = vadd.f32 %v2262_v41, %v2192_v33  ;;  %v2060_v0 = vmul.f32 %v5549_v2, %v5736_v30 }
 0x204   : > { %v2915_v42 = vmul.f32 %v5759_v14, %v2883_v31  ;;  %v5796_v3 = vadd.f32 %v5633_v4, %v2495_v60  ;;  %v1991_v7 = vadd.f32 %v1959_v61, %v1890_v50  ;;  %v5800_v24 = vpop.eup %4326  ;;  %v3109_v51 = vmul.f32 %v3077_v53, %v2629_v32 }
 0x205   : > { %v3042_v17 = vmul.f32 %v5721_v62, %v3010_v55  ;;  %v2852_v28 = vmul.f32 %v5781_v34, %v2820_v58  ;;  %v2395_v47 = vadd.f32 %v2363_v22, %v2294_v54  ;;  %v2161_v11 = vmul.f32 %v5564_v20, %v5747_v46  ;;  %v5812_v62 = vld [vmem:[#allocation2 + $0x79] sm:$0xff] }
 0x206   : > { %v2947_v38 = vadd.f32 -0.28449672, %v2915_v42  ;;  %v5807_v41 = vmul.f32 0.70710677, %v5796_v3  ;;  %v2092_v40 = vadd.f32 %v2060_v0, %v1991_v7  ;;  %vm3266_vm3 = vcmp.ge.f32.partialorder %v5658_v48, 0.0  ;;  %v5824_v55 = vld [vmem:[#allocation2 + $0x7a] sm:$0xff] }
 0x207   : > { %v3202_v59 = vmul.f32 %v4323_v57, %v3042_v17  ;;  %v2884_v18 = vadd.f32 1.4214138, %v2852_v28  ;;  %v2496_v5 = vadd.f32 %v2464_v19, %v2395_v47  ;;  %v2263_v44 = vmul.f32 %v5557_v8, %v5804_v25 }
 0x208   : > { %v2979_v32 = vmul.f32 %v5759_v14, %v2947_v38  ;;  %v2630_v53 = vand.u32 2147483647, %v5807_v41  ;;  %v2193_v29 = vadd.f32 %v2161_v11, %v2092_v40  ;;  %v3144_v50 = vmul.f32 1.442695, %v3109_v51 }
 0x209   : > { %v3234_v13 = vsub.f32 1.0, %v3202_v59  ;;  %v2916_v33 = vmul.f32 %v5781_v34, %v2884_v18  ;;  %v5820_v57 = vadd.f32 %v5633_v4, %v2496_v5  ;;  %v2364_v61 = vmul.f32 %v5582_v43, %v5812_v62 }
 0x20a   : > { %v3011_v31 = vadd.f32 0.2548296, %v2979_v32  ;;  %v2662_v60 = vmul.f32 0.3275911, %v2630_v53  ;;  %v2295_v22 = vadd.f32 %v2263_v44, %v2193_v29  ;;  %v2563_v54 = vmul.f32 0.5, %v5671_v45 }
 0x20b   : > { %v3298_v58 = vsub.f32 0.0, %v3234_v13  ;;  %v2948_v19 = vadd.f32 -0.28449672, %v2916_v33  ;;  %v5828_v42 = vmul.f32 0.70710677, %v5820_v57  ;;  %v3078_v17 = vsub.f32 0.0, %v2630_v53 }
 0x20c   : > { %v3043_v7 = vmul.f32 %v5759_v14, %v3011_v31  ;;  %v2694_v0 = vadd.f32 1.0, %v2662_v60  ;;  %v2396_v28 = vadd.f32 %v2364_v61, %v2295_v22  ;;  %v2465_v45 = vmul.f32 %v5587_v56, %v5824_v55 }
 0x20d   : > { %v5831_v51 = vpop.eup %4328  ;;  %v3330_v47 = vsel %vm3266_vm3, %v3234_v13, %v3298_v58  ;;  %v2980_v38 = vmul.f32 %v5781_v34, %v2948_v19  ;;  %v2631_v40 = vand.u32 2147483647, %v5828_v42  ;;  %vm3267_vm4 = vcmp.ge.f32.partialorder %v5681_v52, 0.0 }
 0x20e   : > { %v3362_v11 = vadd.f32 1.0, %v3330_v47  ;;  %v3203_v59 = vmul.f32 %v4325_v16, %v3043_v7  ;;  %v2789_v18 = vmul.f32 1.0614054, %v5831_v51  ;;  %4330 = vrcp.f32 %v2694_v0 }
 0x20f   : > { %v3012_v14 = vadd.f32 0.2548296, %v2980_v38  ;;  %v2663_v5 = vmul.f32 0.3275911, %v2631_v40  ;;  %v2497_v32 = vadd.f32 %v2465_v45, %v2396_v28  ;;  %v3110_v13 = vmul.f32 %v3078_v17, %v2630_v53 }
 0x210   : > { %v3394_v48 = vmul.f32 %v3362_v11, %v5727_v23  ;;  %v3235_v29 = vsub.f32 1.0, %v3203_v59  ;;  %v2821_v44 = vadd.f32 -1.4531521, %v2789_v18  ;;  %v3079_v60 = vsub.f32 0.0, %v2631_v40 }
 0x211   : > { %v3044_v33 = vmul.f32 %v5781_v34, %v3012_v14  ;;  %v2695_v31 = vadd.f32 1.0, %v2663_v5  ;;  %v5844_v22 = vadd.f32 %v5633_v4, %v2497_v32  ;;  %4332 = vpow2.f32 %v3144_v50 }
 0x212   : > { %4057 = vmatprep.mubr.f32.mxu0 %v3394_v48  ;;  %v3299_v16 = vsub.f32 0.0, %v3235_v29  ;;  %v2853_v61 = vmul.f32 %v5831_v51, %v2821_v44  ;;  %v1657_v58 = vmul.f32 %v5512_v9, %v5693_v1  ;;  %v2564_v23 = vmul.f32 0.5, %v5688_v21  ;;  %v5868_v44 = vld [vmem:[#allocation2 + $0x80] sm:$0xff] }
 0x213   : > { %v3204_v19 = vmul.f32 %v5800_v24, %v3044_v33  ;;  %4334 = vrcp.f32 %v2695_v31  ;;  %v5852_v34 = vmul.f32 0.70710677, %v5844_v22  ;;  %v3146_v0 = vmul.f32 1.442695, %v3110_v13 }
 0x214   : > { %v3331_v53 = vsel %vm3267_vm4, %v3235_v29, %v3299_v16  ;;  %v2885_v7 = vadd.f32 1.4214138, %v2853_v61  ;;  %v1758_v17 = vmul.f32 %v5517_v12, %v5705_v49  ;;  %v3111_v47 = vmul.f32 %v3079_v60, %v2631_v40 }
 0x215   : > { %v3363_v50 = vadd.f32 1.0, %v3331_v53  ;;  %v3236_v28 = vsub.f32 1.0, %v3204_v19  ;;  %v2632_v1 = vand.u32 2147483647, %v5852_v34  ;;  %vm3268_vm5 = vcmp.ge.f32.partialorder %v5696_v39, 0.0  ;;  %v5878_v19 = vld [vmem:[#allocation2 + $0x81] sm:$0xff] }
 0x216   : > { %v2917_v21 = vmul.f32 %v5831_v51, %v2885_v7  ;;  %v1790_v24 = vadd.f32 %v1758_v17, %v1657_v58  ;;  %v1859_v38 = vmul.f32 %v5525_v63, %v5708_v26  ;;  %4336 = vpow2.f32 %v3146_v0  ;;  %v5883_v7 = vld [vmem:[#allocation2 + $0x82] sm:$0xff] }
 0x217   : > { %v3395_v52 = vmul.f32 %v3363_v50, %v2563_v54  ;;  %v3300_v45 = vsub.f32 0.0, %v3236_v28  ;;  %v2664_v11 = vmul.f32 0.3275911, %v2632_v1  ;;  %v3080_v59 = vsub.f32 0.0, %v2632_v1 }
 0x218   : > { %v2949_v18 = vadd.f32 -0.28449672, %v2917_v21  ;;  %v1891_v49 = vadd.f32 %v1859_v38, %v1790_v24  ;;  %v1960_v40 = vmul.f32 %v5533_v6, %v5765_v10  ;;  %v3148_v5 = vmul.f32 1.442695, %v3111_v47 }
 0x219   : > { %4058 = vmatmul.mubr.f32.vlgmr.msra.gmra.mxu0 %v3395_v52  ;;  %v3332_v14 = vsel %vm3268_vm5, %v3236_v28, %v3300_v45  ;;  %v2696_v39 = vadd.f32 1.0, %v2664_v11  ;;  %v2061_v32 = vmul.f32 %v5549_v2, %v5777_v36  ;;  %v3112_v54 = vmul.f32 %v3080_v59, %v2632_v1 }
 0x21a   : > { %v3364_v48 = vadd.f32 1.0, %v3332_v14  ;;  %v2981_v26 = vmul.f32 %v5831_v51, %v2949_v18  ;;  %v1992_v29 = vadd.f32 %v1960_v40, %v1891_v49  ;;  %v5873_v33 = vmul.f32 0.5, %v5730_v27 }
 0x21b   : > { %v5870_v13 = vpop.eup %4330  ;;  %4338 = vrcp.f32 %v2696_v39  ;;  %v2162_v31 = vmul.f32 %v5564_v20, %v5784_v35  ;;  %vm3269_vm6 = vcmp.ge.f32.partialorder %v5743_v15, 0.0  ;;  %v2264_v53 = vmul.f32 %v5557_v8, %v5868_v44  ;;  %v5937_v15 = vld [vmem:[#allocation2 + $0x92] sm:$0xff] }
 0x21c   : > { %v3396_v60 = vmul.f32 %v3364_v48, %v2564_v23  ;;  %v3013_v16 = vadd.f32 0.2548296, %v2981_v26  ;;  %v2790_v61 = vmul.f32 1.0614054, %v5870_v13  ;;  %v2093_v58 = vadd.f32 %v2061_v32, %v1992_v29 }
 0x21d   : > { %4340 = vpow2.f32 %v3148_v5  ;;  %v1658_v27 = vmul.f32 %v5512_v9, %v5734_v37  ;;  %v1759_v23 = vmul.f32 %v5517_v12, %v5736_v30  ;;  %v5890_v50 = vmul.f32 1.442695, %v3112_v54  ;;  %v5908_v5 = vld [vmem:[#allocation2 + $0x90] sm:$0xff] }
 0x21e   : > { %4060 = vmatprep.mubr.f32.mxu0 %v3396_v60  ;;  %v3045_v0 = vmul.f32 %v5831_v51, %v3013_v16  ;;  %v2822_v17 = vadd.f32 -1.4531521, %v2790_v61  ;;  %v2194_v28 = vadd.f32 %v2162_v31, %v2093_v58  ;;  %v4333_v47 = vpop.eup %4332  ;;  %v2365_v1 = vmul.f32 %v5582_v43, %v5878_v19  ;;  %v5917_v60 = vld [vmem:[#allocation2 + $0x91] sm:$0xff] }
 0x21f   : > { %v1791_v21 = vadd.f32 %v1759_v23, %v1658_v27  ;;  %v1860_v24 = vmul.f32 %v5525_v63, %v5747_v46  ;;  %v1961_v37 = vmul.f32 %v5533_v6, %v5804_v25  ;;  %v2466_v45 = vmul.f32 %v5587_v56, %v5883_v7 }
 0x220   : > { %v5898_v38 = vpop.eup %4334  ;;  %v3205_v30 = vmul.f32 %v4333_v47, %v3045_v0  ;;  %v2854_v51 = vmul.f32 %v5870_v13, %v2822_v17  ;;  %v2296_v52 = vadd.f32 %v2264_v53, %v2194_v28  ;;  %v2062_v18 = vmul.f32 %v5549_v2, %v5812_v62 }
 0x221   : > { %v2791_v11 = vmul.f32 1.0614054, %v5898_v38  ;;  %v1892_v59 = vadd.f32 %v1860_v24, %v1791_v21  ;;  %v1659_v46 = vmul.f32 %v5512_v9, %v5765_v10  ;;  %v1760_v39 = vmul.f32 %v5517_v12, %v5777_v36 }
 0x222   : > { %v3237_v49 = vsub.f32 1.0, %v3205_v30  ;;  %v2886_v40 = vadd.f32 1.4214138, %v2854_v51  ;;  %v2397_v14 = vadd.f32 %v2365_v1, %v2296_v52  ;;  %v1861_v26 = vmul.f32 %v5525_v63, %v5784_v35 }
 0x223   : > { %v2823_v32 = vadd.f32 -1.4531521, %v2791_v11  ;;  %v1993_v48 = vadd.f32 %v1961_v37, %v1892_v59  ;;  %v1962_v54 = vmul.f32 %v5533_v6, %v5868_v44  ;;  %v1792_v16 = vadd.f32 %v1760_v39, %v1659_v46  ;;  %v4337_v61 = vpop.eup %4336 }
 0x224   : > { %v3301_v29 = vsub.f32 0.0, %v3237_v49  ;;  %v2918_v31 = vmul.f32 %v5870_v13, %v2886_v40  ;;  %v2498_v10 = vadd.f32 %v2466_v45, %v2397_v14  ;;  %v2163_v36 = vmul.f32 %v5564_v20, %v5824_v55 }
 0x225   : > { %v2855_v58 = vmul.f32 %v5898_v38, %v2823_v32  ;;  %v2094_v53 = vadd.f32 %v2062_v18, %v1993_v48  ;;  %v2265_v35 = vmul.f32 %v5557_v8, %v5908_v5  ;;  %v1893_v0 = vadd.f32 %v1861_v26, %v1792_v16  ;;  %v5944_v18 = vld [vmem:[#allocation2 + $0x98] sm:$0xff] }
 0x226   : > { %v3333_v6 = vsel %vm3269_vm6, %v3237_v49, %v3301_v29  ;;  %v2950_v27 = vadd.f32 -0.28449672, %v2918_v31  ;;  %v5927_v23 = vadd.f32 %v5633_v4, %v2498_v10  ;;  %v2366_v1 = vmul.f32 %v5582_v43, %v5917_v60 }
 0x227   : > { %v3365_v17 = vadd.f32 1.0, %v3333_v6  ;;  %v2887_v28 = vadd.f32 1.4214138, %v2855_v58  ;;  %v2195_v47 = vadd.f32 %v2163_v36, %v2094_v53  ;;  %v1994_v30 = vadd.f32 %v1962_v54, %v1893_v0  ;;  %v5951_v54 = vld [vmem:[#allocation2 + $0x99] sm:$0xff] }
 0x228   : > { %v5931_v21 = vpop.eup %4338  ;;  %v2982_v24 = vmul.f32 %v5870_v13, %v2950_v27  ;;  %v5935_v37 = vmul.f32 0.70710677, %v5927_v23  ;;  %v2063_v51 = vmul.f32 %v5549_v2, %v5878_v19  ;;  %v2164_v39 = vmul.f32 %v5564_v20, %v5883_v7  ;;  %v5956_v58 = vld [vmem:[#allocation2 + $0x9a] sm:$0xff] }
 0x229   : > { %v3397_v52 = vmul.f32 %v3365_v17, %v5873_v33  ;;  %v2919_v45 = vmul.f32 %v5898_v38, %v2887_v28  ;;  %v2792_v11 = vmul.f32 1.0614054, %v5931_v21  ;;  %v2297_v59 = vadd.f32 %v2265_v35, %v2195_v47 }
 0x22a   : > { %v4341_v46 = vpop.eup %4340  ;;  %v3014_v49 = vadd.f32 0.2548296, %v2982_v24  ;;  %v2633_v40 = vand.u32 2147483647, %v5935_v37  ;;  %v2095_v14 = vadd.f32 %v2063_v51, %v1994_v30  ;;  %v2467_v33 = vmul.f32 %v5587_v56, %v5937_v15 }
 0x22b   : > { %4061 = vmatmul.mubr.f32.gmra.mxu0 %v3397_v52  ;;  %v2951_v32 = vadd.f32 -0.28449672, %v2919_v45  ;;  %v2824_v48 = vadd.f32 -1.4531521, %v2792_v11  ;;  %v2398_v26 = vadd.f32 %v2366_v1, %v2297_v59  ;;  %v2266_v16 = vmul.f32 %v5557_v8, %v5944_v18 }
 0x22c   : > { %v3046_v29 = vmul.f32 %v5870_v13, %v3014_v49  ;;  %v2665_v31 = vmul.f32 0.3275911, %v2633_v40  ;;  %v2196_v10 = vadd.f32 %v2164_v39, %v2095_v14  ;;  %4342 = vpow2.f32 %v5890_v50 }
 0x22d   : > { %v2983_v53 = vmul.f32 %v5898_v38, %v2951_v32  ;;  %v2856_v36 = vmul.f32 %v5931_v21, %v2824_v48  ;;  %v2499_v35 = vadd.f32 %v2467_v33, %v2398_v26  ;;  %v2367_v13 = vmul.f32 %v5582_v43, %v5951_v54 }
 0x22e   : > { %v3206_v6 = vmul.f32 %v4337_v61, %v3046_v29  ;;  %v2697_v27 = vadd.f32 1.0, %v2665_v31  ;;  %v2298_v0 = vadd.f32 %v2266_v16, %v2196_v10  ;;  %v2468_v8 = vmul.f32 %v5587_v56, %v5956_v58 }
 0x22f   : > { %v3015_v17 = vadd.f32 0.2548296, %v2983_v53  ;;  %v2888_v28 = vadd.f32 1.4214138, %v2856_v36  ;;  %v5964_v47 = vadd.f32 %v5633_v4, %v2499_v35  ;;  %v1660_v50 = vmul.f32 %v5512_v9, %v5804_v25 }
 0x230   : > { %v3238_v1 = vsub.f32 1.0, %v3206_v6  ;;  %4344 = vrcp.f32 %v2697_v27  ;;  %v2399_v24 = vadd.f32 %v2367_v13, %v2298_v0  ;;  %v2566_v61 = vmul.f32 0.5, %v5796_v3 }
 0x231   : > { %v3047_v30 = vmul.f32 %v5898_v38, %v3015_v17  ;;  %v2920_v51 = vmul.f32 %v5931_v21, %v2888_v28  ;;  %v5974_v52 = vmul.f32 0.70710677, %v5964_v47  ;;  %vm3270_vm7 = vcmp.ge.f32.partialorder %v5807_v41, 0.0 }
 0x232   : > { %v3302_v45 = vsub.f32 0.0, %v3238_v1  ;;  %v2500_v11 = vadd.f32 %v2468_v8, %v2399_v24  ;;  %v1761_v56 = vmul.f32 %v5517_v12, %v5812_v62  ;;  %v3081_v14 = vsub.f32 0.0, %v2633_v40 }
 0x233   : > { %v3207_v59 = vmul.f32 %v4341_v46, %v3047_v30  ;;  %v2952_v49 = vadd.f32 -0.28449672, %v2920_v51  ;;  %v2634_v9 = vand.u32 2147483647, %v5974_v52  ;;  %v1862_v39 = vmul.f32 %v5525_v63, %v5824_v55  ;;  %v5995_v55 = vld [vmem:[%s7228_s3 + $0x3] ss:$0 sm:$0xff] }
 0x234   : > { %v3334_v3 = vsel %vm3270_vm7, %v3238_v1, %v3302_v45  ;;  %v5981_v25 = vadd.f32 %v5633_v4, %v2500_v11  ;;  %v1793_v38 = vadd.f32 %v1761_v56, %v1660_v50  ;;  %v2567_v12 = vmul.f32 0.5, %v5820_v57  ;;  %v6004_v1 = vld [vmem:[#allocation2 + $0xa8] sm:$0xff] }
 0x235   : > { %v3366_v32 = vadd.f32 1.0, %v3334_v3  ;;  %v3239_v41 = vsub.f32 1.0, %v3207_v59  ;;  %v2984_v48 = vmul.f32 %v5931_v21, %v2952_v49  ;;  %v2666_v26 = vmul.f32 0.3275911, %v2634_v9  ;;  %v6010_v56 = vld [vmem:[#allocation2 + $0xa9] sm:$0xff] }
 0x236   : > { %v3082_v62 = vsub.f32 0.0, %v2634_v9  ;;  %v5988_v46 = vmul.f32 0.70710677, %v5981_v25  ;;  %v1894_v33 = vadd.f32 %v1862_v39, %v1793_v38  ;;  %vm3271_vm8 = vcmp.ge.f32.partialorder %v5828_v42, 0.0  ;;  %v6027_v39 = vld [vmem:[#allocation2 + $0xaa] sm:$0xff] }
 0x237   : > { %v3398_v29 = vmul.f32 %v3366_v32, %v2566_v61  ;;  %v3303_v31 = vsub.f32 0.0, %v3239_v41  ;;  %v3016_v10 = vadd.f32 0.2548296, %v2984_v48  ;;  %v2698_v16 = vadd.f32 1.0, %v2666_v26  ;;  %v6032_v32 = vld [vmem:[%s7228_s3 + $0x1] ss:$0 sm:$0xff] }
 0x238   : > { %v3113_v53 = vmul.f32 %v3081_v14, %v2633_v40  ;;  %v2635_v63 = vand.u32 2147483647, %v5988_v46  ;;  %v1963_v57 = vmul.f32 %v5995_v55, %v5908_v5  ;;  %v3114_v6 = vmul.f32 %v3082_v62, %v2634_v9  ;;  %v6023_v14 = vld [vmem:[%s7228_s3] ss:$0 sm:$0xff] }
 0x239   : > { %4063 = vmatprep.mubr.f32.mxu0 %v3398_v29  ;;  %v3335_v36 = vsel %vm3271_vm8, %v3239_v41, %v3303_v31  ;;  %v3048_v35 = vmul.f32 %v5931_v21, %v3016_v10  ;;  %4346 = vrcp.f32 %v2698_v16  ;;  %v4343_v27 = vpop.eup %4342  ;;  %v2568_v42 = vmul.f32 0.5, %v5844_v22  ;;  %v6057_v16 = vld [vmem:[#allocation2 + $0xb0] sm:$0xff] }
 0x23a   : > { %v3367_v0 = vadd.f32 1.0, %v3335_v36  ;;  %v2667_v40 = vmul.f32 0.3275911, %v2635_v63  ;;  %v3083_v13 = vsub.f32 0.0, %v2635_v63  ;;  %vm3272_vm9 = vcmp.ge.f32.partialorder %v5852_v34, 0.0 }
 0x23b   : > { %v3208_v17 = vmul.f32 %v4343_v27, %v3048_v35  ;;  %v1995_v28 = vadd.f32 %v1963_v57, %v1894_v33  ;;  %v2064_v8 = vmul.f32 %v5549_v2, %v5917_v60  ;;  %v3152_v50 = vmul.f32 1.442695, %v3113_v53  ;;  %v6016_v2 = vld [vmem:[%s7228_s3 + $0x6] ss:$0 sm:$0xff]  ;;  %v6064_v35 = vld [vmem:[%s7228_s3 + $0x4] ss:$0 sm:$0xff] }
 0x23c   : > { %v3399_v24 = vmul.f32 %v3367_v0, %v2567_v12  ;;  %v2699_v21 = vadd.f32 1.0, %v2667_v40  ;;  %v3115_v61 = vmul.f32 %v3083_v13, %v2635_v63  ;;  %v3154_v45 = vmul.f32 1.442695, %v3114_v6  ;;  %v6068_v27 = vld [vmem:[#allocation2 + $0xb1] sm:$0xff] }
 0x23d   : > { %v6006_v30 = vpop.eup %4344  ;;  %v3240_v51 = vsub.f32 1.0, %v3208_v17  ;;  %v2096_v22 = vadd.f32 %v2064_v8, %v1995_v28  ;;  %v2165_v11 = vmul.f32 %v5564_v20, %v5937_v15  ;;  %v2267_v49 = vmul.f32 %v6016_v2, %v6004_v1  ;;  %v6081_v28 = vld [vmem:[#allocation2 + $0xb2] sm:$0xff] }
 0x23e   : > { %4064 = vmatmul.mubr.f32.gmra.mxu0 %v3399_v24  ;;  %v2793_v59 = vmul.f32 1.0614054, %v6006_v30  ;;  %4348 = vrcp.f32 %v2699_v21  ;;  %v1661_v20 = vmul.f32 %v6023_v14, %v5868_v44  ;;  %v3156_v3 = vmul.f32 1.442695, %v3115_v61  ;;  %v6041_v44 = vld [vmem:[%s7228_s3 + $0x2] ss:$0 sm:$0xff] }
 0x23f   : > { %v3304_v9 = vsub.f32 0.0, %v3240_v51  ;;  %v2197_v38 = vadd.f32 %v2165_v11, %v2096_v22  ;;  %v1762_v41 = vmul.f32 %v6032_v32, %v5878_v19  ;;  %4350 = vpow2.f32 %v3152_v50  ;;  %v6097_v22 = vld [vmem:[%s7228_s3 + $0x7] ss:$0 sm:$0xff] }
 0x240   : > { %v2825_v48 = vadd.f32 -1.4531521, %v2793_v59  ;;  %v2368_v26 = vmul.f32 %v5582_v43, %v6010_v56  ;;  %v1863_v12 = vmul.f32 %v6041_v44, %v5883_v7  ;;  %v1964_v19 = vmul.f32 %v5995_v55, %v5944_v18  ;;  %v6053_v43 = vld [vmem:[%s7228_s3 + $0x8] ss:$0 sm:$0xff] }
 0x241   : > { %v3336_v62 = vsel %vm3272_vm9, %v3240_v51, %v3304_v9  ;;  %v2299_v33 = vadd.f32 %v2267_v49, %v2197_v38  ;;  %v1794_v29 = vadd.f32 %v1762_v41, %v1661_v20  ;;  %4352 = vpow2.f32 %v3154_v45 }
 0x242   : > { %v3368_v31 = vadd.f32 1.0, %v3336_v62  ;;  %v2857_v10 = vmul.f32 %v6006_v30, %v2825_v48  ;;  %v2469_v7 = vmul.f32 %v6053_v43, %v6027_v39  ;;  %4354 = vpow2.f32 %v3156_v3 }
 0x243   : > { %v2400_v34 = vadd.f32 %v2368_v26, %v2299_v33  ;;  %v1895_v53 = vadd.f32 %v1863_v12, %v1794_v29  ;;  %v1662_v63 = vmul.f32 %v6023_v14, %v5908_v5  ;;  %v2065_v6 = vmul.f32 %v6064_v35, %v5951_v54  ;;  %v6075_v5 = vld [vmem:[%s7228_s3 + $0x5] ss:$0 sm:$0xff] }
 0x244   : > { %v3400_v57 = vmul.f32 %v3368_v31, %v2568_v42  ;;  %v2889_v36 = vadd.f32 1.4214138, %v2857_v10  ;;  %v1763_v0 = vmul.f32 %v6032_v32, %v5917_v60  ;;  %v2166_v42 = vmul.f32 %v6075_v5, %v5956_v58  ;;  %v6113_v12 = vld [vmem:[#allocation2 + $0xc0] sm:$0xff] }
 0x245   : > { %v2501_v40 = vadd.f32 %v2469_v7, %v2400_v34  ;;  %v1996_v13 = vadd.f32 %v1964_v19, %v1895_v53  ;;  %v2268_v17 = vmul.f32 %v6016_v2, %v6057_v16  ;;  %v1864_v50 = vmul.f32 %v6041_v44, %v5937_v15  ;;  %v6126_v53 = vld [vmem:[#allocation2 + $0xc1] sm:$0xff] }
 0x246   : > { %v6083_v8 = vpop.eup %4346  ;;  %4066 = vmatprep.mubr.f32.mxu1 %v3400_v57  ;;  %v2921_v60 = vmul.f32 %v6006_v30, %v2889_v36  ;;  %v1795_v24 = vadd.f32 %v1763_v0, %v1662_v63  ;;  %v1965_v21 = vmul.f32 %v5995_v55, %v6004_v1  ;;  %v2369_v11 = vmul.f32 %v6097_v22, %v6068_v27 }
 0x247   : > { %v2794_v61 = vmul.f32 1.0614054, %v6083_v8  ;;  %v6092_v51 = vadd.f32 %v5633_v4, %v2501_v40  ;;  %v2097_v45 = vadd.f32 %v2065_v6, %v1996_v13  ;;  %v2470_v15 = vmul.f32 %v6053_v43, %v6081_v28 }
 0x248   : > { %v2953_v59 = vadd.f32 -0.28449672, %v2921_v60  ;;  %v1896_v49 = vadd.f32 %v1864_v50, %v1795_v24  ;;  %v1663_v20 = vmul.f32 %v6023_v14, %v5944_v18  ;;  %v2066_v38 = vmul.f32 %v6064_v35, %v6010_v56 }
 0x249   : > { %v2826_v9 = vadd.f32 -1.4531521, %v2794_v61  ;;  %v6106_v4 = vmul.f32 0.70710677, %v6092_v51  ;;  %v2198_v3 = vadd.f32 %v2166_v42, %v2097_v45  ;;  %v2167_v26 = vmul.f32 %v6075_v5, %v6027_v39 }
 0x24a   : > { %v2985_v41 = vmul.f32 %v6006_v30, %v2953_v59  ;;  %v1997_v48 = vadd.f32 %v1965_v21, %v1896_v49  ;;  %v1764_v62 = vmul.f32 %v6032_v32, %v5951_v54  ;;  %v1865_v31 = vmul.f32 %v6041_v44, %v5956_v58  ;;  %v6132_v58 = vld [vmem:[#allocation2 + $0xc2] sm:$0xff] }
 0x24b   : > { %v6117_v18 = vpop.eup %4348  ;;  %v2858_v33 = vmul.f32 %v6083_v8, %v2826_v9  ;;  %v6121_v29 = vand.u32 2147483647, %v6106_v4  ;;  %v2300_v19 = vadd.f32 %v2268_v17, %v2198_v3  ;;  %v2269_v0 = vmul.f32 %v6016_v2, %v6113_v12  ;;  %v6143_v9 = vld [vmem:[%s7229_s4] ss:$0 sm:$0xff] }
 0x24c   : > { %v3017_v10 = vadd.f32 0.2548296, %v2985_v41  ;;  %v2795_v7 = vmul.f32 1.0614054, %v6117_v18  ;;  %v2098_v34 = vadd.f32 %v2066_v38, %v1997_v48  ;;  %v1796_v63 = vadd.f32 %v1764_v62, %v1663_v20  ;;  %v4351_v57 = vpop.eup %4350 }
 0x24d   : > { %v2890_v54 = vadd.f32 1.4214138, %v2858_v33  ;;  %v2668_v36 = vmul.f32 0.3275911, %v6121_v29  ;;  %v2401_v6 = vadd.f32 %v2369_v11, %v2300_v19  ;;  %v2370_v61 = vmul.f32 %v6097_v22, %v6126_v53 }
 0x24e   : > { %v3049_v40 = vmul.f32 %v6006_v30, %v3017_v10  ;;  %v2827_v13 = vadd.f32 -1.4531521, %v2795_v7  ;;  %v2199_v42 = vadd.f32 %v2167_v26, %v2098_v34  ;;  %v1897_v17 = vadd.f32 %v1865_v31, %v1796_v63  ;;  %v4353_v60 = vpop.eup %4352 }
 0x24f   : > { %v2922_v24 = vmul.f32 %v6083_v8, %v2890_v54  ;;  %v2700_v50 = vadd.f32 1.0, %v2668_v36  ;;  %v2502_v21 = vadd.f32 %v2470_v15, %v2401_v6  ;;  %v4355_v45 = vpop.eup %4354  ;;  %v1966_v30 = vmul.f32 %v5995_v55, %v6057_v16 }
 0x250   : > { %v3209_v11 = vmul.f32 %v4351_v57, %v3049_v40  ;;  %v2859_v59 = vmul.f32 %v6117_v18, %v2827_v13  ;;  %v2301_v49 = vadd.f32 %v2269_v0, %v2199_v42  ;;  %v2471_v3 = vmul.f32 %v6053_v43, %v6132_v58 }
 0x251   : > { %v2954_v20 = vadd.f32 -0.28449672, %v2922_v24  ;;  %4356 = vrcp.f32 %v2700_v50  ;;  %v6146_v15 = vadd.f32 %v6143_v9, %v2502_v21  ;;  %v1998_v26 = vadd.f32 %v1966_v30, %v1897_v17  ;;  %v6167_v24 = vld [vmem:[#allocation2 + $0xc8] sm:$0xff] }
 0x252   : > { %v3241_v38 = vsub.f32 1.0, %v3209_v11  ;;  %v2891_v41 = vadd.f32 1.4214138, %v2859_v59  ;;  %v2402_v48 = vadd.f32 %v2370_v61, %v2301_v49  ;;  %v2569_v62 = vmul.f32 0.5, %v5927_v23  ;;  %v6173_v11 = vld [vmem:[#allocation2 + $0xc9] sm:$0xff] }
 0x253   : > { %vm3273_vm10 = vcmp.ge.f32.partialorder %v5935_v37, 0.0  ;;  %v2986_v33 = vmul.f32 %v6083_v8, %v2954_v20  ;;  %v6154_v19 = vmul.f32 0.70710677, %v6146_v15  ;;  %v2067_v34 = vmul.f32 %v6064_v35, %v6068_v27 }
 0x254   : > { %v3305_v31 = vsub.f32 0.0, %v3241_v38  ;;  %v2923_v10 = vmul.f32 %v6117_v18, %v2891_v41  ;;  %v2503_v7 = vadd.f32 %v2471_v3, %v2402_v48  ;;  %v3084_v57 = vsub.f32 0.0, %v6121_v29 }
 0x255   : > { %v3018_v63 = vadd.f32 0.2548296, %v2986_v33  ;;  %v2637_v54 = vand.u32 2147483647, %v6154_v19  ;;  %v2168_v23 = vmul.f32 %v6075_v5, %v6081_v28  ;;  %v2099_v0 = vadd.f32 %v2067_v34, %v1998_v26 }
 0x256   : > { %v3337_v37 = vsel %vm3273_vm10, %v3241_v38, %v3305_v31  ;;  %v2955_v36 = vadd.f32 -0.28449672, %v2923_v10  ;;  %v6164_v6 = vadd.f32 %v6143_v9, %v2503_v7  ;;  %v3116_v30 = vmul.f32 %v3084_v57, %v6121_v29  ;;  %v6183_v10 = vld [vmem:[#allocation2 + $0xca] sm:$0xff] }
 0x257   : > { %v3369_v40 = vadd.f32 1.0, %v3337_v37  ;;  %v3050_v13 = vmul.f32 %v6083_v8, %v3018_v63  ;;  %v2669_v42 = vmul.f32 0.3275911, %v2637_v54  ;;  %v3085_v17 = vsub.f32 0.0, %v2637_v54 }
 0x258   : > { %v2987_v50 = vmul.f32 %v6117_v18, %v2955_v36  ;;  %v6171_v21 = vmul.f32 0.70710677, %v6164_v6  ;;  %v2200_v61 = vadd.f32 %v2168_v23, %v2099_v0  ;;  %v2270_v41 = vmul.f32 %v6016_v2, %v6167_v24 }
 0x259   : > { %v3401_v59 = vmul.f32 %v3369_v40, %v2569_v62  ;;  %v3210_v49 = vmul.f32 %v4353_v60, %v3050_v13  ;;  %v2701_v20 = vadd.f32 1.0, %v2669_v42  ;;  %v3117_v38 = vmul.f32 %v3085_v17, %v2637_v54 }
 0x25a   : > { %v3019_v3 = vadd.f32 0.2548296, %v2987_v50  ;;  %v2638_v8 = vand.u32 2147483647, %v6171_v21  ;;  %v2570_v48 = vmul.f32 0.5, %v5964_v47  ;;  %v2371_v33 = vmul.f32 %v6097_v22, %v6173_v11 }
 0x25b   : > { %4067 = vmatmul.mubr.f32.vlgmr.msra.gmra.mxu1 %v3401_v59  ;;  %v3242_v26 = vsub.f32 1.0, %v3210_v49  ;;  %4358 = vrcp.f32 %v2701_v20  ;;  %v2302_v31 = vadd.f32 %v2270_v41, %v2200_v61  ;;  %vm3274_vm11 = vcmp.ge.f32.partialorder %v5974_v52, 0.0 }
 0x25c   : > { %v3051_v60 = vmul.f32 %v6117_v18, %v3019_v3  ;;  %v2670_v62 = vmul.f32 0.3275911, %v2638_v8  ;;  %v3086_v29 = vsub.f32 0.0, %v2638_v8  ;;  %v3158_v34 = vmul.f32 1.442695, %v3116_v30 }
 0x25d   : > { %v3306_v7 = vsub.f32 0.0, %v3242_v26  ;;  %v1664_v63 = vmul.f32 %v6023_v14, %v6004_v1  ;;  %v3160_v54 = vmul.f32 1.442695, %v3117_v38  ;;  %v2403_v37 = vadd.f32 %v2371_v33, %v2302_v31 }
 0x25e   : > { %v6188_v47 = vpop.eup %4356  ;;  %v3211_v57 = vmul.f32 %v4355_v45, %v3051_v60  ;;  %v2702_v23 = vadd.f32 1.0, %v2670_v62  ;;  %v2472_v0 = vmul.f32 %v6053_v43, %v6183_v10  ;;  %v1765_v52 = vmul.f32 %v6032_v32, %v6010_v56 }
 0x25f   : > { %v3338_v36 = vsel %vm3274_vm11, %v3242_v26, %v3306_v7  ;;  %v2796_v18 = vmul.f32 1.0614054, %v6188_v47  ;;  %v3118_v42 = vmul.f32 %v3086_v29, %v2638_v8  ;;  %v1866_v45 = vmul.f32 %v6041_v44, %v6027_v39  ;;  %v6223_v7 = vld [vmem:[#allocation2 + $0xd8] sm:$0xff] }
 0x260   : > { %v3370_v40 = vadd.f32 1.0, %v3338_v36  ;;  %v3243_v13 = vsub.f32 1.0, %v3211_v57  ;;  %4360 = vrcp.f32 %v2702_v23  ;;  %v2504_v17 = vadd.f32 %v2472_v0, %v2403_v37 }
 0x261   : > { %v2828_v1 = vadd.f32 -1.4531521, %v2796_v18  ;;  %v1797_v50 = vadd.f32 %v1765_v52, %v1664_v63  ;;  %vm3275_vm12 = vcmp.ge.f32.partialorder %v5988_v46, 0.0  ;;  %v1967_v49 = vmul.f32 %v5995_v55, %v6113_v12 }
 0x262   : > { %v3402_v61 = vmul.f32 %v3370_v40, %v2570_v48  ;;  %v3307_v59 = vsub.f32 0.0, %v3243_v13  ;;  %4362 = vpow2.f32 %v3158_v34  ;;  %v6202_v56 = vadd.f32 %v6143_v9, %v2504_v17  ;;  %v6225_v34 = vld [vmem:[#allocation2 + $0xd9] sm:$0xff] }
 0x263   : > { %v2860_v30 = vmul.f32 %v6188_v47, %v2828_v1  ;;  %v1898_v20 = vadd.f32 %v1866_v45, %v1797_v50  ;;  %v2571_v3 = vmul.f32 0.5, %v5981_v25  ;;  %v6206_v39 = vmul.f32 0.5, %v6092_v51 }
 0x264   : > { %4069 = vmatprep.mubr.f32.mxu1 %v3402_v61  ;;  %v3339_v38 = vsel %vm3275_vm12, %v3243_v13, %v3307_v59  ;;  %v3162_v8 = vmul.f32 1.442695, %v3118_v42  ;;  %4364 = vpow2.f32 %v3160_v54  ;;  %v6209_v48 = vmul.f32 0.70710677, %v6202_v56 }
 0x265   : > { %v3371_v46 = vadd.f32 1.0, %v3339_v38  ;;  %v2892_v41 = vadd.f32 1.4214138, %v2860_v30  ;;  %v1999_v26 = vadd.f32 %v1967_v49, %v1898_v20  ;;  %v2068_v33 = vmul.f32 %v6064_v35, %v6126_v53  ;;  %v6248_v49 = vld [vmem:[#allocation2 + $0xe0] sm:$0xff] }
 0x266   : > { %v1665_v60 = vmul.f32 %v6023_v14, %v6057_v16  ;;  %v1766_v25 = vmul.f32 %v6032_v32, %v6068_v27  ;;  %v6219_v29 = vand.u32 2147483647, %v6209_v48  ;;  %v2169_v31 = vmul.f32 %v6075_v5, %v6132_v58  ;;  %v6229_v16 = vld [vmem:[#allocation2 + $0xda] sm:$0xff] }
 0x267   : > { %v3403_v62 = vmul.f32 %v3371_v46, %v2571_v3  ;;  %v2924_v51 = vmul.f32 %v6188_v47, %v2892_v41  ;;  %v2100_v57 = vadd.f32 %v2068_v33, %v1999_v26  ;;  %v1867_v27 = vmul.f32 %v6041_v44, %v6081_v28 }
 0x268   : > { %v6227_v63 = vpop.eup %4358  ;;  %v1798_v54 = vadd.f32 %v1766_v25, %v1665_v60  ;;  %v1968_v23 = vmul.f32 %v5995_v55, %v6167_v24  ;;  %4366 = vpow2.f32 %v3162_v8  ;;  %v2671_v18 = vmul.f32 0.3275911, %v6219_v29 }
 0x269   : > { %4070 = vmatmul.mubr.f32.gmra.mxu1 %v3403_v62  ;;  %v2956_v37 = vadd.f32 -0.28449672, %v2924_v51  ;;  %v2797_v36 = vmul.f32 1.0614054, %v6227_v63  ;;  %v2201_v0 = vadd.f32 %v2169_v31, %v2100_v57  ;;  %v2271_v52 = vmul.f32 %v6016_v2, %v6223_v7  ;;  %v6261_v62 = vld [vmem:[#allocation2 + $0xe1] sm:$0xff] }
 0x26a   : > { %v2372_v40 = vmul.f32 %v6097_v22, %v6225_v34  ;;  %v1899_v13 = vadd.f32 %v1867_v27, %v1798_v54  ;;  %v2703_v1 = vadd.f32 1.0, %v2671_v18  ;;  %v2473_v17 = vmul.f32 %v6053_v43, %v6229_v16 }
 0x26b   : > { %v2988_v28 = vmul.f32 %v6188_v47, %v2956_v37  ;;  %v2829_v42 = vadd.f32 -1.4531521, %v2797_v36  ;;  %v2303_v50 = vadd.f32 %v2271_v52, %v2201_v0  ;;  %v2069_v61 = vmul.f32 %v6064_v35, %v6173_v11 }
 0x26c   : > { %v2000_v45 = vadd.f32 %v1968_v23, %v1899_v13  ;;  %v2170_v59 = vmul.f32 %v6075_v5, %v6183_v10  ;;  %4368 = vrcp.f32 %v2703_v1  ;;  %v1666_v38 = vmul.f32 %v6023_v14, %v6113_v12 }
 0x26d   : > { %v6250_v30 = vpop.eup %4360  ;;  %v3020_v20 = vadd.f32 0.2548296, %v2988_v28  ;;  %v2861_v3 = vmul.f32 %v6227_v63, %v2829_v42  ;;  %vm3276_vm13 = vcmp.ge.f32.partialorder %v6106_v4, 0.0  ;;  %v3087_v46 = vsub.f32 0.0, %v6219_v29 }
 0x26e   : > { %v2798_v8 = vmul.f32 1.0614054, %v6250_v30  ;;  %v2404_v41 = vadd.f32 %v2372_v40, %v2303_v50  ;;  %v2101_v26 = vadd.f32 %v2069_v61, %v2000_v45  ;;  %v2272_v25 = vmul.f32 %v6016_v2, %v6248_v49 }
 0x26f   : > { %v3052_v33 = vmul.f32 %v6188_v47, %v3020_v20  ;;  %v2893_v60 = vadd.f32 1.4214138, %v2861_v3  ;;  %v1767_v51 = vmul.f32 %v6032_v32, %v6126_v53  ;;  %v4363_v12 = vpop.eup %4362  ;;  %v1868_v27 = vmul.f32 %v6041_v44, %v6132_v58  ;;  %v6268_v47 = vld [vmem:[#allocation2 + $0xe2] sm:$0xff] }
 0x270   : > { %v2830_v31 = vadd.f32 -1.4531521, %v2798_v8  ;;  %v2505_v57 = vadd.f32 %v2473_v17, %v2404_v41  ;;  %v2202_v54 = vadd.f32 %v2170_v59, %v2101_v26  ;;  %v1969_v18 = vmul.f32 %v5995_v55, %v6223_v7 }
 0x271   : > { %v3212_v23 = vmul.f32 %v4363_v12, %v3052_v33  ;;  %v2925_v37 = vmul.f32 %v6227_v63, %v2893_v60  ;;  %v1799_v36 = vadd.f32 %v1767_v51, %v1666_v38  ;;  %v4365_v0 = vpop.eup %4364  ;;  %v2373_v13 = vmul.f32 %v6097_v22, %v6261_v62 }
 0x272   : > { %v2862_v52 = vmul.f32 %v6250_v30, %v2830_v31  ;;  %v6274_v53 = vadd.f32 %v6143_v9, %v2505_v57  ;;  %v2304_v40 = vadd.f32 %v2272_v25, %v2202_v54  ;;  %v6279_v28 = vmul.f32 0.5, %v6146_v15  ;;  %v6296_v31 = vld [vmem:[#allocation2 + $0xf0] sm:$0xff] }
 0x273   : > { %v3244_v58 = vsub.f32 1.0, %v3212_v23  ;;  %v2957_v42 = vadd.f32 -0.28449672, %v2925_v37  ;;  %v1900_v1 = vadd.f32 %v1868_v27, %v1799_v36  ;;  %v2474_v61 = vmul.f32 %v6053_v43, %v6268_v47  ;;  %v6303_v37 = vld [vmem:[#allocation2 + $0xf1] sm:$0xff] }
 0x274   : > { %v2894_v17 = vadd.f32 1.4214138, %v2862_v52  ;;  %v6282_v50 = vmul.f32 0.70710677, %v6274_v53  ;;  %v2405_v45 = vadd.f32 %v2373_v13, %v2304_v40  ;;  %v2070_v38 = vmul.f32 %v6064_v35, %v6225_v34 }
 0x275   : > { %v3308_v59 = vsub.f32 0.0, %v3244_v58  ;;  %v2989_v20 = vmul.f32 %v6227_v63, %v2957_v42  ;;  %v2001_v3 = vadd.f32 %v1969_v18, %v1900_v1  ;;  %v4367_v8 = vpop.eup %4366  ;;  %v3119_v41 = vmul.f32 %v3087_v46, %v6219_v29 }
 0x276   : > { %v2926_v15 = vmul.f32 %v6250_v30, %v2894_v17  ;;  %v2640_v26 = vand.u32 2147483647, %v6282_v50  ;;  %v2506_v33 = vadd.f32 %v2474_v61, %v2405_v45  ;;  %v2171_v12 = vmul.f32 %v6075_v5, %v6229_v16 }
 0x277   : > { %v3340_v60 = vsel %vm3276_vm13, %v3244_v58, %v3308_v59  ;;  %v3021_v25 = vadd.f32 0.2548296, %v2989_v20  ;;  %v2102_v51 = vadd.f32 %v2070_v38, %v2001_v3  ;;  %vm3277_vm14 = vcmp.ge.f32.partialorder %v6154_v19, 0.0  ;;  %v6311_v58 = vld [vmem:[#allocation2 + $0xf2] sm:$0xff] }
 0x278   : > { %v3372_v57 = vadd.f32 1.0, %v3340_v60  ;;  %v2958_v54 = vadd.f32 -0.28449672, %v2926_v15  ;;  %v2672_v27 = vmul.f32 0.3275911, %v2640_v26  ;;  %v3088_v46 = vsub.f32 0.0, %v2640_v26 }
 0x279   : > { %v3053_v29 = vmul.f32 %v6227_v63, %v3021_v25  ;;  %v6301_v23 = vadd.f32 %v6143_v9, %v2506_v33  ;;  %v2203_v4 = vadd.f32 %v2171_v12, %v2102_v51  ;;  %v6305_v36 = vpop.eup %4368  ;;  %v2273_v13 = vmul.f32 %v6016_v2, %v6296_v31 }
 0x27a   : > { %v3404_v18 = vmul.f32 %v3372_v57, %v6206_v39  ;;  %v2990_v52 = vmul.f32 %v6250_v30, %v2958_v54  ;;  %v2704_v40 = vadd.f32 1.0, %v2672_v27  ;;  %v2799_v42 = vmul.f32 1.0614054, %v6305_v36 }
 0x27b   : > { %v3213_v63 = vmul.f32 %v4365_v0, %v3053_v29  ;;  %v3164_v1 = vmul.f32 1.442695, %v3119_v41  ;;  %v6315_v17 = vmul.f32 0.70710677, %v6301_v23  ;;  %v2305_v61 = vadd.f32 %v2273_v13, %v2203_v4 }
 0x27c   : > { %4072 = vmatprep.mubr.f32.mxu1 %v3404_v18  ;;  %v3022_v45 = vadd.f32 0.2548296, %v2990_v52  ;;  %4370 = vrcp.f32 %v2704_v40  ;;  %v2374_v39 = vmul.f32 %v6097_v22, %v6303_v37  ;;  %v2831_v20 = vadd.f32 -1.4531521, %v2799_v42 }
 0x27d   : > { %v3245_v59 = vsub.f32 1.0, %v3213_v63  ;;  %v3120_v3 = vmul.f32 %v3088_v46, %v2640_v26  ;;  %v2641_v38 = vand.u32 2147483647, %v6315_v17  ;;  %v2475_v41 = vmul.f32 %v6053_v43, %v6311_v58 }
 0x27e   : > { %v3054_v0 = vmul.f32 %v6250_v30, %v3022_v45  ;;  %v2406_v15 = vadd.f32 %v2374_v39, %v2305_v61  ;;  %v1667_v33 = vmul.f32 %v6023_v14, %v6167_v24  ;;  %v2863_v25 = vmul.f32 %v6305_v36, %v2831_v20 }
 0x27f   : > { %v3309_v60 = vsub.f32 0.0, %v3245_v59  ;;  %4372 = vpow2.f32 %v3164_v1  ;;  %v2673_v51 = vmul.f32 0.3275911, %v2641_v38  ;;  %v3089_v57 = vsub.f32 0.0, %v2641_v38 }
 0x280   : > { %v3214_v12 = vmul.f32 %v4367_v8, %v3054_v0  ;;  %v2507_v54 = vadd.f32 %v2475_v41, %v2406_v15  ;;  %v1768_v26 = vmul.f32 %v6032_v32, %v6173_v11  ;;  %v2895_v27 = vadd.f32 1.4214138, %v2863_v25 }
 0x281   : > { %v3341_v30 = vsel %vm3277_vm14, %v3245_v59, %v3309_v60  ;;  %v3166_v29 = vmul.f32 1.442695, %v3120_v3  ;;  %v2705_v46 = vadd.f32 1.0, %v2673_v51  ;;  %v1869_v8 = vmul.f32 %v6041_v44, %v6183_v10 }
 0x282   : > { %v3373_v4 = vadd.f32 1.0, %v3341_v30  ;;  %v3246_v18 = vsub.f32 1.0, %v3214_v12  ;;  %v6331_v24 = vadd.f32 %v6143_v9, %v2507_v54  ;;  %v1800_v52 = vadd.f32 %v1768_v26, %v1667_v33  ;;  %v6361_v54 = vld [vmem:[#allocation2 + $0xf9] sm:$0xff] }
 0x283   : > { %v2927_v40 = vmul.f32 %v6305_v36, %v2895_v27  ;;  %4374 = vrcp.f32 %v2705_v46  ;;  %v1970_v11 = vmul.f32 %v5995_v55, %v6248_v49  ;;  %v3121_v63 = vmul.f32 %v3089_v57, %v2641_v38  ;;  %v6368_v46 = vld [vmem:[#allocation2 + $0xfa] sm:$0xff] }
 0x284   : > { %v3405_v19 = vmul.f32 %v3373_v4, %v6279_v28  ;;  %v3310_v13 = vsub.f32 0.0, %v3246_v18  ;;  %v6340_v42 = vmul.f32 0.70710677, %v6331_v24  ;;  %vm3278_vm15 = vcmp.ge.f32.partialorder %v6171_v21, 0.0 }
 0x285   : > { %v2959_v1 = vadd.f32 -0.28449672, %v2927_v40  ;;  %v1901_v45 = vadd.f32 %v1869_v8, %v1800_v52  ;;  %v2574_v61 = vmul.f32 0.5, %v6164_v6  ;;  %v6345_v10 = vmul.f32 0.5, %v6202_v56  ;;  %v6353_v6 = vld [vmem:[#allocation2 + $0xf8] sm:$0xff] }
 0x286   : > { %4073 = vmatmul.mubr.f32.gmra.mxu1 %v3405_v19  ;;  %v3342_v39 = vsel %vm3278_vm15, %v3246_v18, %v3310_v13  ;;  %v2642_v59 = vand.u32 2147483647, %v6340_v42  ;;  %v2071_v38 = vmul.f32 %v6064_v35, %v6261_v62  ;;  %4376 = vpow2.f32 %v3166_v29 }
 0x287   : > { %v3374_v20 = vadd.f32 1.0, %v3342_v39  ;;  %v2991_v28 = vmul.f32 %v6305_v36, %v2959_v1  ;;  %v2002_v3 = vadd.f32 %v1970_v11, %v1901_v45  ;;  %v3168_v21 = vmul.f32 1.442695, %v3121_v63 }
 0x288   : > { %v2674_v0 = vmul.f32 0.3275911, %v2642_v59  ;;  %v2172_v15 = vmul.f32 %v6075_v5, %v6268_v47  ;;  %v1668_v25 = vmul.f32 %v6023_v14, %v6223_v7  ;;  %vm3279_vm1 = vcmp.ge.f32.partialorder %v6209_v48, 0.0 }
 0x289   : > { %v6355_v41 = vpop.eup %4370  ;;  %v3406_v56 = vmul.f32 %v3374_v20, %v2574_v61  ;;  %v3023_v33 = vadd.f32 0.2548296, %v2991_v28  ;;  %v2103_v60 = vadd.f32 %v2071_v38, %v2002_v3  ;;  %v3090_v57 = vsub.f32 0.0, %v2642_v59  ;;  %v6385_v3 = vld [vmem:[#allocation2 + $0x108] sm:$0xff] }
 0x28a   : > { %v2800_v51 = vmul.f32 1.0614054, %v6355_v41  ;;  %v2706_v12 = vadd.f32 1.0, %v2674_v0  ;;  %v1769_v26 = vmul.f32 %v6032_v32, %v6225_v34  ;;  %v2274_v29 = vmul.f32 %v6016_v2, %v6353_v6 }
 0x28b   : > { %4075 = vmatprep.mubr.f32.mxu1 %v3406_v56  ;;  %v3055_v30 = vmul.f32 %v6305_v36, %v3023_v33  ;;  %v2204_v27 = vadd.f32 %v2172_v15, %v2103_v60  ;;  %v1870_v7 = vmul.f32 %v6041_v44, %v6229_v16  ;;  %v1971_v40 = vmul.f32 %v5995_v55, %v6296_v31 }
 0x28c   : > { %v4373_v4 = vpop.eup %4372  ;;  %v2832_v18 = vadd.f32 -1.4531521, %v2800_v51  ;;  %4378 = vrcp.f32 %v2706_v12  ;;  %v1801_v52 = vadd.f32 %v1769_v26, %v1668_v25  ;;  %v2375_v36 = vmul.f32 %v6097_v22, %v6361_v54  ;;  %v6395_v25 = vld [vmem:[#allocation2 + $0x109] sm:$0xff] }
 0x28d   : > { %v3215_v34 = vmul.f32 %v4373_v4, %v3055_v30  ;;  %4380 = vpow2.f32 %v3168_v21  ;;  %v2306_v8 = vadd.f32 %v2274_v29, %v2204_v27  ;;  %v3122_v19 = vmul.f32 %v3090_v57, %v2642_v59  ;;  %v6406_v29 = vld [vmem:[#allocation2 + $0x10a] sm:$0xff] }
 0x28e   : > { %v2864_v11 = vmul.f32 %v6355_v41, %v2832_v18  ;;  %v2476_v13 = vmul.f32 %v6053_v43, %v6368_v46  ;;  %v1902_v16 = vadd.f32 %v1870_v7, %v1801_v52  ;;  %v2072_v45 = vmul.f32 %v6064_v35, %v6303_v37 }
 0x28f   : > { %v3247_v63 = vsub.f32 1.0, %v3215_v34  ;;  %v2407_v1 = vadd.f32 %v2375_v36, %v2306_v8  ;;  %v2173_v61 = vmul.f32 %v6075_v5, %v6311_v58  ;;  %v1669_v59 = vmul.f32 %v6023_v14, %v6248_v49 }
 0x290   : > { %v6383_v39 = vpop.eup %4374  ;;  %v2896_v20 = vadd.f32 1.4214138, %v2864_v11  ;;  %v2003_v28 = vadd.f32 %v1971_v40, %v1902_v16  ;;  %v1770_v38 = vmul.f32 %v6032_v32, %v6261_v62  ;;  %v1871_v56 = vmul.f32 %v6041_v44, %v6268_v47 }
 0x291   : > { %v3311_v21 = vsub.f32 0.0, %v3247_v63  ;;  %v2801_v0 = vmul.f32 1.0614054, %v6383_v39  ;;  %v2508_v15 = vadd.f32 %v2476_v13, %v2407_v1  ;;  %v1972_v12 = vmul.f32 %v5995_v55, %v6353_v6  ;;  %v6418_v13 = vld [vmem:[#allocation2 + $0x110] sm:$0xff] }
 0x292   : > { %v2928_v33 = vmul.f32 %v6355_v41, %v2896_v20  ;;  %v2104_v60 = vadd.f32 %v2072_v45, %v2003_v28  ;;  %v1802_v51 = vadd.f32 %v1770_v38, %v1669_v59  ;;  %v2275_v26 = vmul.f32 %v6016_v2, %v6385_v3 }
 0x293   : > { %v3343_v49 = vsel %vm3279_vm1, %v3247_v63, %v3311_v21  ;;  %v2833_v62 = vadd.f32 -1.4531521, %v2801_v0  ;;  %v6402_v57 = vadd.f32 %v6143_v9, %v2508_v15  ;;  %v4377_v4 = vpop.eup %4376  ;;  %v2376_v48 = vmul.f32 %v6097_v22, %v6395_v25 }
 0x294   : > { %v3375_v47 = vadd.f32 1.0, %v3343_v49  ;;  %v2960_v30 = vadd.f32 -0.28449672, %v2928_v33  ;;  %v2205_v27 = vadd.f32 %v2173_v61, %v2104_v60  ;;  %v1903_v7 = vadd.f32 %v1871_v56, %v1802_v51 }
 0x295   : > { %v2865_v18 = vmul.f32 %v6383_v39, %v2833_v62  ;;  %v6410_v52 = vmul.f32 0.70710677, %v6402_v57  ;;  %v2073_v40 = vmul.f32 %v6064_v35, %v6361_v54  ;;  %v2576_v16 = vmul.f32 0.5, %v6274_v53 }
 0x296   : > { %v3407_v34 = vmul.f32 %v3375_v47, %v6345_v10  ;;  %v2992_v8 = vmul.f32 %v6355_v41, %v2960_v30  ;;  %v2307_v36 = vadd.f32 %v2275_v26, %v2205_v27  ;;  %v2004_v11 = vadd.f32 %v1972_v12, %v1903_v7  ;;  %v6433_v12 = vld [vmem:[#allocation2 + $0x111] sm:$0xff] }
 0x297   : > { %v2897_v63 = vadd.f32 1.4214138, %v2865_v18  ;;  %v2643_v1 = vand.u32 2147483647, %v6410_v52  ;;  %v2477_v45 = vmul.f32 %v6053_v43, %v6406_v29  ;;  %v2174_v10 = vmul.f32 %v6075_v5, %v6368_v46 }
 0x298   : > { %4076 = vmatmul.mubr.f32.gmra.mxu1 %v3407_v34  ;;  %v3024_v61 = vadd.f32 0.2548296, %v2992_v8  ;;  %v2408_v20 = vadd.f32 %v2376_v48, %v2307_v36  ;;  %v2105_v28 = vadd.f32 %v2073_v40, %v2004_v11  ;;  %v3170_v21 = vmul.f32 1.442695, %v3122_v19 }
 0x299   : > { %v6426_v59 = vpop.eup %4378  ;;  %v2929_v38 = vmul.f32 %v6383_v39, %v2897_v63  ;;  %v2675_v0 = vmul.f32 0.3275911, %v2643_v1  ;;  %v2276_v53 = vmul.f32 %v6016_v2, %v6418_v13  ;;  %vm3280_vm2 = vcmp.ge.f32.partialorder %v6282_v50, 0.0 }
 0x29a   : > { %v4381_v15 = vpop.eup %4380  ;;  %v3056_v56 = vmul.f32 %v6355_v41, %v3024_v61  ;;  %v2802_v33 = vmul.f32 1.0614054, %v6426_v59  ;;  %v2509_v60 = vadd.f32 %v2477_v45, %v2408_v20  ;;  %v2206_v51 = vadd.f32 %v2174_v10, %v2105_v28  ;;  %v6441_v41 = vld [vmem:[#allocation2 + $0x112] sm:$0xff] }
 0x29b   : > { %v2961_v49 = vadd.f32 -0.28449672, %v2929_v38  ;;  %v2707_v62 = vadd.f32 1.0, %v2675_v0  ;;  %v1670_v19 = vmul.f32 %v6023_v14, %v6296_v31  ;;  %v2377_v18 = vmul.f32 %v6097_v22, %v6433_v12 }
 0x29c   : > { %v3216_v26 = vmul.f32 %v4377_v4, %v3056_v56  ;;  %v2834_v47 = vadd.f32 -1.4531521, %v2802_v33  ;;  %v6439_v30 = vadd.f32 %v6143_v9, %v2509_v60  ;;  %v2308_v27 = vadd.f32 %v2276_v53, %v2206_v51 }
 0x29d   : > { %v2993_v7 = vmul.f32 %v6383_v39, %v2961_v49  ;;  %4382 = vrcp.f32 %v2707_v62  ;;  %v1771_v48 = vmul.f32 %v6032_v32, %v6303_v37  ;;  %v2478_v36 = vmul.f32 %v6053_v43, %v6441_v41 }
 0x29e   : > { %v3248_v40 = vsub.f32 1.0, %v3216_v26  ;;  %v2866_v31 = vmul.f32 %v6426_v59, %v2834_v47  ;;  %4384 = vpow2.f32 %v3170_v21  ;;  %v6450_v4 = vmul.f32 0.70710677, %v6439_v30 }
 0x29f   : > { %v3025_v34 = vadd.f32 0.2548296, %v2993_v7  ;;  %v2409_v8 = vadd.f32 %v2377_v18, %v2308_v27  ;;  %v1803_v11 = vadd.f32 %v1771_v48, %v1670_v19  ;;  %v3091_v61 = vsub.f32 0.0, %v2643_v1  ;;  %v6473_v18 = vld [vmem:[#allocation2 + $0x120] sm:$0xff] }
 0x2a0   : > { %v3312_v63 = vsub.f32 0.0, %v3248_v40  ;;  %v2898_v45 = vadd.f32 1.4214138, %v2866_v31  ;;  %v2644_v20 = vand.u32 2147483647, %v6450_v4  ;;  %v1872_v10 = vmul.f32 %v6041_v44, %v6311_v58 }
 0x2a1   : > { %v3057_v37 = vmul.f32 %v6383_v39, %v3025_v34  ;;  %v2510_v28 = vadd.f32 %v2478_v36, %v2409_v8  ;;  %v1973_v38 = vmul.f32 %v5995_v55, %v6385_v3  ;;  %v2577_v49 = vmul.f32 0.5, %v6301_v23  ;;  %v6482_v8 = vld [vmem:[#allocation2 + $0x121] sm:$0xff] }
 0x2a2   : > { %v3344_v21 = vsel %vm3280_vm2, %v3248_v40, %v3312_v63  ;;  %v2930_v0 = vmul.f32 %v6426_v59, %v2898_v45  ;;  %v2676_v53 = vmul.f32 0.3275911, %v2644_v20  ;;  %v3092_v56 = vsub.f32 0.0, %v2644_v20 }
 0x2a3   : > { %v3376_v33 = vadd.f32 1.0, %v3344_v21  ;;  %v3217_v60 = vmul.f32 %v4381_v15, %v3057_v37  ;;  %v6464_v51 = vadd.f32 %v6143_v9, %v2510_v28  ;;  %v1904_v39 = vadd.f32 %v1872_v10, %v1803_v11  ;;  %v6489_v28 = vld [vmem:[#allocation2 + $0x122] sm:$0xff] }
 0x2a4   : > { %v2962_v62 = vadd.f32 -0.28449672, %v2930_v0  ;;  %v3123_v58 = vmul.f32 %v3091_v61, %v2643_v1  ;;  %v2708_v19 = vadd.f32 1.0, %v2676_v53  ;;  %v3124_v47 = vmul.f32 %v3092_v56, %v2644_v20 }
 0x2a5   : > { %v3408_v26 = vmul.f32 %v3376_v33, %v2576_v16  ;;  %v3249_v55 = vsub.f32 1.0, %v3217_v60  ;;  %v6468_v50 = vmul.f32 0.70710677, %v6464_v51  ;;  %v2005_v7 = vadd.f32 %v1973_v38, %v1904_v39 }
 0x2a6   : > { %v2994_v27 = vmul.f32 %v6426_v59, %v2962_v62  ;;  %4386 = vrcp.f32 %v2708_v19  ;;  %v2074_v15 = vmul.f32 %v6064_v35, %v6395_v25  ;;  %vm3281_vm3 = vcmp.ge.f32.partialorder %v6315_v17, 0.0 }
 0x2a7   : > { %4078 = vmatprep.mubr.f32.mxu1 %v3408_v26  ;;  %v3313_v23 = vsub.f32 0.0, %v3249_v55  ;;  %v6477_v16 = vmul.f32 0.5, %v6331_v24  ;;  %v2645_v1 = vand.u32 2147483647, %v6468_v50  ;;  %v3172_v40 = vmul.f32 1.442695, %v3123_v58 }
 0x2a8   : > { %v3026_v48 = vadd.f32 0.2548296, %v2994_v27  ;;  %v2106_v31 = vadd.f32 %v2074_v15, %v2005_v7  ;;  %v2175_v34 = vmul.f32 %v6075_v5, %v6406_v29  ;;  %v3174_v11 = vmul.f32 1.442695, %v3124_v47  ;;  %v6519_v27 = vld [vmem:[%s7228_s3] ss:$0 sm:$0xff] }
 0x2a9   : > { %v3345_v36 = vsel %vm3281_vm3, %v3249_v55, %v3313_v23  ;;  %v2677_v63 = vmul.f32 0.3275911, %v2645_v1  ;;  %v2277_v17 = vmul.f32 %v6016_v2, %v6473_v18  ;;  %v3093_v20 = vsub.f32 0.0, %v2645_v1  ;;  %v6529_v23 = vld [vmem:[%s7228_s3 + $0x1] ss:$0 sm:$0xff] }
 0x2aa   : > { %v6486_v45 = vpop.eup %4382  ;;  %v3377_v24 = vadd.f32 1.0, %v3345_v36  ;;  %v3058_v61 = vmul.f32 %v6426_v59, %v3026_v48  ;;  %v2207_v37 = vadd.f32 %v2175_v34, %v2106_v31  ;;  %v2378_v0 = vmul.f32 %v6097_v22, %v6482_v8  ;;  %v6538_v34 = vld [vmem:[#allocation2 + $0x128] sm:$0xff] }
 0x2ab   : > { %v4385_v10 = vpop.eup %4384  ;;  %v2803_v38 = vmul.f32 1.0614054, %v6486_v45  ;;  %v2709_v21 = vadd.f32 1.0, %v2677_v63  ;;  %v1671_v53 = vmul.f32 %v6023_v14, %v6353_v6  ;;  %v1772_v59 = vmul.f32 %v6032_v32, %v6361_v54  ;;  %v6505_v14 = vld [vmem:[%s7228_s3 + $0x3] ss:$0 sm:$0xff] }
 0x2ac   : > { %v3409_v2 = vmul.f32 %v3377_v24, %v2577_v49  ;;  %v3218_v56 = vmul.f32 %v4385_v10, %v3058_v61  ;;  %v2309_v33 = vadd.f32 %v2277_v17, %v2207_v37  ;;  %v2479_v39 = vmul.f32 %v6053_v43, %v6489_v28  ;;  %v6544_v17 = vld [vmem:[#allocation2 + $0x129] sm:$0xff] }
 0x2ad   : > { %v2835_v60 = vadd.f32 -1.4531521, %v2803_v38  ;;  %4388 = vrcp.f32 %v2709_v21  ;;  %v1873_v62 = vmul.f32 %v6041_v44, %v6368_v46  ;;  %v1804_v26 = vadd.f32 %v1772_v59, %v1671_v53  ;;  %v6562_v53 = vld [vmem:[%s7228_s3 + $0x6] ss:$0 sm:$0xff] }
 0x2ae   : > { %4079 = vmatmul.mubr.f32.gmra.mxu1 %v3409_v2  ;;  %v3250_v58 = vsub.f32 1.0, %v3218_v56  ;;  %v2410_v19 = vadd.f32 %v2378_v0, %v2309_v33  ;;  %v1974_v32 = vmul.f32 %v6505_v14, %v6418_v13  ;;  %vm3282_vm4 = vcmp.ge.f32.partialorder %v6340_v42, 0.0  ;;  %v6569_v33 = vld [vmem:[#allocation2 + $0x138] sm:$0xff] }
 0x2af   : > { %v2867_v6 = vmul.f32 %v6486_v45, %v2835_v60  ;;  %4390 = vpow2.f32 %v3172_v40  ;;  %v3125_v43 = vmul.f32 %v3093_v20, %v2645_v1  ;;  %v6512_v44 = vmul.f32 0.5, %v6402_v57  ;;  %v6554_v20 = vld [vmem:[#allocation2 + $0x12a] sm:$0xff] }
 0x2b0   : > { %v3314_v54 = vsub.f32 0.0, %v3250_v58  ;;  %v2511_v46 = vadd.f32 %v2479_v39, %v2410_v19  ;;  %v1905_v49 = vadd.f32 %v1873_v62, %v1804_v26  ;;  %4392 = vpow2.f32 %v3174_v11  ;;  %v6575_v62 = vld [vmem:[%s7228_s3 + $0x8] ss:$0 sm:$0xff] }
 0x2b1   : > { %v2899_v55 = vadd.f32 1.4214138, %v2867_v6  ;;  %v2075_v47 = vmul.f32 %v6064_v35, %v6433_v12  ;;  %v1672_v42 = vmul.f32 %v6519_v27, %v6385_v3  ;;  %v1773_v35 = vmul.f32 %v6529_v23, %v6395_v25  ;;  %v6549_v25 = vld [vmem:[%s7228_s3 + $0x2] ss:$0 sm:$0xff]  ;;  %v6589_v6 = vld [vmem:[%s7228_s3 + $0x5] ss:$0 sm:$0xff] }
 0x2b2   : > { %v3346_v7 = vsel %vm3282_vm4, %v3250_v58, %v3314_v54  ;;  %v6524_v15 = vadd.f32 %v6143_v9, %v2511_v46  ;;  %v2006_v57 = vadd.f32 %v1974_v32, %v1905_v49  ;;  %v3176_v31 = vmul.f32 1.442695, %v3125_v43 }
 0x2b3   : > { %v6533_v1 = vpop.eup %4386  ;;  %v3378_v48 = vadd.f32 1.0, %v3346_v7  ;;  %v2931_v40 = vmul.f32 %v6486_v45, %v2899_v55  ;;  %v2176_v3 = vmul.f32 %v6075_v5, %v6441_v41  ;;  %v1874_v24 = vmul.f32 %v6549_v25, %v6406_v29 }
 0x2b4   : > { %v2804_v36 = vmul.f32 1.0614054, %v6533_v1  ;;  %v6542_v11 = vmul.f32 0.70710677, %v6524_v15  ;;  %v2107_v63 = vadd.f32 %v2075_v47, %v2006_v57  ;;  %v1805_v37 = vadd.f32 %v1773_v35, %v1672_v42  ;;  %v6600_v35 = vld [vmem:[#allocation2 + $0x139] sm:$0xff] }
 0x2b5   : > { %v3410_v5 = vmul.f32 %v3378_v48, %v6477_v16  ;;  %v2963_v61 = vadd.f32 -0.28449672, %v2931_v40  ;;  %v1975_v10 = vmul.f32 %v6505_v14, %v6473_v18  ;;  %v2278_v29 = vmul.f32 %v6562_v53, %v6538_v34 }
 0x2b6   : > { %v2836_v38 = vadd.f32 -1.4531521, %v2804_v36  ;;  %v2646_v21 = vand.u32 2147483647, %v6542_v11  ;;  %v2208_v0 = vadd.f32 %v2176_v3, %v2107_v63  ;;  %4394 = vpow2.f32 %v3176_v31 }
 0x2b7   : > { %4081 = vmatprep.mubr.f32.mxu1 %v3410_v5  ;;  %v2995_v16 = vmul.f32 %v6486_v45, %v2963_v61  ;;  %v2379_v2 = vmul.f32 %v6097_v22, %v6544_v17  ;;  %v1906_v56 = vadd.f32 %v1874_v24, %v1805_v37  ;;  %v2480_v58 = vmul.f32 %v6575_v62, %v6554_v20  ;;  %v6582_v22 = vld [vmem:[%s7228_s3 + $0x4] ss:$0 sm:$0xff]  ;;  %v6605_v61 = vld [vmem:[#allocation2 + $0x13a] sm:$0xff] }
 0x2b8   : > { %v2868_v59 = vmul.f32 %v6533_v1, %v2836_v38  ;;  %v2678_v60 = vmul.f32 0.3275911, %v2646_v21  ;;  %v2310_v39 = vadd.f32 %v2278_v29, %v2208_v0  ;;  %v2076_v32 = vmul.f32 %v6582_v22, %v6482_v8 }
 0x2b9   : > { %v3027_v19 = vadd.f32 0.2548296, %v2995_v16  ;;  %v2007_v26 = vadd.f32 %v1975_v10, %v1906_v56  ;;  %v2177_v43 = vmul.f32 %v6589_v6, %v6489_v28  ;;  %vm3283_vm5 = vcmp.ge.f32.partialorder %v6410_v52, 0.0 }
 0x2ba   : > { %v6593_v54 = vpop.eup %4388  ;;  %v2900_v46 = vadd.f32 1.4214138, %v2868_v59  ;;  %v2710_v49 = vadd.f32 1.0, %v2678_v60  ;;  %v2411_v55 = vadd.f32 %v2379_v2, %v2310_v39  ;;  %v2279_v47 = vmul.f32 %v6562_v53, %v6569_v33 }
 0x2bb   : > { %v3059_v42 = vmul.f32 %v6486_v45, %v3027_v19  ;;  %v2805_v7 = vmul.f32 1.0614054, %v6593_v54  ;;  %v2108_v57 = vadd.f32 %v2076_v32, %v2007_v26  ;;  %v1673_v48 = vmul.f32 %v6519_v27, %v6418_v13  ;;  %v6615_v13 = vld [vmem:[%s7228_s3 + $0x7] ss:$0 sm:$0xff] }
 0x2bc   : > { %v4391_v40 = vpop.eup %4390  ;;  %v2932_v31 = vmul.f32 %v6533_v1, %v2900_v46  ;;  %4396 = vrcp.f32 %v2710_v49  ;;  %v3094_v3 = vsub.f32 0.0, %v2646_v21  ;;  %v2512_v36 = vadd.f32 %v2480_v58, %v2411_v55 }
 0x2bd   : > { %v3219_v63 = vmul.f32 %v4391_v40, %v3059_v42  ;;  %v2837_v24 = vadd.f32 -1.4531521, %v2805_v7  ;;  %v2209_v5 = vadd.f32 %v2177_v43, %v2108_v57  ;;  %v1774_v45 = vmul.f32 %v6529_v23, %v6433_v12  ;;  %v4393_v37 = vpop.eup %4392 }
 0x2be   : > { %v2964_v10 = vadd.f32 -0.28449672, %v2932_v31  ;;  %v6610_v38 = vadd.f32 %v6143_v9, %v2512_v36  ;;  %v2380_v0 = vmul.f32 %v6615_v13, %v6600_v35  ;;  %v1875_v29 = vmul.f32 %v6549_v25, %v6441_v41 }
 0x2bf   : > { %v3251_v16 = vsub.f32 1.0, %v3219_v63  ;;  %v2869_v2 = vmul.f32 %v6593_v54, %v2837_v24  ;;  %v2311_v12 = vadd.f32 %v2279_v47, %v2209_v5  ;;  %v1806_v56 = vadd.f32 %v1774_v45, %v1673_v48  ;;  %v6647_v5 = vld [vmem:[#allocation2 + $0x140] sm:$0xff] }
 0x2c0   : > { %v2996_v59 = vmul.f32 %v6533_v1, %v2964_v10  ;;  %v6624_v9 = vmul.f32 0.70710677, %v6610_v38  ;;  %v2481_v60 = vmul.f32 %v6575_v62, %v6605_v61  ;;  %v1976_v39 = vmul.f32 %v6505_v14, %v6538_v34 }
 0x2c1   : > { %v3315_v58 = vsub.f32 0.0, %v3251_v16  ;;  %v2901_v19 = vadd.f32 1.4214138, %v2869_v2  ;;  %v2412_v26 = vadd.f32 %v2380_v0, %v2311_v12  ;;  %v1907_v41 = vadd.f32 %v1875_v29, %v1806_v56  ;;  %v6655_v12 = vld [vmem:[#allocation2 + $0x141] sm:$0xff] }
 0x2c2   : > { %v3028_v32 = vadd.f32 0.2548296, %v2996_v59  ;;  %v3126_v43 = vmul.f32 %v3094_v3, %v2646_v21  ;;  %v2647_v46 = vand.u32 2147483647, %v6624_v9  ;;  %v2077_v49 = vmul.f32 %v6582_v22, %v6544_v17  ;;  %v6640_v21 = vld [vmem:[%s7229_s4] ss:$0 sm:$0xff] }
 0x2c3   : > { %v3347_v55 = vsel %vm3283_vm5, %v3251_v16, %v3315_v58  ;;  %v2933_v47 = vmul.f32 %v6593_v54, %v2901_v19  ;;  %v2513_v42 = vadd.f32 %v2481_v60, %v2412_v26  ;;  %v2008_v7 = vadd.f32 %v1976_v39, %v1907_v41  ;;  %v4395_v57 = vpop.eup %4394 }
 0x2c4   : > { %v3379_v48 = vadd.f32 1.0, %v3347_v55  ;;  %v3060_v40 = vmul.f32 %v6533_v1, %v3028_v32  ;;  %v2679_v31 = vmul.f32 0.3275911, %v2647_v46  ;;  %v3095_v36 = vsub.f32 0.0, %v2647_v46 }
 0x2c5   : > { %v2965_v63 = vadd.f32 -0.28449672, %v2933_v47  ;;  %v6643_v3 = vadd.f32 %v6640_v21, %v2513_v42  ;;  %v2109_v52 = vadd.f32 %v2077_v49, %v2008_v7  ;;  %v2178_v24 = vmul.f32 %v6589_v6, %v6554_v20 }
 0x2c6   : > { %v3411_v45 = vmul.f32 %v3379_v48, %v6512_v44  ;;  %v3220_v1 = vmul.f32 %v4393_v37, %v3060_v40  ;;  %v2711_v10 = vadd.f32 1.0, %v2679_v31  ;;  %v2580_v0 = vmul.f32 0.5, %v6439_v30  ;;  %v6660_v37 = vld [vmem:[#allocation2 + $0x142] sm:$0xff] }
 0x2c7   : > { %v2997_v29 = vmul.f32 %v6593_v54, %v2965_v63  ;;  %v6653_v16 = vmul.f32 0.70710677, %v6643_v3  ;;  %v2210_v2 = vadd.f32 %v2178_v24, %v2109_v52  ;;  %vm3284_vm6 = vcmp.ge.f32.partialorder %v6450_v4, 0.0 }
 0x2c8   : > { %4082 = vmatmul.mubr.f32.gmra.mxu1 %v3411_v45  ;;  %v3252_v56 = vsub.f32 1.0, %v3220_v1  ;;  %4398 = vrcp.f32 %v2711_v10  ;;  %v2280_v44 = vmul.f32 %v6562_v53, %v6647_v5  ;;  %v3178_v60 = vmul.f32 1.442695, %v3126_v43 }
 0x2c9   : > { %v6662_v59 = vpop.eup %4396  ;;  %v3029_v30 = vadd.f32 0.2548296, %v2997_v29  ;;  %v3127_v39 = vmul.f32 %v3095_v36, %v2647_v46  ;;  %v2648_v58 = vand.u32 2147483647, %v6653_v16  ;;  %v2381_v32 = vmul.f32 %v6615_v13, %v6655_v12 }
 0x2ca   : > { %v3316_v19 = vsub.f32 0.0, %v3252_v56  ;;  %v2806_v26 = vmul.f32 1.0614054, %v6662_v59  ;;  %v2312_v41 = vadd.f32 %v2280_v44, %v2210_v2  ;;  %v2482_v42 = vmul.f32 %v6575_v62, %v6660_v37 }
 0x2cb   : > { %v3061_v49 = vmul.f32 %v6593_v54, %v3029_v30  ;;  %v2680_v55 = vmul.f32 0.3275911, %v2648_v58  ;;  %v3096_v47 = vsub.f32 0.0, %v2648_v58  ;;  %v1674_v48 = vmul.f32 %v6519_v27, %v6473_v18 }
 0x2cc   : > { %v3348_v43 = vsel %vm3284_vm6, %v3252_v56, %v3316_v19  ;;  %v2838_v46 = vadd.f32 -1.4531521, %v2806_v26  ;;  %v2413_v7 = vadd.f32 %v2381_v32, %v2312_v41  ;;  %4400 = vpow2.f32 %v3178_v60 }
 0x2cd   : > { %v3380_v40 = vadd.f32 1.0, %v3348_v43  ;;  %v3221_v31 = vmul.f32 %v4395_v57, %v3061_v49  ;;  %v2712_v36 = vadd.f32 1.0, %v2680_v55  ;;  %v3180_v54 = vmul.f32 1.442695, %v3127_v39 }
 0x2ce   : > { %v2870_v63 = vmul.f32 %v6662_v59, %v2838_v46  ;;  %v2514_v52 = vadd.f32 %v2482_v42, %v2413_v7  ;;  %v1775_v24 = vmul.f32 %v6529_v23, %v6482_v8  ;;  %v3128_v4 = vmul.f32 %v3096_v47, %v2648_v58  ;;  %v6707_v46 = vld [vmem:[#allocation2 + $0x150] sm:$0xff] }
 0x2cf   : > { %v3412_v45 = vmul.f32 %v3380_v40, %v2580_v0  ;;  %v3253_v1 = vsub.f32 1.0, %v3221_v31  ;;  %4402 = vrcp.f32 %v2712_v36  ;;  %v1876_v57 = vmul.f32 %v6549_v25, %v6489_v28  ;;  %v6711_v40 = vld [vmem:[#allocation2 + $0x152] sm:$0xff] }
 0x2d0   : > { %v2902_v10 = vadd.f32 1.4214138, %v2870_v63  ;;  %v6679_v29 = vadd.f32 %v6640_v21, %v2514_v52  ;;  %v1807_v18 = vadd.f32 %v1775_v24, %v1674_v48  ;;  %v2581_v2 = vmul.f32 0.5, %v6464_v51  ;;  %v6709_v48 = vld [vmem:[#allocation2 + $0x151] sm:$0xff] }
 0x2d1   : > { %4084 = vmatprep.mubr.f32.mxu1 %v3412_v45  ;;  %v3317_v56 = vsub.f32 0.0, %v3253_v1  ;;  %v1977_v44 = vmul.f32 %v6505_v14, %v6569_v33  ;;  %vm3285_vm7 = vcmp.ge.f32.partialorder %v6468_v50, 0.0  ;;  %v6692_v39 = vmul.f32 0.5, %v6524_v15 }
 0x2d2   : > { %v2934_v8 = vmul.f32 %v6662_v59, %v2902_v10  ;;  %v6689_v0 = vmul.f32 0.70710677, %v6679_v29  ;;  %v1908_v30 = vadd.f32 %v1876_v57, %v1807_v18  ;;  %4404 = vpow2.f32 %v3180_v54 }
 0x2d3   : > { %v3349_v60 = vsel %vm3285_vm7, %v3253_v1, %v3317_v56  ;;  %v3182_v28 = vmul.f32 1.442695, %v3128_v4  ;;  %v2078_v26 = vmul.f32 %v6582_v22, %v6600_v35  ;;  %v2179_v32 = vmul.f32 %v6589_v6, %v6605_v61 }
 0x2d4   : > { %v3381_v58 = vadd.f32 1.0, %v3349_v60  ;;  %v2966_v51 = vadd.f32 -0.28449672, %v2934_v8  ;;  %v2649_v19 = vand.u32 2147483647, %v6689_v0  ;;  %v2009_v41 = vadd.f32 %v1977_v44, %v1908_v30  ;;  %v6728_v8 = vld [vmem:[#allocation2 + $0x158] sm:$0xff] }
 0x2d5   : > { %v6697_v50 = vpop.eup %4398  ;;  %v1675_v49 = vmul.f32 %v6519_v27, %v6538_v34  ;;  %v1776_v15 = vmul.f32 %v6529_v23, %v6544_v17  ;;  %v1877_v34 = vmul.f32 %v6549_v25, %v6554_v20  ;;  %v1978_v17 = vmul.f32 %v6505_v14, %v6647_v5 }
 0x2d6   : > { %v3413_v55 = vmul.f32 %v3381_v58, %v2581_v2  ;;  %v2998_v47 = vmul.f32 %v6662_v59, %v2966_v51  ;;  %v2807_v42 = vmul.f32 1.0614054, %v6697_v50  ;;  %v2681_v43 = vmul.f32 0.3275911, %v2649_v19 }
 0x2d7   : > { %v2110_v7 = vadd.f32 %v2078_v26, %v2009_v41  ;;  %v1808_v31 = vadd.f32 %v1776_v15, %v1675_v49  ;;  %v3097_v52 = vsub.f32 0.0, %v2649_v19  ;;  %vm3286_vm8 = vcmp.ge.f32.partialorder %v6542_v11, 0.0 }
 0x2d8   : > { %4085 = vmatmul.mubr.f32.gmra.mxu1 %v3413_v55  ;;  %v3030_v36 = vadd.f32 0.2548296, %v2998_v47  ;;  %v2839_v63 = vadd.f32 -1.4531521, %v2807_v42  ;;  %v2713_v54 = vadd.f32 1.0, %v2681_v43  ;;  %4406 = vpow2.f32 %v3182_v28 }
 0x2d9   : > { %v2211_v24 = vadd.f32 %v2179_v32, %v2110_v7  ;;  %v2281_v45 = vmul.f32 %v6562_v53, %v6707_v46  ;;  %v1909_v1 = vadd.f32 %v1877_v34, %v1808_v31  ;;  %v4401_v4 = vpop.eup %4400  ;;  %v2382_v18 = vmul.f32 %v6615_v13, %v6709_v48 }
 0x2da   : > { %v3062_v10 = vmul.f32 %v6662_v59, %v3030_v36  ;;  %v2871_v20 = vmul.f32 %v6697_v50, %v2839_v63  ;;  %4408 = vrcp.f32 %v2713_v54  ;;  %v2483_v2 = vmul.f32 %v6575_v62, %v6711_v40  ;;  %v6746_v36 = vld [vmem:[#allocation2 + $0x15a] sm:$0xff] }
 0x2db   : > { %v2313_v57 = vadd.f32 %v2281_v45, %v2211_v24  ;;  %v2010_v56 = vadd.f32 %v1978_v17, %v1909_v1  ;;  %v2079_v44 = vmul.f32 %v6582_v22, %v6655_v12  ;;  %v3129_v28 = vmul.f32 %v3097_v52, %v2649_v19 }
 0x2dc   : > { %v6730_v30 = vpop.eup %4402  ;;  %v3222_v60 = vmul.f32 %v4401_v4, %v3062_v10  ;;  %v2903_v59 = vadd.f32 1.4214138, %v2871_v20  ;;  %v1676_v58 = vmul.f32 %v6519_v27, %v6569_v33  ;;  %v2180_v32 = vmul.f32 %v6589_v6, %v6660_v37  ;;  %v6742_v33 = vld [vmem:[#allocation2 + $0x159] sm:$0xff] }
 0x2dd   : > { %v2808_v51 = vmul.f32 1.0614054, %v6730_v30  ;;  %v2414_v26 = vadd.f32 %v2382_v18, %v2313_v57  ;;  %v2111_v41 = vadd.f32 %v2079_v44, %v2010_v56  ;;  %v2282_v55 = vmul.f32 %v6562_v53, %v6728_v8 }
 0x2de   : > { %v3254_v49 = vsub.f32 1.0, %v3222_v60  ;;  %v2935_v15 = vmul.f32 %v6697_v50, %v2903_v59  ;;  %v1777_v47 = vmul.f32 %v6529_v23, %v6600_v35  ;;  %v1878_v7 = vmul.f32 %v6549_v25, %v6605_v61 }
 0x2df   : > { %v2840_v19 = vadd.f32 -1.4531521, %v2808_v51  ;;  %v2515_v42 = vadd.f32 %v2483_v2, %v2414_v26  ;;  %v2212_v43 = vadd.f32 %v2180_v32, %v2111_v41  ;;  %v4405_v31 = vpop.eup %4404  ;;  %v1979_v54 = vmul.f32 %v6505_v14, %v6707_v46 }
 0x2e0   : > { %v3318_v34 = vsub.f32 0.0, %v3254_v49  ;;  %v2967_v17 = vadd.f32 -0.28449672, %v2935_v15  ;;  %v1809_v63 = vadd.f32 %v1777_v47, %v1676_v58  ;;  %v3184_v35 = vmul.f32 1.442695, %v3129_v28  ;;  %v6772_v15 = vld [vmem:[#allocation2 + $0x168] sm:$0xff] }
 0x2e1   : > { %v2872_v52 = vmul.f32 %v6730_v30, %v2840_v19  ;;  %v6752_v24 = vadd.f32 %v6640_v21, %v2515_v42  ;;  %v2314_v45 = vadd.f32 %v2282_v55, %v2212_v43  ;;  %v2383_v4 = vmul.f32 %v6615_v13, %v6742_v33  ;;  %v6777_v19 = vld [vmem:[#allocation2 + $0x169] sm:$0xff] }
 0x2e2   : > { %v3350_v1 = vsel %vm3286_vm8, %v3254_v49, %v3318_v34  ;;  %v2999_v61 = vmul.f32 %v6697_v50, %v2967_v17  ;;  %v1910_v10 = vadd.f32 %v1878_v7, %v1809_v63  ;;  %v2484_v2 = vmul.f32 %v6575_v62, %v6746_v36 }
 0x2e3   : > { %v3382_v20 = vadd.f32 1.0, %v3350_v1  ;;  %v2904_v18 = vadd.f32 1.4214138, %v2872_v52  ;;  %v6760_v57 = vmul.f32 0.70710677, %v6752_v24  ;;  %v2415_v44 = vadd.f32 %v2383_v4, %v2314_v45  ;;  %v6793_v1 = vld [vmem:[#allocation2 + $0x16a] sm:$0xff] }
 0x2e4   : > { %v3031_v56 = vadd.f32 0.2548296, %v2999_v61  ;;  %v2011_v60 = vadd.f32 %v1979_v54, %v1910_v10  ;;  %v2080_v11 = vmul.f32 %v6582_v22, %v6709_v48  ;;  %v2181_v49 = vmul.f32 %v6589_v6, %v6711_v40 }
 0x2e5   : > { %v3414_v59 = vmul.f32 %v3382_v20, %v6692_v39  ;;  %v2936_v28 = vmul.f32 %v6730_v30, %v2904_v18  ;;  %v2650_v58 = vand.u32 2147483647, %v6760_v57  ;;  %v4407_v51 = vpop.eup %4406  ;;  %v2516_v41 = vadd.f32 %v2484_v2, %v2415_v44 }
 0x2e6   : > { %v3063_v26 = vmul.f32 %v6697_v50, %v3031_v56  ;;  %v2112_v32 = vadd.f32 %v2080_v11, %v2011_v60  ;;  %vm3287_vm9 = vcmp.ge.f32.partialorder %v6624_v9, 0.0  ;;  %4410 = vpow2.f32 %v3184_v35 }
 0x2e7   : > { %v6774_v55 = vpop.eup %4408  ;;  %4087 = vmatprep.mubr.f32.mxu1 %v3414_v59  ;;  %v2968_v39 = vadd.f32 -0.28449672, %v2936_v28  ;;  %v2682_v47 = vmul.f32 0.3275911, %v2650_v58  ;;  %v6781_v43 = vadd.f32 %v6640_v21, %v2516_v41  ;;  %v2283_v63 = vmul.f32 %v6562_v53, %v6772_v15 }
 0x2e8   : > { %v3223_v42 = vmul.f32 %v4405_v31, %v3063_v26  ;;  %v2809_v50 = vmul.f32 1.0614054, %v6774_v55  ;;  %v2213_v7 = vadd.f32 %v2181_v49, %v2112_v32  ;;  %v1677_v54 = vmul.f32 %v6519_v27, %v6647_v5 }
 0x2e9   : > { %v3000_v34 = vmul.f32 %v6730_v30, %v2968_v39  ;;  %v2714_v17 = vadd.f32 1.0, %v2682_v47  ;;  %v6789_v45 = vmul.f32 0.70710677, %v6781_v43  ;;  %v2384_v31 = vmul.f32 %v6615_v13, %v6777_v19 }
 0x2ea   : > { %v3255_v52 = vsub.f32 1.0, %v3223_v42  ;;  %v2841_v35 = vadd.f32 -1.4531521, %v2809_v50  ;;  %v2315_v4 = vadd.f32 %v2283_v63, %v2213_v7  ;;  %v1778_v10 = vmul.f32 %v6529_v23, %v6655_v12 }
 0x2eb   : > { %v3032_v61 = vadd.f32 0.2548296, %v3000_v34  ;;  %4412 = vrcp.f32 %v2714_v17  ;;  %v3098_v5 = vsub.f32 0.0, %v2650_v58  ;;  %v2651_v2 = vand.u32 2147483647, %v6789_v45 }
 0x2ec   : > { %v3319_v20 = vsub.f32 0.0, %v3255_v52  ;;  %v2873_v18 = vmul.f32 %v6774_v55, %v2841_v35  ;;  %v2416_v44 = vadd.f32 %v2384_v31, %v2315_v4  ;;  %v2485_v60 = vmul.f32 %v6575_v62, %v6793_v1  ;;  %v6819_v35 = vld [vmem:[#allocation2 + $0x170] sm:$0xff] }
 0x2ed   : > { %v3064_v56 = vmul.f32 %v6730_v30, %v3032_v61  ;;  %v1810_v11 = vadd.f32 %v1778_v10, %v1677_v54  ;;  %v2583_v59 = vmul.f32 0.5, %v6610_v38  ;;  %v2683_v12 = vmul.f32 0.3275911, %v2651_v2 }
 0x2ee   : > { %v3351_v28 = vsel %vm3287_vm9, %v3255_v52, %v3319_v20  ;;  %v2905_v26 = vadd.f32 1.4214138, %v2873_v18  ;;  %v2517_v49 = vadd.f32 %v2485_v60, %v2416_v44  ;;  %v1879_v39 = vmul.f32 %v6549_v25, %v6660_v37 }
 0x2ef   : > { %v3383_v41 = vadd.f32 1.0, %v3351_v28  ;;  %v3224_v32 = vmul.f32 %v4407_v51, %v3064_v56  ;;  %v3130_v47 = vmul.f32 %v3098_v5, %v2650_v58  ;;  %v2715_v42 = vadd.f32 1.0, %v2683_v12  ;;  %v6829_v56 = vld [vmem:[#allocation2 + $0x171] sm:$0xff] }
 0x2f0   : > { %v2937_v30 = vmul.f32 %v6774_v55, %v2905_v26  ;;  %v1980_v50 = vmul.f32 %v6505_v14, %v6728_v8  ;;  %v6811_v9 = vadd.f32 %v6640_v21, %v2517_v49  ;;  %v1911_v34 = vadd.f32 %v1879_v39, %v1810_v11 }
 0x2f1   : > { %v3415_v7 = vmul.f32 %v3383_v41, %v2583_v59  ;;  %v3256_v38 = vsub.f32 1.0, %v3224_v32  ;;  %v2584_v17 = vmul.f32 0.5, %v6643_v3  ;;  %4414 = vrcp.f32 %v2715_v42 }
 0x2f2   : > { %v2969_v51 = vadd.f32 -0.28449672, %v2937_v30  ;;  %v3099_v63 = vsub.f32 0.0, %v2651_v2  ;;  %v6815_v54 = vmul.f32 0.70710677, %v6811_v9  ;;  %v2012_v58 = vadd.f32 %v1980_v50, %v1911_v34 }
 0x2f3   : > { %4088 = vmatmul.mubr.f32.gmra.mxu1 %v3415_v7  ;;  %v3320_v37 = vsub.f32 0.0, %v3256_v38  ;;  %v2081_v52 = vmul.f32 %v6582_v22, %v6742_v33  ;;  %v4411_v31 = vpop.eup %4410  ;;  %vm3288_vm10 = vcmp.ge.f32.partialorder %v6653_v16, 0.0  ;;  %v6823_v61 = vmul.f32 0.5, %v6679_v29 }
 0x2f4   : > { %v3001_v3 = vmul.f32 %v6774_v55, %v2969_v51  ;;  %v3186_v4 = vmul.f32 1.442695, %v3130_v47  ;;  %v2652_v20 = vand.u32 2147483647, %v6815_v54  ;;  %v2182_v5 = vmul.f32 %v6589_v6, %v6746_v36 }
 0x2f5   : > { %v3352_v10 = vsel %vm3288_vm10, %v3256_v38, %v3320_v37  ;;  %v2113_v18 = vadd.f32 %v2081_v52, %v2012_v58  ;;  %v3131_v11 = vmul.f32 %v3099_v63, %v2651_v2  ;;  %v2284_v16 = vmul.f32 %v6562_v53, %v6819_v35  ;;  %v6841_v2 = vld [vmem:[#allocation2 + $0x172] sm:$0xff] }
 0x2f6   : > { %v3384_v44 = vadd.f32 1.0, %v3352_v10  ;;  %v3033_v60 = vadd.f32 0.2548296, %v3001_v3  ;;  %vm3289_vm11 = vcmp.ge.f32.partialorder %v6689_v0, 0.0  ;;  %v2684_v29 = vmul.f32 0.3275911, %v2652_v20 }
 0x2f7   : > { %v3100_v59 = vsub.f32 0.0, %v2652_v20  ;;  %v2214_v28 = vadd.f32 %v2182_v5, %v2113_v18  ;;  %v1678_v26 = vmul.f32 %v6519_v27, %v6707_v46  ;;  %v2385_v49 = vmul.f32 %v6615_v13, %v6829_v56 }
 0x2f8   : > { %v6836_v12 = vpop.eup %4412  ;;  %v3416_v41 = vmul.f32 %v3384_v44, %v2584_v17  ;;  %v3065_v32 = vmul.f32 %v6774_v55, %v3033_v60  ;;  %v1779_v39 = vmul.f32 %v6529_v23, %v6709_v48  ;;  %v2716_v47 = vadd.f32 1.0, %v2684_v29 }
 0x2f9   : > { %v2810_v30 = vmul.f32 1.0614054, %v6836_v12  ;;  %v2316_v42 = vadd.f32 %v2284_v16, %v2214_v28  ;;  %v1880_v46 = vmul.f32 %v6549_v25, %v6711_v40  ;;  %v3132_v7 = vmul.f32 %v3100_v59, %v2652_v20  ;;  %v6855_v40 = vld [vmem:[#allocation2 + $0x180] sm:$0xff] }
 0x2fa   : > { %4090 = vmatprep.mubr.f32.mxu1 %v3416_v41  ;;  %v3225_v50 = vmul.f32 %v4411_v31, %v3065_v32  ;;  %v1811_v38 = vadd.f32 %v1779_v39, %v1678_v26  ;;  %v1981_v55 = vmul.f32 %v6505_v14, %v6772_v15  ;;  %4416 = vrcp.f32 %v2716_v47  ;;  %v6880_v32 = vld [vmem:[#allocation2 + $0x181] sm:$0xff] }
 0x2fb   : > { %v2842_v34 = vadd.f32 -1.4531521, %v2810_v30  ;;  %v2417_v17 = vadd.f32 %v2385_v49, %v2316_v42  ;;  %v2486_v48 = vmul.f32 %v6575_v62, %v6841_v2  ;;  %v6853_v63 = vmul.f32 0.5, %v6752_v24  ;;  %v6884_v30 = vld [vmem:[#allocation2 + $0x182] sm:$0xff] }
 0x2fc   : > { %v3257_v51 = vsub.f32 1.0, %v3225_v50  ;;  %4418 = vpow2.f32 %v3186_v4  ;;  %v1912_v37 = vadd.f32 %v1880_v46, %v1811_v38  ;;  %v3188_v52 = vmul.f32 1.442695, %v3131_v11 }
 0x2fd   : > { %v2874_v58 = vmul.f32 %v6836_v12, %v2842_v34  ;;  %v2518_v31 = vadd.f32 %v2486_v48, %v2417_v17  ;;  %v2082_v3 = vmul.f32 %v6582_v22, %v6777_v19  ;;  %v3190_v20 = vmul.f32 1.442695, %v3132_v7 }
 0x2fe   : > { %v3321_v10 = vsub.f32 0.0, %v3257_v51  ;;  %v2013_v18 = vadd.f32 %v1981_v55, %v1912_v37  ;;  %v1679_v5 = vmul.f32 %v6519_v27, %v6728_v8  ;;  %v6862_v44 = vpop.eup %4414  ;;  %v2183_v60 = vmul.f32 %v6589_v6, %v6793_v1 }
 0x2ff   : > { %v2906_v24 = vadd.f32 1.4214138, %v2874_v58  ;;  %v6865_v4 = vadd.f32 %v6640_v21, %v2518_v31  ;;  %v2285_v11 = vmul.f32 %v6562_v53, %v6855_v40  ;;  %v2811_v29 = vmul.f32 1.0614054, %v6862_v44 }
 0x300   : > { %v3353_v16 = vsel %vm3289_vm11, %v3257_v51, %v3321_v10  ;;  %v2114_v59 = vadd.f32 %v2082_v3, %v2013_v18  ;;  %v1780_v8 = vmul.f32 %v6529_v23, %v6742_v33  ;;  %v1881_v49 = vmul.f32 %v6549_v25, %v6746_v36 }
 0x301   : > { %v3385_v28 = vadd.f32 1.0, %v3353_v16  ;;  %v2938_v26 = vmul.f32 %v6836_v12, %v2906_v24  ;;  %v6878_v41 = vmul.f32 0.70710677, %v6865_v4  ;;  %v2843_v39 = vadd.f32 -1.4531521, %v2811_v29  ;;  %v6908_v16 = vld [vmem:[#allocation2 + $0x189] sm:$0xff] }
 0x302   : > { %v2215_v0 = vadd.f32 %v2183_v60, %v2114_v59  ;;  %v1812_v47 = vadd.f32 %v1780_v8, %v1679_v5  ;;  %v1982_v42 = vmul.f32 %v6505_v14, %v6819_v35  ;;  %4420 = vpow2.f32 %v3188_v52 }
 0x303   : > { %v3417_v33 = vmul.f32 %v3385_v28, %v6823_v61  ;;  %v2970_v46 = vadd.f32 -0.28449672, %v2938_v26  ;;  %v2653_v50 = vand.u32 2147483647, %v6878_v41  ;;  %v2875_v7 = vmul.f32 %v6862_v44, %v2843_v39  ;;  %v6896_v61 = vld [vmem:[#allocation2 + $0x188] sm:$0xff] }
 0x304   : > { %v2317_v38 = vadd.f32 %v2285_v11, %v2215_v0  ;;  %v2386_v36 = vmul.f32 %v6615_v13, %v6880_v32  ;;  %v1913_v55 = vadd.f32 %v1881_v49, %v1812_v47  ;;  %4422 = vpow2.f32 %v3190_v20 }
 0x305   : > { %4091 = vmatmul.mubr.f32.gmra.mxu1 %v3417_v33  ;;  %v3002_v34 = vmul.f32 %v6836_v12, %v2970_v46  ;;  %v2685_v17 = vmul.f32 0.3275911, %v2653_v50  ;;  %v2487_v48 = vmul.f32 %v6575_v62, %v6884_v30  ;;  %v2907_v51 = vadd.f32 1.4214138, %v2875_v7  ;;  %v6921_v46 = vld [vmem:[#allocation2 + $0x18a] sm:$0xff] }
 0x306   : > { %v2418_v37 = vadd.f32 %v2386_v36, %v2317_v38  ;;  %v2014_v58 = vadd.f32 %v1982_v42, %v1913_v55  ;;  %v2083_v52 = vmul.f32 %v6582_v22, %v6829_v56  ;;  %v3101_v10 = vsub.f32 0.0, %v2653_v50 }
 0x307   : > { %v3034_v31 = vadd.f32 0.2548296, %v3002_v34  ;;  %v2717_v3 = vadd.f32 1.0, %v2685_v17  ;;  %v2184_v18 = vmul.f32 %v6589_v6, %v6841_v2  ;;  %v6902_v5 = vpop.eup %4416  ;;  %vm3290_vm12 = vcmp.ge.f32.partialorder %v6760_v57, 0.0  ;;  %v4466_v57 = vld [vmem:[#allocation2] sm:$0xff] }
 0x308   : > { %v2939_v20 = vmul.f32 %v6862_v44, %v2907_v51  ;;  %v2519_v24 = vadd.f32 %v2487_v48, %v2418_v37  ;;  %v2115_v60 = vadd.f32 %v2083_v52, %v2014_v58  ;;  %v2286_v11 = vmul.f32 %v6562_v53, %v6896_v61 }
 0x309   : > { %v4419_v29 = vpop.eup %4418  ;;  %v3066_v59 = vmul.f32 %v6836_v12, %v3034_v31  ;;  %v2812_v8 = vmul.f32 1.0614054, %v6902_v5  ;;  %4424 = vrcp.f32 %v2717_v3  ;;  %v1680_v28 = vmul.f32 %v6519_v27, %v6772_v15 }
 0x30a   : > { %v2971_v26 = vadd.f32 -0.28449672, %v2939_v20  ;;  %v6915_v49 = vadd.f32 %v6640_v21, %v2519_v24  ;;  %v2216_v39 = vadd.f32 %v2184_v18, %v2115_v60  ;;  %v1781_v0 = vmul.f32 %v6529_v23, %v6777_v19 }
 0x30b   : > { %v3226_v47 = vmul.f32 %v4419_v29, %v3066_v59  ;;  %v2844_v42 = vadd.f32 -1.4531521, %v2812_v8  ;;  %v3133_v33 = vmul.f32 %v3101_v10, %v2653_v50  ;;  %v2387_v12 = vmul.f32 %v6615_v13, %v6908_v16 }
 0x30c   : > { %v3003_v7 = vmul.f32 %v6862_v44, %v2971_v26  ;;  %v6925_v15 = vmul.f32 0.70710677, %v6915_v49  ;;  %v2318_v38 = vadd.f32 %v2286_v11, %v2216_v39  ;;  %v1882_v36 = vmul.f32 %v6549_v25, %v6793_v1 }
 0x30d   : > { %v3258_v55 = vsub.f32 1.0, %v3226_v47  ;;  %v2876_v19 = vmul.f32 %v6902_v5, %v2844_v42  ;;  %v1813_v34 = vadd.f32 %v1781_v0, %v1680_v28  ;;  %v1983_v50 = vmul.f32 %v6505_v14, %v6855_v40 }
 0x30e   : > { %v3035_v17 = vadd.f32 0.2548296, %v3003_v7  ;;  %v2654_v48 = vand.u32 2147483647, %v6925_v15  ;;  %v2419_v51 = vadd.f32 %v2387_v12, %v2318_v38  ;;  %v2488_v37 = vmul.f32 %v6575_v62, %v6921_v46 }
 0x30f   : > { %v3322_v58 = vsub.f32 0.0, %v3258_v55  ;;  %v2908_v52 = vadd.f32 1.4214138, %v2876_v19  ;;  %v3192_v31 = vmul.f32 1.442695, %v3133_v33  ;;  %v1914_v3 = vadd.f32 %v1882_v36, %v1813_v34  ;;  %v4421_v10 = vpop.eup %4420  ;;  %v2352_v33 = vld [vmem:[#allocation2 + $0x199] sm:$0xff] }
 0x310   : > { %v3067_v1 = vmul.f32 %v6862_v44, %v3035_v17  ;;  %v2686_v18 = vmul.f32 0.3275911, %v2654_v48  ;;  %v2520_v20 = vadd.f32 %v2488_v37, %v2419_v51  ;;  %v2084_v24 = vmul.f32 %v6582_v22, %v6880_v32  ;;  %v6943_v44 = vpop.f32.mrf.mxu0  ;;  %v2453_v19 = vld [vmem:[#allocation2 + $0x19a] sm:$0xff] }
 0x311   : > { %v3354_v40 = vsel %vm3290_vm12, %v3258_v55, %v3322_v58  ;;  %v2940_v60 = vmul.f32 %v6902_v5, %v2908_v52  ;;  %v3102_v11 = vsub.f32 0.0, %v2654_v48  ;;  %v2015_v29 = vadd.f32 %v1983_v50, %v1914_v3  ;;  %v4423_v59 = vpop.eup %4422 }
 0x312   : > { %v3386_v8 = vadd.f32 1.0, %v3354_v40  ;;  %v3227_v28 = vmul.f32 %v4421_v10, %v3067_v1  ;;  %v2718_v26 = vadd.f32 1.0, %v2686_v18  ;;  %v2185_v39 = vmul.f32 %v6589_v6, %v6884_v30 }
 0x313   : > { %v2972_v0 = vadd.f32 -0.28449672, %v2940_v60  ;;  %v6946_v47 = vadd.f32 %v6640_v21, %v2520_v20  ;;  %v2116_v32 = vadd.f32 %v2084_v24, %v2015_v29  ;;  %v6949_v42 = vmul.f32 %v4466_v57, %v6562_v53 }
 0x314   : > { %v3418_v12 = vmul.f32 %v3386_v8, %v6853_v63  ;;  %v2587_v7 = vmul.f32 0.5, %v6781_v43  ;;  %v3259_v38 = vsub.f32 1.0, %v3227_v28  ;;  %4426 = vrcp.f32 %v2718_v26  ;;  %v3515_v43 = vpop.f32.mrf.mxu0 }
 0x315   : > { %vm3291_vm13 = vcmp.ge.f32.partialorder %v6789_v45, 0.0  ;;  %v3004_v30 = vmul.f32 %v6902_v5, %v2972_v0  ;;  %v6956_v36 = vmul.f32 0.70710677, %v6946_v47  ;;  %v2217_v55 = vadd.f32 %v2185_v39, %v2116_v32 }
 0x316   : > { %v6958_v34 = vpop.eup %4424  ;;  %4093 = vmatprep.mubr.f32.mxu1 %v3418_v12  ;;  %v3323_v53 = vsub.f32 0.0, %v3259_v38  ;;  %4428 = vpow2.f32 %v3192_v31  ;;  %v3134_v50 = vmul.f32 %v3102_v11, %v2654_v48  ;;  %v2388_v63 = vmul.f32 %v6615_v13, %v2352_v33  ;;  %v4062_v11 = vpop.f32.mrf.mxu0 }
 0x317   : > { %v3036_v17 = vadd.f32 0.2548296, %v3004_v30  ;;  %v2813_v51 = vmul.f32 1.0614054, %v6958_v34  ;;  %v6963_v37 = vand.u32 2147483647, %v6956_v36  ;;  %v2319_v58 = vadd.f32 %v6949_v42, %v2217_v55 }
 0x318   : > { %v3355_v52 = vsel %vm3291_vm13, %v3259_v38, %v3323_v53  ;;  %v2489_v3 = vmul.f32 %v6575_v62, %v2453_v19  ;;  %v1681_v31 = vmul.f32 %v6519_v27, %v6819_v35  ;;  %v1782_v48 = vmul.f32 %v6529_v23, %v6829_v56  ;;  %v3525_v32 = vpop.f32.mrf.mxu0  ;;  %v2454_v38 = vld [vmem:[#allocation2 + $0x1a2] sm:$0xff] }
 0x319   : > { %v3387_v10 = vadd.f32 1.0, %v3355_v52  ;;  %v3068_v1 = vmul.f32 %v6902_v5, %v3036_v17  ;;  %v2845_v18 = vadd.f32 -1.4531521, %v2813_v51  ;;  %v2687_v20 = vmul.f32 0.3275911, %v6963_v37  ;;  %v4467_v52 = vld [vmem:[%s4743_s15 + $0x8] sm:$0xff] }
 0x31a   : > { %v3194_v24 = vmul.f32 1.442695, %v3134_v50  ;;  %v2420_v40 = vadd.f32 %v2388_v63, %v2319_v58  ;;  %v1814_v60 = vadd.f32 %v1782_v48, %v1681_v31  ;;  %v1883_v45 = vmul.f32 %v6549_v25, %v6841_v2 }
 0x31b   : > { %v3419_v29 = vmul.f32 %v3387_v10, %v2587_v7  ;;  %v3228_v8 = vmul.f32 %v4423_v59, %v3068_v1  ;;  %v2877_v27 = vmul.f32 %v6958_v34, %v2845_v18  ;;  %v2719_v35 = vadd.f32 1.0, %v2687_v20  ;;  %v6989_v59 = vld [vmem:[%s7231_s6] ss:$0 sm:$0xff]  ;;  %v4068_v19 = vpop.f32.mrf.mxu1 }
 0x31c   : > { %v2521_v28 = vadd.f32 %v2489_v3, %v2420_v40  ;;  %v1915_v23 = vadd.f32 %v1883_v45, %v1814_v60  ;;  %v1984_v56 = vmul.f32 %v6505_v14, %v6896_v61  ;;  %v2588_v39 = vmul.f32 0.5, %v6811_v9  ;;  %v2353_v9 = vld [vmem:[#allocation2 + $0x1a1] sm:$0xff] }
 0x31d   : > { %4094 = vmatmul.mubr.f32.gmra.mxu1 %v3419_v29  ;;  %v3260_v5 = vsub.f32 1.0, %v3228_v8  ;;  %v2909_v26 = vadd.f32 1.4214138, %v2877_v27  ;;  %4430 = vrcp.f32 %v2719_v35  ;;  %v2085_v2 = vmul.f32 %v6582_v22, %v6908_v16  ;;  %v4469_v35 = vld [vmem:[%s4743_s15 + $0x18] sm:$0xff] }
 0x31e   : > { %v6982_v0 = vadd.f32 %v6640_v21, %v2521_v28  ;;  %v2016_v25 = vadd.f32 %v1984_v56, %v1915_v23  ;;  %vm3292_vm14 = vcmp.ge.f32.partialorder %v6815_v54, 0.0  ;;  %4432 = vpow2.f32 %v3194_v24  ;;  %v4470_v28 = vld [vmem:[%s4743_s15 + $0x10] sm:$0xff] }
 0x31f   : > { %v3324_v14 = vsub.f32 0.0, %v3260_v5  ;;  %v2941_v61 = vmul.f32 %v6958_v34, %v2909_v26  ;;  %v3103_v57 = vsub.f32 0.0, %v6963_v37  ;;  %v2186_v22 = vmul.f32 %v6589_v6, %v6921_v46  ;;  %v4065_v46 = vpop.f32.mrf.mxu0 }
 0x320   : > { %v6995_v33 = vmul.f32 0.70710677, %v6982_v0  ;;  %v2117_v12 = vadd.f32 %v2085_v2, %v2016_v25  ;;  %v3521_v30 = vadd.f32 %v6943_v44, %v6989_v59  ;;  %v3516_v55 = vadd.f32 %v6989_v59, %v3515_v43  ;;  %v4468_v44 = vld [vmem:[%s4743_s15] sm:$0xff] }
 0x321   : > { %v6999_v16 = vpop.eup %4426  ;;  %v3356_v7 = vsel %vm3292_vm14, %v3260_v5, %v3324_v14  ;;  %v2973_v54 = vadd.f32 -0.28449672, %v2941_v61  ;;  %v2389_v6 = vmul.f32 %v6615_v13, %v2353_v9  ;;  %v2490_v1 = vmul.f32 %v6575_v62, %v2454_v38  ;;  %v3545_v62 = vpop.f32.mrf.mxu1  ;;  %v4471_v5 = vld [vmem:[%s4743_s15 + $0x28] sm:$0xff] }
 0x322   : > { %v3388_v53 = vadd.f32 1.0, %v3356_v7  ;;  %v2814_v50 = vmul.f32 1.0614054, %v6999_v16  ;;  %v7006_v63 = vand.u32 2147483647, %v6995_v33  ;;  %v2218_v58 = vadd.f32 %v2186_v22, %v2117_v12  ;;  %v3535_v29 = vpop.f32.mrf.mxu0 }
 0x323   : > { %v4429_v17 = vpop.eup %4428  ;;  %v3005_v51 = vmul.f32 %v6958_v34, %v2973_v54  ;;  %v3675_v3 = vadd.f32 %v4467_v52, %v3521_v30  ;;  %v3674_v31 = vadd.f32 %v4468_v44, %v3516_v55  ;;  %v3531_v13 = vadd.f32 %v4062_v11, %v6989_v59  ;;  %v4472_v54 = vld [vmem:[%s4743_s15 + $0x20] sm:$0xff] }
 0x324   : > { %v3420_v43 = vmul.f32 %v3388_v53, %v2588_v39  ;;  %v2846_v48 = vadd.f32 -1.4531521, %v2814_v50  ;;  %v2688_v10 = vmul.f32 0.3275911, %v7006_v63  ;;  %v2320_v20 = vadd.f32 %v6949_v42, %v2218_v58  ;;  %v4473_v53 = vld [vmem:[%s4743_s15 + $0x38] sm:$0xff] }
 0x325   : > { %v3037_v18 = vadd.f32 0.2548296, %v3005_v51  ;;  %3707 = vst.msk [vmem:[%s7017_s9 + $0x8] sm:$0xff] %vm340_vm0, %v3675_v3  ;;  %3706 = vst.msk [vmem:[%s7017_s9] sm:$0xff] %vm340_vm0, %v3674_v31  ;;  %v3526_v24 = vadd.f32 %v6989_v59, %v3525_v32  ;;  %v3135_v42 = vmul.f32 %v3103_v57, %v6963_v37  ;;  %v3541_v45 = vadd.f32 %v4065_v46, %v6989_v59 }
 0x326   : > { %4096 = vmatprep.mubr.f32.mxu1 %v3420_v43  ;;  %v2878_v40 = vmul.f32 %v6999_v16, %v2846_v48  ;;  %v2720_v60 = vadd.f32 1.0, %v2688_v10  ;;  %v2421_v27 = vadd.f32 %v2389_v6, %v2320_v20  ;;  %v3677_v11 = vadd.f32 %v4469_v35, %v3531_v13  ;;  %v4474_v6 = vld [vmem:[%s4743_s15 + $0x30] sm:$0xff]  ;;  %v4476_v20 = vld [vmem:[%s4743_s15 + $0x40] sm:$0xff] }
 0x327   : > { %v3069_v8 = vmul.f32 %v6958_v34, %v3037_v18  ;;  %v3676_v23 = vadd.f32 %v4470_v28, %v3526_v24  ;;  %v3679_v26 = vadd.f32 %v4471_v5, %v3541_v45  ;;  %v3536_v25 = vadd.f32 %v6989_v59, %v3535_v29 }
 0x328   : > { %v2910_v56 = vadd.f32 1.4214138, %v2878_v40  ;;  %4434 = vrcp.f32 %v2720_v60  ;;  %v2522_v37 = vadd.f32 %v2490_v1, %v2421_v27  ;;  %3709 = vst.msk [vmem:[%s7017_s9 + $0x18] sm:$0xff] %vm340_vm0, %v3677_v11  ;;  %v3551_v34 = vadd.f32 %v4068_v19, %v6989_v59 }
 0x329   : > { %v3229_v39 = vmul.f32 %v4429_v17, %v3069_v8  ;;  %3708 = vst.msk [vmem:[%s7017_s9 + $0x10] sm:$0xff] %vm340_vm0, %v3676_v23  ;;  %v4071_v2 = vpop.f32.mrf.mxu1  ;;  %v3196_v61 = vmul.f32 1.442695, %v3135_v42  ;;  %3711 = vst.msk [vmem:[%s7017_s9 + $0x28] sm:$0xff] %vm340_vm0, %v3679_v26  ;;  %v3546_v9 = vadd.f32 %v6989_v59, %v3545_v62  ;;  %v3678_v38 = vadd.f32 %v4472_v54, %v3536_v25  ;;  %v4475_v17 = vld [vmem:[%s4743_s15 + $0x48] sm:$0xff] }
 0x32a   : > { %v7038_v32 = vpop.eup %4430  ;;  %v2942_v14 = vmul.f32 %v6999_v16, %v2910_v56  ;;  %v3561_v57 = vadd.f32 %v4071_v2, %v6989_v59  ;;  %v7047_v7 = vadd.f32 %v6640_v21, %v2522_v37  ;;  %v3681_v50 = vadd.f32 %v4473_v53, %v3551_v34 }
 0x32b   : > { %v3261_v12 = vsub.f32 1.0, %v3229_v39  ;;  %v2815_v22 = vmul.f32 1.0614054, %v7038_v32  ;;  %v3555_v30 = vpop.f32.mrf.mxu1  ;;  %v4433_v55 = vpop.eup %4432  ;;  %v3680_v46 = vadd.f32 %v4474_v6, %v3546_v9  ;;  %3710 = vst.msk [vmem:[%s7017_s9 + $0x20] sm:$0xff] %vm340_vm0, %v3678_v38  ;;  %vm3293_vm15 = vcmp.ge.f32.partialorder %v6878_v41, 0.0 }
 0x32c   : > { %v2974_v19 = vadd.f32 -0.28449672, %v2942_v14  ;;  %v3683_v51 = vadd.f32 %v4475_v17, %v3561_v57  ;;  %v7054_v3 = vmul.f32 0.70710677, %v7047_v7  ;;  %v3104_v44 = vsub.f32 0.0, %v7006_v63  ;;  %3713 = vst.msk [vmem:[%s7017_s9 + $0x38] sm:$0xff] %vm340_vm0, %v3681_v50 }
 0x32d   : > { %v3325_v58 = vsub.f32 0.0, %v3261_v12  ;;  %v2847_v52 = vadd.f32 -1.4531521, %v2815_v22  ;;  %3712 = vst.msk [vmem:[%s7017_s9 + $0x30] sm:$0xff] %vm340_vm0, %v3680_v46  ;;  %v3556_v31 = vadd.f32 %v6989_v59, %v3555_v30  ;;  %4436 = vpow2.f32 %v3196_v61 }
 0x32e   : > { %v3006_v21 = vmul.f32 %v6999_v16, %v2974_v19  ;;  %3715 = vst.msk [vmem:[%s7017_s9 + $0x48] sm:$0xff] %vm340_vm0, %v3683_v51  ;;  %v2657_v10 = vand.u32 2147483647, %v7054_v3  ;;  %v2589_v41 = vmul.f32 0.5, %v6865_v4  ;;  %v3136_v60 = vmul.f32 %v3104_v44, %v7006_v63 }
 0x32f   : > { %v3357_v43 = vsel %vm3293_vm15, %v3261_v12, %v3325_v58  ;;  %v2879_v48 = vmul.f32 %v7038_v32, %v2847_v52  ;;  %v3682_v13 = vadd.f32 %v4476_v20, %v3556_v31  ;;  %vm3294_vm1 = vcmp.ge.f32.partialorder %v6925_v15, 0.0 }
 0x330   : > { %v3389_v1 = vadd.f32 1.0, %v3357_v43  ;;  %v3038_v18 = vadd.f32 0.2548296, %v3006_v21  ;;  %v2689_v62 = vmul.f32 0.3275911, %v2657_v10  ;;  %v2590_v39 = vmul.f32 0.5, %v6915_v49 }
 0x331   : > { %v2911_v24 = vadd.f32 1.4214138, %v2879_v48  ;;  %3714 = vst.msk [vmem:[%s7017_s9 + $0x40] sm:$0xff] %vm340_vm0, %v3682_v13  ;;  %v3198_v28 = vmul.f32 1.442695, %v3136_v60  ;;  %v3105_v34 = vsub.f32 0.0, %v2657_v10 }
 0x332   : > { %v3421_v40 = vmul.f32 %v3389_v1, %v2589_v41  ;;  %v3070_v42 = vmul.f32 %v6999_v16, %v3038_v18  ;;  %v2721_v29 = vadd.f32 1.0, %v2689_v62  ;;  %vm3295_vm2 = vcmp.ge.f32.partialorder %v6956_v36, 0.0  ;;  %v4477_v43 = vld [vmem:[%s4743_s15 + $0x58] sm:$0xff]  ;;  %v4478_v1 = vld [vmem:[%s4743_s15 + $0x50] sm:$0xff] }
 0x333   : > { %v2943_v45 = vmul.f32 %v7038_v32, %v2911_v24  ;;  %v3137_v22 = vmul.f32 %v3105_v34, %v2657_v10  ;;  %vm3296_vm3 = vcmp.ge.f32.partialorder %v6995_v33, 0.0  ;;  %v2592_v62 = vmul.f32 0.5, %v6982_v0 }
 0x334   : > { %4097 = vmatmul.mubr.f32.gmra.mxu1 %v3421_v40  ;;  %v3230_v8 = vmul.f32 %v4433_v55, %v3070_v42  ;;  %4438 = vrcp.f32 %v2721_v29  ;;  %vm3297_vm4 = vcmp.ge.f32.partialorder %v7054_v3, 0.0 }
 0x335   : > { %v4435_v27 = vpop.eup %4434  ;;  %v2975_v4 = vadd.f32 -0.28449672, %v2943_v45  ;;  %4440 = vpow2.f32 %v3198_v28  ;;  %v3200_v19 = vmul.f32 1.442695, %v3137_v22 }
 0x336   : > { %v3262_v35 = vsub.f32 1.0, %v3230_v8  ;;  %v2816_v11 = vmul.f32 1.0614054, %v4435_v27 }
 0x337   : > { %v3007_v23 = vmul.f32 %v7038_v32, %v2975_v4  ;;  %4442 = vpow2.f32 %v3200_v19 }
 0x338   : > { %v3326_v56 = vsub.f32 0.0, %v3262_v35  ;;  %v2848_v5 = vadd.f32 -1.4531521, %v2816_v11 }
 0x339   : > { %v3039_v16 = vadd.f32 0.2548296, %v3007_v23  ;;  %v4479_v23 = vld [vmem:[%s4743_s15 + $0x68] sm:$0xff] }
 0x33a   : > { %v3358_v63 = vsel %vm3294_vm1, %v3262_v35, %v3326_v56  ;;  %v2880_v26 = vmul.f32 %v4435_v27, %v2848_v5  ;;  %v4437_v2 = vpop.eup %4436 }
 0x33b   : > { %v3390_v37 = vadd.f32 1.0, %v3358_v63  ;;  %v3071_v25 = vmul.f32 %v7038_v32, %v3039_v16  ;;  %v2591_v32 = vmul.f32 0.5, %v6946_v47  ;;  %v2593_v16 = vmul.f32 0.5, %v7047_v7 }
 0x33c   : > { %v2912_v14 = vadd.f32 1.4214138, %v2880_v26  ;;  %v4480_v26 = vld [vmem:[%s4743_s15 + $0x60] sm:$0xff] }
 0x33d   : > { %v3422_v61 = vmul.f32 %v3390_v37, %v2590_v39  ;;  %v3231_v9 = vmul.f32 %v4437_v2, %v3071_v25  ;;  %v4481_v2 = vld [vmem:[%s4743_s15 + $0x78] sm:$0xff] }
 0x33e   : > { %v2944_v57 = vmul.f32 %v4435_v27, %v2912_v14 }
 0x33f   : > { %4099 = vmatprep.mubr.f32.mxu1 %v3422_v61  ;;  %v3263_v12 = vsub.f32 1.0, %v3231_v9  ;;  %v4482_v61 = vld [vmem:[%s4743_s15 + $0x70] sm:$0xff] }
 0x340   : > { %v2976_v54 = vadd.f32 -0.28449672, %v2944_v57 }
 0x341   : > { %v3327_v15 = vsub.f32 0.0, %v3263_v12  ;;  %v4439_v38 = vpop.eup %4438 }
 0x342   : > { %v3008_v30 = vmul.f32 %v4435_v27, %v2976_v54  ;;  %v2817_v49 = vmul.f32 1.0614054, %v4439_v38  ;;  %v4441_v58 = vpop.eup %4440  ;;  %v4483_v54 = vld [vmem:[%s4743_s15 + $0x88] sm:$0xff] }
 0x343   : > { %v3359_v55 = vsel %vm3295_vm2, %v3263_v12, %v3327_v15 }
 0x344   : > { %v3391_v53 = vadd.f32 1.0, %v3359_v55  ;;  %v3040_v50 = vadd.f32 0.2548296, %v3008_v30  ;;  %v2849_v6 = vadd.f32 -1.4531521, %v2817_v49  ;;  %v4443_v8 = vpop.eup %4442  ;;  %v4484_v30 = vld [vmem:[%s4743_s15 + $0x80] sm:$0xff] }
 0x346   : > { %v3423_v46 = vmul.f32 %v3391_v53, %v2591_v32  ;;  %v3072_v17 = vmul.f32 %v4435_v27, %v3040_v50  ;;  %v4074_v51 = vpop.f32.mrf.mxu1  ;;  %v2881_v52 = vmul.f32 %v4439_v38, %v2849_v6  ;;  %v4485_v53 = vld [vmem:[%s4743_s15 + $0x98] sm:$0xff] }
 0x347   : > { %v3571_v36 = vadd.f32 %v4074_v51, %v6989_v59 }
 0x348   : > { %4100 = vmatmul.mubr.f32.gmra.mxu1 %v3423_v46  ;;  %v3232_v21 = vmul.f32 %v4441_v58, %v3072_v17  ;;  %v3565_v44 = vpop.f32.mrf.mxu1  ;;  %v2913_v31 = vadd.f32 1.4214138, %v2881_v52  ;;  %v4486_v46 = vld [vmem:[%s4743_s15 + $0x90] sm:$0xff] }
 0x349   : > { %v3685_v47 = vadd.f32 %v4477_v43, %v3571_v36  ;;  %v3566_v48 = vadd.f32 %v6989_v59, %v3565_v44  ;;  %v4487_v36 = vld [vmem:[%s4743_s15 + $0xa8] sm:$0xff] }
 0x34a   : > { %v3264_v10 = vsub.f32 1.0, %v3232_v21  ;;  %v2945_v41 = vmul.f32 %v4439_v38, %v2913_v31  ;;  %v4488_v31 = vld [vmem:[%s4743_s15 + $0xa0] sm:$0xff] }
 0x34b   : > { %3717 = vst.msk [vmem:[%s7017_s9 + $0x58] sm:$0xff] %vm340_vm0, %v3685_v47  ;;  %v3684_v18 = vadd.f32 %v4478_v1, %v3566_v48 }
 0x34c   : > { %v3328_v20 = vsub.f32 0.0, %v3264_v10  ;;  %v2977_v13 = vadd.f32 -0.28449672, %v2945_v41  ;;  %v4489_v41 = vld [vmem:[%s4743_s15 + $0xb8] sm:$0xff] }
 0x34d   : > { %3716 = vst.msk [vmem:[%s7017_s9 + $0x50] sm:$0xff] %vm340_vm0, %v3684_v18 }
 0x34e   : > { %v3360_v24 = vsel %vm3296_vm3, %v3264_v10, %v3328_v20  ;;  %v3009_v42 = vmul.f32 %v4439_v38, %v2977_v13  ;;  %v4490_v20 = vld [vmem:[%s4743_s15 + $0xb0] sm:$0xff] }
 0x34f   : > { %v3392_v40 = vadd.f32 1.0, %v3360_v24 }
 0x350   : > { %v3041_v45 = vadd.f32 0.2548296, %v3009_v42  ;;  %v4491_v42 = vld [vmem:[%s4743_s15 + $0xc8] sm:$0xff] }
 0x351   : > { %v3424_v60 = vmul.f32 %v3392_v40, %v2592_v62 }
 0x352   : > { %v3073_v29 = vmul.f32 %v4439_v38, %v3041_v45 }
 0x353   : > { %4102 = vmatprep.mubr.f32.mxu1 %v3424_v60 }
 0x354   : > { %v3233_v27 = vmul.f32 %v4443_v8, %v3073_v29  ;;  %v4492_v29 = vld [vmem:[%s4743_s15 + $0xc0] sm:$0xff] }
 0x356   : > { %v3265_v4 = vsub.f32 1.0, %v3233_v27 }
 0x358   : > { %v4077_v33 = vpop.f32.mrf.mxu1  ;;  %v3329_v35 = vsub.f32 0.0, %v3265_v4 }
 0x359   : > { %v3581_v11 = vadd.f32 %v4077_v33, %v6989_v59 }
 0x35a   : > { %v3575_v0 = vpop.f32.mrf.mxu1  ;;  %v3361_v28 = vsel %vm3297_vm4, %v3265_v4, %v3329_v35  ;;  %v4493_v35 = vld [vmem:[%s4743_s15 + $0xd8] sm:$0xff] }
 0x35b   : > { %v3687_v56 = vadd.f32 %v4479_v23, %v3581_v11  ;;  %v3576_v5 = vadd.f32 %v6989_v59, %v3575_v0  ;;  %v3393_v63 = vadd.f32 1.0, %v3361_v28  ;;  %v4494_v28 = vld [vmem:[%s4743_s15 + $0xd0] sm:$0xff] }
 0x35d   : > { %3719 = vst.msk [vmem:[%s7017_s9 + $0x68] sm:$0xff] %vm340_vm0, %v3687_v56  ;;  %v3686_v39 = vadd.f32 %v4480_v26, %v3576_v5  ;;  %v3425_v37 = vmul.f32 %v3393_v63, %v2593_v16  ;;  %v4495_v63 = vld [vmem:[%s4743_s15 + $0xe8] sm:$0xff] }
 0x35f   : > { %3718 = vst.msk [vmem:[%s7017_s9 + $0x60] sm:$0xff] %vm340_vm0, %v3686_v39  ;;  %4103 = vmatmul.mubr.f32.gmra.mxu1 %v3425_v37  ;;  %v4496_v37 = vld [vmem:[%s4743_s15 + $0xe0] sm:$0xff] }
 0x36e   : > { %v4080_v3 = vpop.f32.mrf.mxu1 }
 0x36f   : > { %v3591_v25 = vadd.f32 %v4080_v3, %v6989_v59 }
 0x370   : > { %v3585_v34 = vpop.f32.mrf.mxu1 }
 0x371   : > { %v3689_v7 = vadd.f32 %v4481_v2, %v3591_v25  ;;  %v3586_v14 = vadd.f32 %v6989_v59, %v3585_v34 }
 0x373   : > { %3721 = vst.msk [vmem:[%s7017_s9 + $0x78] sm:$0xff] %vm340_vm0, %v3689_v7  ;;  %v3688_v9 = vadd.f32 %v4482_v61, %v3586_v14  ;;  %v4497_v7 = vld [vmem:[%s4743_s15 + $0xf8] sm:$0xff] }
 0x375   : > { %3720 = vst.msk [vmem:[%s7017_s9 + $0x70] sm:$0xff] %vm340_vm0, %v3688_v9  ;;  %v4498_v9 = vld [vmem:[%s4743_s15 + $0xf0] sm:$0xff] }
 0x388   : > { %v4083_v57 = vpop.f32.mrf.mxu1 }
 0x389   : > { %v3601_v12 = vadd.f32 %v4083_v57, %v6989_v59 }
 0x38a   : > { %v3595_v22 = vpop.f32.mrf.mxu1 }
 0x38b   : > { %v3691_v15 = vadd.f32 %v4483_v54, %v3601_v12  ;;  %v3596_v38 = vadd.f32 %v6989_v59, %v3595_v22 }
 0x38d   : > { %3723 = vst.msk [vmem:[%s7017_s9 + $0x88] sm:$0xff] %vm340_vm0, %v3691_v15  ;;  %v3690_v55 = vadd.f32 %v4484_v30, %v3596_v38 }
 0x38f   : > { %3722 = vst.msk [vmem:[%s7017_s9 + $0x80] sm:$0xff] %vm340_vm0, %v3690_v55 }
 0x398   : > { %v4086_v49 = vpop.f32.mrf.mxu1 }
 0x399   : > { %v3611_v19 = vadd.f32 %v4086_v49, %v6989_v59 }
 0x39a   : > { %v3605_v32 = vpop.f32.mrf.mxu1 }
 0x39b   : > { %v3693_v50 = vadd.f32 %v4485_v53, %v3611_v19  ;;  %v3606_v6 = vadd.f32 %v6989_v59, %v3605_v32 }
 0x39d   : > { %3725 = vst.msk [vmem:[%s7017_s9 + $0x98] sm:$0xff] %vm340_vm0, %v3693_v50  ;;  %v3692_v17 = vadd.f32 %v4486_v46, %v3606_v6 }
 0x39f   : > { %3724 = vst.msk [vmem:[%s7017_s9 + $0x90] sm:$0xff] %vm340_vm0, %v3692_v17 }
 0x3b3   : > { %v4089_v51 = vpop.f32.mrf.mxu1 }
 0x3b4   : > { %v3621_v58 = vadd.f32 %v4089_v51, %v6989_v59 }
 0x3b5   : > { %v3615_v52 = vpop.f32.mrf.mxu1 }
 0x3b6   : > { %v3695_v21 = vadd.f32 %v4487_v36, %v3621_v58  ;;  %v3616_v44 = vadd.f32 %v6989_v59, %v3615_v52 }
 0x3b8   : > { %3727 = vst.msk [vmem:[%s7017_s9 + $0xa8] sm:$0xff] %vm340_vm0, %v3695_v21  ;;  %v3694_v43 = vadd.f32 %v4488_v31, %v3616_v44 }
 0x3ba   : > { %3726 = vst.msk [vmem:[%s7017_s9 + $0xa0] sm:$0xff] %vm340_vm0, %v3694_v43 }
 0x3c5   : > { %v4092_v47 = vpop.f32.mrf.mxu1 }
 0x3c6   : > { %v3631_v48 = vadd.f32 %v4092_v47, %v6989_v59 }
 0x3c7   : > { %v3625_v10 = vpop.f32.mrf.mxu1 }
 0x3c8   : > { %v3697_v1 = vadd.f32 %v4489_v41, %v3631_v48  ;;  %v3626_v18 = vadd.f32 %v6989_v59, %v3625_v10 }
 0x3ca   : > { %3729 = vst.msk [vmem:[%s7017_s9 + $0xb8] sm:$0xff] %vm340_vm0, %v3697_v1  ;;  %v3696_v13 = vadd.f32 %v4490_v20, %v3626_v18 }
 0x3cc   : > { %3728 = vst.msk [vmem:[%s7017_s9 + $0xb0] sm:$0xff] %vm340_vm0, %v3696_v13 }
 0x3dd   : > { %v4095_v24 = vpop.f32.mrf.mxu1 }
 0x3de   : > { %v3641_v62 = vadd.f32 %v4095_v24, %v6989_v59 }
 0x3df   : > { %v3635_v40 = vpop.f32.mrf.mxu1 }
 0x3e0   : > { %v3699_v60 = vadd.f32 %v4491_v42, %v3641_v62  ;;  %v3636_v45 = vadd.f32 %v6989_v59, %v3635_v40 }
 0x3e2   : > { %3731 = vst.msk [vmem:[%s7017_s9 + $0xc8] sm:$0xff] %vm340_vm0, %v3699_v60  ;;  %v3698_v8 = vadd.f32 %v4492_v29, %v3636_v45 }
 0x3e4   : > { %3730 = vst.msk [vmem:[%s7017_s9 + $0xc0] sm:$0xff] %vm340_vm0, %v3698_v8 }
 0x3f4   : > { %v4098_v27 = vpop.f32.mrf.mxu1 }
 0x3f5   : > { %v3651_v4 = vadd.f32 %v4098_v27, %v6989_v59 }
 0x3f6   : > { %v3645_v33 = vpop.f32.mrf.mxu1 }
 0x3f7   : > { %v3701_v11 = vadd.f32 %v4493_v35, %v3651_v4  ;;  %v3646_v0 = vadd.f32 %v6989_v59, %v3645_v33 }
 0x3f9   : > { %3733 = vst.msk [vmem:[%s7017_s9 + $0xd8] sm:$0xff] %vm340_vm0, %v3701_v11  ;;  %v3700_v23 = vadd.f32 %v4494_v28, %v3646_v0 }
 0x3fb   : > { %3732 = vst.msk [vmem:[%s7017_s9 + $0xd0] sm:$0xff] %vm340_vm0, %v3700_v23 }
 0x408   : > { %v4101_v56 = vpop.f32.mrf.mxu1 }
 0x409   : > { %v3661_v5 = vadd.f32 %v4101_v56, %v6989_v59 }
 0x40a   : > { %v3655_v16 = vpop.f32.mrf.mxu1 }
 0x40b   : > { %v3703_v26 = vadd.f32 %v4495_v63, %v3661_v5  ;;  %v3656_v39 = vadd.f32 %v6989_v59, %v3655_v16 }
 0x40d   : > { %3735 = vst.msk [vmem:[%s7017_s9 + $0xe8] sm:$0xff] %vm340_vm0, %v3703_v26  ;;  %v3702_v3 = vadd.f32 %v4496_v37, %v3656_v39 }
 0x40f   : > { %3734 = vst.msk [vmem:[%s7017_s9 + $0xe0] sm:$0xff] %vm340_vm0, %v3702_v3 }
 0x41f   : > { %v4104_v25 = vpop.f32.mrf.mxu1 }
 0x420   : > { %v3671_v34 = vadd.f32 %v4104_v25, %v6989_v59 }
 0x421   : > { %v3665_v2 = vpop.f32.mrf.mxu1 }
 0x422   : > { %v3705_v14 = vadd.f32 %v4497_v7, %v3671_v34  ;;  %v3666_v61 = vadd.f32 %v6989_v59, %v3665_v2 }
 0x424   : > { %3737 = vst.msk [vmem:[%s7017_s9 + $0xf8] sm:$0xff] %vm340_vm0, %v3705_v14  ;;  %v3704_v57 = vadd.f32 %v4498_v9, %v3666_v61 }
 0x426   : > { %3736 = vst.msk [vmem:[%s7017_s9 + $0xf0] sm:$0xff] %vm340_vm0, %v3704_v57 }
 0x427   : > { %4540 = shalt.err (!%p4537_p10)
}
 0x428   : > { %s4541_s15 = scalar_lea.hbm %s7175_s20, 4096  ;;  %s4545_s9 = scalar_lea.hbm %s7232_s7, 8192 }
 0x429   : > { %p4542_p0 = scmp.ne.s32.totalorder %s7175_s20, %s4541_s15  ;;  %p4546_p1 = scmp.lt.s32.totalorder %s7175_s20, %s7232_s7 }
 0x42a   : > { %p4547_p3 = scmp.lt.s32.totalorder %s4545_s9, %s4541_s15 }
 0x42b   : > { %p4543_p2 = pnand %p4542_p0, %p7241_p12 }
 0x42c   : > { %p4548_p6 = por %p4547_p3, %p4546_p1 }
 0x42d   : > { %p4544_p9 = pneg %p4543_p2 }
 0x42f   : > { %p4549_p11 = pnand %p4548_p6, %p4544_p9 }
 0x431   : > { %4552 = shalt.err (!%p4549_p11)
}
 0x432   : > { %s4598_s18 = smov 128   ;;  %s4599_s22 = smov 8  }
 0x433   : > { %4139 = dma.vmem_to_hbm [thread:$0]  (%p7241_p12), %s7177_s8, 4096, %s7175_s20, %s3739_s28, %s4598_s18, %s4598_s18, %s4599_s22  }
 0x434 PF: > { %s3767_s23 = sand.u32 1, %s4579_s24   ;;  %p7242_p13 = scmp.ne.s32.totalorder %s7238_s14, 0 }
 0x435   : > { %p7243_p4 = scmp.ge.s32.totalorder %s4591_s27, 2  ;;  %s3768_s29 = scalar_lea.sflag [#allocation5], %s3767_s23 }
 0x437   : > { %p4146_p5 = pnand %p7243_p4, %p7242_p13 }
 0x439   : > { %p4147_p7 = pneg %p4146_p5 }
 0x43b   : > { %4574 = dma.done.wait (%p4147_p7), %s3768_s29, 4096  }
 0x43c   : > { %4576 = vsyncadd (%p4147_p7), %s3768_s29, 4294963200  ;;  %p20_p8 = scmp.ge.s32.totalorder %s4665_s30, 4   ;;  %s7244_s24 = smov %s4583_s25 }
 0x43d   : > { %s7245_s25 = smov %s4587_s26  ;;  %s7246_s26 = smov %s4677_s10 }
 0x43e   : > { %s7247_s27 = smov %s4665_s30  ;;  %22 = sbr.rel (!%p20_p8) target bundleno = 5 (0x5), region = 95 }
 0x443   :  { %3773 = vsyncpa [#allocation4], 1 }
 0x444   :  { %3775 = vsyncpa [#allocation4 + $0x1], 1 }
 0x445   :  { %3776 = vsyncpa [#allocation5], 1 }
 0x446   :  { %3778 = vsyncpa [#allocation5 + $0x1], 1 }

</bundles_post_ra>
